<compile_context>
chip_gen: v7x
topology: tpu7x:2x2x1
jax: 0.10.0
libtpu: 0.0.40
codegen_flags: <defaults>
</compile_context>

<pallas_src>
import jax
import jax.numpy as jnp
from jax.experimental import pallas as pl
from jax.experimental.pallas import tpu as pltpu

EMBEDDING_DIM = 64
NUM_USERS = 1000
NUM_ITEMS = 1000
MAX_TILE_B = 1024  # upper bound on batch rows per grid step


def _fused_kernel(uid_ref, iid_ref, hi_ref, lo_ref, w2t_ref, b2_ref, w3_ref,
                  b3_ref, o_ref):
    tile_b = uid_ref.shape[1]          # batch tile (lane axis)
    two_r = hi_ref.shape[1]            # 2 * padded table rows
    r_pad = two_r // 2

    # Merged one-hot gather: rows [0, r_pad) match the user id, rows
    # [r_pad, 2*r_pad) match the item id.  Built on the VPU, consumed by the MXU.
    row_ids = jax.lax.broadcasted_iota(jnp.int32, (two_r, tile_b), 0)
    match = (row_ids == uid_ref[...]) | (row_ids == (iid_ref[...] + r_pad))
    onehot = jnp.where(match, jnp.float32(1.0), jnp.float32(0.0)).astype(jnp.bfloat16)

    # Layer 1 (folded into the tables, bias folded into the user half).
    # bf16 hi/lo split keeps ~f32 table precision at ~2 bf16 MXU passes.
    h1 = jnp.dot(hi_ref[...], onehot, preferred_element_type=jnp.float32)
    h1 = h1 + jnp.dot(lo_ref[...], onehot, preferred_element_type=jnp.float32)
    h1 = jnp.maximum(h1, 0.0)                                   # (64, B)

    # Layer 2: (32, 64) @ (64, B) -> (32, B)
    h2 = jnp.dot(w2t_ref[...], h1, preferred_element_type=jnp.float32)
    h2 = jnp.maximum(h2 + b2_ref[...], 0.0)                     # (32, B)

    # Layer 3 (32 -> 1) on VPU/XLU: weighted sublane reduce, lane-dense store.
    o_ref[...] = jnp.sum(h2 * w3_ref[...], axis=0, keepdims=True) + b3_ref[0]


def fold_params(params):
    """One-time fold of the module params into kernel-ready operands."""
    user_table, item_table, w1, b1, w2, b2, w3, b3 = params

    # Fold layer 1 into the tables; fold b1 into the user half.
    u_proj_t = (user_table @ w1[:EMBEDDING_DIM, :]).T + b1.reshape(-1, 1)  # (64, U)
    i_proj_t = (item_table @ w1[EMBEDDING_DIM:, :]).T                      # (64, I)

    r_pad = pl.cdiv(max(NUM_USERS, NUM_ITEMS), 128) * 128
    u_proj_t = jnp.pad(u_proj_t, ((0, 0), (0, r_pad - NUM_USERS)))
    i_proj_t = jnp.pad(i_proj_t, ((0, 0), (0, r_pad - NUM_ITEMS)))
    table = jnp.concatenate([u_proj_t, i_proj_t], axis=1)                  # (64, 2*r_pad)

    # bf16 hi/lo split: hi + lo reconstructs the f32 table to ~2^-16 relative.
    table_hi = table.astype(jnp.bfloat16)
    table_lo = (table - table_hi.astype(jnp.float32)).astype(jnp.bfloat16)

    return {
        "table_hi": table_hi,                   # (64, 2*r_pad) bf16
        "table_lo": table_lo,                   # (64, 2*r_pad) bf16
        "w2_t": w2.T,                           # (32, 64) f32
        "b2_col": b2.reshape(-1, 1),            # (32, 1)
        "w3_col": w3.reshape(-1, 1),            # (32, 1)
        "b3_s": b3.reshape(1),                  # (1,) -> SMEM scalar
    }


def _pick_tile(b, max_tile=MAX_TILE_B):
    """Small-batch fast path + >=2 tiles for v7x megacore when the batch allows."""
    units = pl.cdiv(b, 128)                     # number of 128-row units needed
    if units * 128 <= max_tile:
        if units >= 2:                          # split in two so both TCs get work
            units = pl.cdiv(units, 2)
        return units * 128
    return max_tile


def recsys_forward(user_id, item_id, folded, max_tile=MAX_TILE_B):
    """Forward pass. user_id/item_id: int (B,). Returns (B, 1) f32."""
    b = user_id.shape[0]
    tile_b = _pick_tile(b, max_tile)
    n_tiles = pl.cdiv(b, tile_b)
    b_pad = n_tiles * tile_b

    # Clamp ids (nn.Embedding would error on OOB; avoid a silent zero embedding).
    uid = jnp.clip(user_id.astype(jnp.int32), 0, NUM_USERS - 1)
    iid = jnp.clip(item_id.astype(jnp.int32), 0, NUM_ITEMS - 1)
    uid = jnp.zeros((1, b_pad), jnp.int32).at[0, :b].set(uid)
    iid = jnp.zeros((1, b_pad), jnp.int32).at[0, :b].set(iid)

    stream = pl.BlockSpec((1, tile_b), lambda i: (0, i))        # ids in / scores out
    resident = lambda arr: pl.BlockSpec(arr.shape, lambda i: (0, 0))

    out = pl.pallas_call(
        _fused_kernel,
        out_shape=jax.ShapeDtypeStruct((1, b_pad), jnp.float32),
        grid=(n_tiles,),
        in_specs=[
            stream, stream,
            resident(folded["table_hi"]), resident(folded["table_lo"]),
            resident(folded["w2_t"]), resident(folded["b2_col"]),
            resident(folded["w3_col"]),
            pl.BlockSpec((1,), lambda i: (0,), memory_space=pltpu.MemorySpace.SMEM),
        ],
        out_specs=stream,
        compiler_params=pltpu.CompilerParams(
            dimension_semantics=("parallel",),
            # Only the big-tile path needs extra scoped VMEM headroom.
            vmem_limit_bytes=(48 * 1024 * 1024) if tile_b > 512 else None,
        ),
    )(uid, iid, folded["table_hi"], folded["table_lo"], folded["w2_t"],
      folded["b2_col"], folded["w3_col"], folded["b3_s"])

    return out[0, :b].reshape(b, 1)


def init_params(key):
    """Deterministic synthetic parameters matching the PyTorch module's shapes."""
    ks = jax.random.split(key, 8)
    user_table = jax.random.normal(ks[0], (NUM_USERS, EMBEDDING_DIM), jnp.float32) * 0.02
    item_table = jax.random.normal(ks[1], (NUM_ITEMS, EMBEDDING_DIM), jnp.float32) * 0.02
    # fc layers: Linear(128, 64), Linear(64, 32), Linear(32, 1); stored (in, out).
    w1 = jax.random.normal(ks[2], (2 * EMBEDDING_DIM, 64), jnp.float32) * 0.05
    b1 = jax.random.normal(ks[3], (1, 64), jnp.float32) * 0.01
    w2 = jax.random.normal(ks[4], (64, 32), jnp.float32) * 0.05
    b2 = jax.random.normal(ks[5], (1, 32), jnp.float32) * 0.01
    w3 = jax.random.normal(ks[6], (32, 1), jnp.float32) * 0.05
    b3 = jax.random.normal(ks[7], (1, 1), jnp.float32) * 0.01
    return (user_table, item_table, w1, b1, w2, b2, w3, b3)


def _reference(user_id, item_id, params):
    """Pure-JAX reference of the PyTorch forward, for correctness checking."""
    user_table, item_table, w1, b1, w2, b2, w3, b3 = params
    u = jnp.take(user_table, user_id, axis=0)
    i = jnp.take(item_table, item_id, axis=0)
    x = jnp.concatenate([u, i], axis=1)
    h1 = jnp.maximum(x @ w1 + b1, 0.0)
    h2 = jnp.maximum(h1 @ w2 + b2, 0.0)
    return h2 @ w3 + b3


if __name__ == "__main__":
    key = jax.random.PRNGKey(0)
    pkey, ukey1, ikey1, ukey2, ikey2 = jax.random.split(key, 5)

    params = init_params(pkey)
    folded = fold_params(params)            # one-time fold (not per forward call)

    # Small batch: exercises the small-batch fast path (single 128-row tile).
    B1 = 8
    u1 = jax.random.randint(ukey1, (B1,), 0, NUM_USERS, dtype=jnp.int32)
    i1 = jax.random.randint(ikey1, (B1,), 0, NUM_ITEMS, dtype=jnp.int32)
    out1 = jax.block_until_ready(recsys_forward(u1, i1, folded))
    ref1 = jax.block_until_ready(_reference(u1, i1, params))
    assert out1.shape == (B1, 1), out1.shape
    assert jnp.allclose(out1, ref1, atol=2e-5, rtol=2e-4), "small-batch mismatch"

    # Medium batch: exercises the multi-tile grid (2 x 256-row tiles).
    B2 = 300
    u2 = jax.random.randint(ukey2, (B2,), 0, NUM_USERS, dtype=jnp.int32)
    i2 = jax.random.randint(ikey2, (B2,), 0, NUM_ITEMS, dtype=jnp.int32)
    out2 = jax.block_until_ready(recsys_forward(u2, i2, folded))
    ref2 = jax.block_until_ready(_reference(u2, i2, params))
    assert out2.shape == (B2, 1), out2.shape
    assert jnp.allclose(out2, ref2, atol=2e-5, rtol=2e-4), "multi-tile mismatch"

    print("KERNEL_OK")
</pallas_src>

<mosaic_0001>
module attributes {stable_mosaic.version = 11 : i64} {
  func.func @_fused_kernel(%arg0: i32, %arg1: memref<1x128xi32, #tpu.memory_space<vmem>>, %arg2: memref<1x128xi32, #tpu.memory_space<vmem>>, %arg3: memref<64x2048xbf16, #tpu.memory_space<vmem>>, %arg4: memref<64x2048xbf16, #tpu.memory_space<vmem>>, %arg5: memref<32x64xf32, #tpu.memory_space<vmem>>, %arg6: memref<32x1xf32, #tpu.memory_space<vmem>>, %arg7: memref<32x1xf32, #tpu.memory_space<vmem>>, %arg8: memref<1xf32, #tpu.memory_space<smem>>, %arg9: memref<1x128xf32, #tpu.memory_space<vmem>>) attributes {dimension_semantics = [#tpu.dimension_semantics<parallel>], iteration_bounds = array<i64: 1>, scalar_prefetch = 0 : i64, scratch_operands = 0 : i64, tpu.core_type = #tpu.core_type<tc>, window_params = [{transform_indices = @transform_0, window_bounds = array<i64: 1, 128>}, {transform_indices = @transform_1, window_bounds = array<i64: 1, 128>}, {pipeline_mode = #tpu.pipeline_mode<synchronous>, transform_indices = @transform_2, window_bounds = array<i64: 64, 2048>}, {pipeline_mode = #tpu.pipeline_mode<synchronous>, transform_indices = @transform_3, window_bounds = array<i64: 64, 2048>}, {pipeline_mode = #tpu.pipeline_mode<synchronous>, transform_indices = @transform_4, window_bounds = array<i64: 32, 64>}, {pipeline_mode = #tpu.pipeline_mode<synchronous>, transform_indices = @transform_5, window_bounds = array<i64: 32, 1>}, {pipeline_mode = #tpu.pipeline_mode<synchronous>, transform_indices = @transform_6, window_bounds = array<i64: 32, 1>}, {transform_indices = @transform_7, window_bounds = array<i64: 1>}, {transform_indices = @transform_8, window_bounds = array<i64: 1, 128>}]} {
    %0 = tpu.iota {dimensions = array<i32: 0>} : vector<2048x128xi32>
    %c0 = arith.constant 0 : index
    %c0_0 = arith.constant 0 : index
    %1 = vector.load %arg1[%c0, %c0_0] : memref<1x128xi32, #tpu.memory_space<vmem>>, vector<1x128xi32>
    %2 = vector.broadcast %1 : vector<1x128xi32> to vector<2048x128xi32>
    %3 = arith.cmpi eq, %0, %2 : vector<2048x128xi32>
    %c0_1 = arith.constant 0 : index
    %c0_2 = arith.constant 0 : index
    %4 = vector.load %arg2[%c0_1, %c0_2] : memref<1x128xi32, #tpu.memory_space<vmem>>, vector<1x128xi32>
    %c1024_i32 = arith.constant 1024 : i32
    %5 = vector.broadcast %c1024_i32 : i32 to vector<1x128xi32>
    %6 = arith.addi %4, %5 : vector<1x128xi32>
    %7 = vector.broadcast %6 : vector<1x128xi32> to vector<2048x128xi32>
    %8 = arith.cmpi eq, %0, %7 : vector<2048x128xi32>
    %9 = arith.ori %3, %8 : vector<2048x128xi1>
    %cst = arith.constant 1.000000e+00 : f32
    %cst_3 = arith.constant 0.000000e+00 : f32
    %10 = vector.broadcast %cst : f32 to vector<2048x128xf32>
    %11 = vector.broadcast %cst_3 : f32 to vector<2048x128xf32>
    %12 = arith.select %9, %10, %11 : vector<2048x128xi1>, vector<2048x128xf32>
    %13 = arith.truncf %12 : vector<2048x128xf32> to vector<2048x128xbf16>
    %c0_4 = arith.constant 0 : index
    %c0_5 = arith.constant 0 : index
    %14 = vector.load %arg3[%c0_4, %c0_5] : memref<64x2048xbf16, #tpu.memory_space<vmem>>, vector<64x2048xbf16>
    %cst_6 = arith.constant dense<0.000000e+00> : vector<64x128xf32>
    %15 = tpu.matmul %14, %13, %cst_6 {dimension_numbers = #tpu.dot_dimension_numbers<[1], [0], [0], [1], [0, 0, 1, 1], [], []>} : vector<64x2048xbf16>, vector<2048x128xbf16>, vector<64x128xf32> -> vector<64x128xf32>
    %c0_7 = arith.constant 0 : index
    %c0_8 = arith.constant 0 : index
    %16 = vector.load %arg4[%c0_7, %c0_8] : memref<64x2048xbf16, #tpu.memory_space<vmem>>, vector<64x2048xbf16>
    %cst_9 = arith.constant dense<0.000000e+00> : vector<64x128xf32>
    %17 = tpu.matmul %16, %13, %cst_9 {dimension_numbers = #tpu.dot_dimension_numbers<[1], [0], [0], [1], [0, 0, 1, 1], [], []>} : vector<64x2048xbf16>, vector<2048x128xbf16>, vector<64x128xf32> -> vector<64x128xf32>
    %18 = arith.addf %15, %17 : vector<64x128xf32>
    %cst_10 = arith.constant 0.000000e+00 : f32
    %19 = vector.broadcast %cst_10 : f32 to vector<64x128xf32>
    %20 = arith.maximumf %18, %19 : vector<64x128xf32>
    %c0_11 = arith.constant 0 : index
    %c0_12 = arith.constant 0 : index
    %21 = vector.load %arg5[%c0_11, %c0_12] : memref<32x64xf32, #tpu.memory_space<vmem>>, vector<32x64xf32>
    %cst_13 = arith.constant dense<0.000000e+00> : vector<32x128xf32>
    %22 = tpu.matmul %21, %20, %cst_13 {dimension_numbers = #tpu.dot_dimension_numbers<[1], [0], [0], [1], [0, 0, 1, 1], [], []>} : vector<32x64xf32>, vector<64x128xf32>, vector<32x128xf32> -> vector<32x128xf32>
    %c0_14 = arith.constant 0 : index
    %c0_15 = arith.constant 0 : index
    %23 = vector.load %arg6[%c0_14, %c0_15] : memref<32x1xf32, #tpu.memory_space<vmem>>, vector<32x1xf32>
    %24 = vector.broadcast %23 : vector<32x1xf32> to vector<32x128xf32>
    %25 = arith.addf %22, %24 : vector<32x128xf32>
    %cst_16 = arith.constant 0.000000e+00 : f32
    %26 = vector.broadcast %cst_16 : f32 to vector<32x128xf32>
    %27 = arith.maximumf %25, %26 : vector<32x128xf32>
    %c0_17 = arith.constant 0 : index
    %c0_18 = arith.constant 0 : index
    %28 = vector.load %arg7[%c0_17, %c0_18] : memref<32x1xf32, #tpu.memory_space<vmem>>, vector<32x1xf32>
    %29 = vector.broadcast %28 : vector<32x1xf32> to vector<32x128xf32>
    %30 = arith.mulf %27, %29 : vector<32x128xf32>
    %cst_19 = arith.constant dense<0.000000e+00> : vector<128xf32>
    %31 = vector.multi_reduction <add>, %30, %cst_19 [0] : vector<32x128xf32> to vector<128xf32>
    %32 = vector.shape_cast %31 : vector<128xf32> to vector<1x128xf32>
    %c0_20 = arith.constant 0 : index
    %33 = memref.load %arg8[%c0_20] : memref<1xf32, #tpu.memory_space<smem>>
    %34 = vector.broadcast %33 : f32 to vector<1x128xf32>
    %35 = arith.addf %32, %34 : vector<1x128xf32>
    %c0_21 = arith.constant 0 : index
    %c0_22 = arith.constant 0 : index
    %36 = vector.load %arg9[%c0_21, %c0_22] : memref<1x128xf32, #tpu.memory_space<vmem>>, vector<1x128xf32>
    tpu.vector_store %arg9[%c0_21, %c0_22], %35 {strides = array<i32>} : memref<1x128xf32, #tpu.memory_space<vmem>>, vector<1x128xf32>,
    return
  }
  func.func @transform_0(%arg0: i32) -> (i32, i32) {
    %c0_i32 = arith.constant 0 : i32
    %c0_i32_0 = arith.constant 0 : i32
    return %c0_i32, %arg0 : i32, i32
  }
  func.func @transform_1(%arg0: i32) -> (i32, i32) {
    %c0_i32 = arith.constant 0 : i32
    %c0_i32_0 = arith.constant 0 : i32
    return %c0_i32, %arg0 : i32, i32
  }
  func.func @transform_2(%arg0: i32) -> (i32, i32) {
    %c0_i32 = arith.constant 0 : i32
    %c0_i32_0 = arith.constant 0 : i32
    %c0_i32_1 = arith.constant 0 : i32
    return %c0_i32, %c0_i32_0 : i32, i32
  }
  func.func @transform_3(%arg0: i32) -> (i32, i32) {
    %c0_i32 = arith.constant 0 : i32
    %c0_i32_0 = arith.constant 0 : i32
    %c0_i32_1 = arith.constant 0 : i32
    return %c0_i32, %c0_i32_0 : i32, i32
  }
  func.func @transform_4(%arg0: i32) -> (i32, i32) {
    %c0_i32 = arith.constant 0 : i32
    %c0_i32_0 = arith.constant 0 : i32
    %c0_i32_1 = arith.constant 0 : i32
    return %c0_i32, %c0_i32_0 : i32, i32
  }
  func.func @transform_5(%arg0: i32) -> (i32, i32) {
    %c0_i32 = arith.constant 0 : i32
    %c0_i32_0 = arith.constant 0 : i32
    %c0_i32_1 = arith.constant 0 : i32
    return %c0_i32, %c0_i32_0 : i32, i32
  }
  func.func @transform_6(%arg0: i32) -> (i32, i32) {
    %c0_i32 = arith.constant 0 : i32
    %c0_i32_0 = arith.constant 0 : i32
    %c0_i32_1 = arith.constant 0 : i32
    return %c0_i32, %c0_i32_0 : i32, i32
  }
  func.func @transform_7(%arg0: i32) -> i32 {
    %c0_i32 = arith.constant 0 : i32
    %c0_i32_0 = arith.constant 0 : i32
    return %c0_i32 : i32
  }
  func.func @transform_8(%arg0: i32) -> (i32, i32) {
    %c0_i32 = arith.constant 0 : i32
    %c0_i32_0 = arith.constant 0 : i32
    return %c0_i32, %arg0 : i32, i32
  }
}

</mosaic_0001>

<bundles_post_ra>
// kernel: tpu_custom_call.1
= control target key start
LH: loop header
LB: loop body
LE: loop exit
PB: predicated region body
PF: predicated region fallthrough
CT: control target
= control target key end

     0   :  { %14 = vsyncpa [#allocation4], 0  ;;  %s9218_s0 = inlined_call_operand.vmem [shape: s32[1,128], index: 0, kind: input, shape index: {}]   ;;  %s9219_s1 = inlined_call_operand.vmem [shape: s32[1,128], index: 1, kind: input, shape index: {}]   ;;  %s9220_s2 = inlined_call_operand.hbm [shape: bf16[64,2048], index: 2, kind: input, shape index: {}]   ;;  %s9221_s3 = inlined_call_operand.hbm [shape: bf16[64,2048], index: 3, kind: input, shape index: {}]   ;;  %s9222_s4 = inlined_call_operand.vmem [shape: f32[32,64], index: 4, kind: input, shape index: {}]   ;;  %s9223_s5 = inlined_call_operand.vmem [shape: f32[32,1], index: 5, kind: input, shape index: {}]   ;;  %s9224_s6 = inlined_call_operand.vmem [shape: f32[32,1], index: 6, kind: input, shape index: {}]   ;;  %s9225_s7 = inlined_call_operand.<no memory space> [shape: f32[1], index: 7, kind: input, shape index: {}]   ;;  %s9226_s8 = inlined_call_operand.hbm [shape: f32[1,128], index: 8, kind: output, shape index: {}]  }
   0x1   :  { %15 = vsyncpa [#allocation7], 0 }
   0x2   :  { %16 = vsyncpa [#allocation5], 0  ;;  %s4909_s27 = smov [#allocation3]   ;;  %s4837_s9 = scalar_lea.hbm %s9220_s2, 8192 }
   0x3   :  { %s26_s28 = sshll.u32 %s4909_s27, 4  ;;  %p4838_p0 = scmp.ne.s32.totalorder %s9220_s2, %s4837_s9  ;;  %s27_s28 = int_to_ptr.vmem [resolvable:$true] %s26_s28 }
   0x4   :  { %p4841_p1 = scmp.lt.u32.totalorder %s4837_s9, %s9220_s2 }
   0x6   :  { %p4843_p2 = pnand %p4841_p1, %p4838_p0 }
   0x8   :  { %4846 = shalt.err (!%p4843_p2)
}
   0x9   :  { %s4847_s14 = scalar_lea.vmem %s27_s28, 8192  ;;  %p4852_p4 = scmp.lt.s32.totalorder %s27_s28, %s27_s28 }
   0xa   :  { %p4848_p3 = scmp.ne.s32.totalorder %s27_s28, %s4847_s14  ;;  %p4853_p5 = scmp.lt.s32.totalorder %s4847_s14, %s4847_s14 }
   0xc   :  { %p4854_p6 = por %p4853_p5, %p4852_p4 }
   0xe   :  { %p4855_p7 = pnand %p4854_p6, %p4848_p3 }
  0x10   :  { %4858 = shalt.err (!%p4855_p7)
}
  0x11   :  { %s4910_s15 = smov 1024   ;;  %s4911_s16 = smov 64  }
  0x12   :  { %32 = dma.hbm_to_vmem [thread:$0]  %s9220_s2, 8192, %s27_s28, [#allocation4], %s4910_s15, %s4910_s15, %s4911_s16  }
  0x13   :  { %s4912_s19 = smov [#allocation6]   ;;  %s4859_s23 = scalar_lea.hbm %s9221_s3, 8192 }
  0x14   :  { %s38_s20 = sshll.u32 %s4912_s19, 4  ;;  %p4860_p8 = scmp.ne.s32.totalorder %s9221_s3, %s4859_s23  ;;  %s39_s20 = int_to_ptr.vmem [resolvable:$true] %s38_s20 }
  0x15   :  { %p4863_p9 = scmp.lt.u32.totalorder %s4859_s23, %s9221_s3 }
  0x17   :  { %p4865_p10 = pnand %p4863_p9, %p4860_p8 }
  0x19   :  { %4868 = shalt.err (!%p4865_p10)
}
  0x1a   :  { %s4869_s29 = scalar_lea.vmem %s39_s20, 8192  ;;  %p4874_p12 = scmp.lt.s32.totalorder %s39_s20, %s39_s20 }
  0x1b   :  { %p4870_p11 = scmp.ne.s32.totalorder %s39_s20, %s4869_s29  ;;  %p4875_p13 = scmp.lt.s32.totalorder %s4869_s29, %s4869_s29 }
  0x1d   :  { %p4876_p0 = por %p4875_p13, %p4874_p12 }
  0x1f   :  { %p4877_p1 = pnand %p4876_p0, %p4870_p11 }
  0x21   :  { %4880 = shalt.err (!%p4877_p1)
}
  0x22   :  { %44 = dma.hbm_to_vmem [thread:$0]  %s9221_s3, 8192, %s39_s20, [#allocation7], %s4910_s15, %s4910_s15, %s4911_s16  }
  0x23   :  { %4903 = dma.done.wait [#allocation4], 8192  }
  0x24   :  { %4904 = vsyncadd [#allocation4], 4294959104 }
  0x25   :  { %4905 = dma.done.wait [#allocation7], 8192  }
  0x26   :  { %4906 = vsyncadd [#allocation7], 4294959104  ;;  %v60_v0 = vlaneseq  ;;  %v4993_v5 = vld [vmem:[%s9218_s0] ss:$0 sm:$0xff]  ;;  %v9296_v15 = vmov 1.0|1.0  }
  0x27   :  { %v578_v6 = vld [vmem:[%s9219_s1] sm:$0x1]  ;;  %v9819_v16 = vmov 0  ;;  %v9823_v20 = vmov 0  ;;  %v9825_v22 = vmov 0  ;;  %v9827_v24 = vmov 0 }
  0x28   :  { %v4985_v1 = vshrl.u32 %v60_v0, 7  ;;  %v579_v7 = vadd.s32 1024, %v578_v6  ;;  %v9829_v26 = vmov 0  ;;  %v9831_v28 = vmov 0  ;;  %v5285_v59 = vld [vmem:[#allocation6] sm:$0xff]  ;;  %v5294_v62 = vld [vmem:[#allocation6 + $0x8] sm:$0xff] }
  0x29   :  { %v9833_v30 = vmov 0  ;;  %v9835_v32 = vmov 0  ;;  %v9837_v34 = vmov 0  ;;  %v9839_v36 = vmov 0  ;;  %v5287_v60 = vld [vmem:[#allocation6 + $0x40] sm:$0xff]  ;;  %v5296_v63 = vld [vmem:[#allocation6 + $0x48] sm:$0xff] }
  0x2a   :  { %v77_v2 = vadd.s32 128, %v4985_v1  ;;  %v582_v3 = vsub.s32 0, %v4985_v1  ;;  %v78_v4 = vadd.s32 136, %v4985_v1  ;;  %v109_v8 = vadd.s32 384, %v4985_v1  ;;  %v1582_v18 = vld [vmem:[#allocation6 + $0x130] sm:$0xff]  ;;  %s4915_s11 = smov [#allocation8]  }
  0x2b   :  { %v110_v10 = vadd.s32 392, %v4985_v1  ;;  %v62_v12 = vadd.s32 8, %v4985_v1  ;;  %v93_v14 = vadd.s32 256, %v4985_v1  ;;  %vm322_vm12 = vcmp.eq.s32.totalorder %v4985_v1, %v4993_v5  ;;  %s3473_s12 = sshll.u32 %s4915_s11, 4  ;;  %s3474_s12 = int_to_ptr.vmem [resolvable:$true] %s3473_s12 }
  0x2c   :  { %vm338_vm0 = vcmp.eq.s32.totalorder %v77_v2, %v4993_v5  ;;  %v5000_v9 = vrot.slane %v579_v7, %v582_v3  ;;  %vm339_vm1 = vcmp.eq.s32.totalorder %v78_v4, %v4993_v5  ;;  %vm370_vm5 = vcmp.eq.s32.totalorder %v109_v8, %v4993_v5  ;;  %s4881_s13 = scalar_lea.vmem %s3474_s12, 16  ;;  %p4886_p3 = scmp.lt.s32.totalorder %s3474_s12, %s3474_s12 }
  0x2d   :  { %vm371_vm8 = vcmp.eq.s32.totalorder %v110_v10, %v4993_v5  ;;  %v94_v17 = vadd.s32 264, %v4985_v1  ;;  %vm323_vm15 = vcmp.eq.s32.totalorder %v62_v12, %v4993_v5  ;;  %v79_v19 = vadd.s32 144, %v4985_v1  ;;  %p4882_p2 = scmp.ne.s32.totalorder %s3474_s12, %s4881_s13 }
  0x2e   :  { %vm600_vm2 = vcmp.eq.s32.totalorder %v77_v2, %v5000_v9  ;;  %vm601_vm3 = vcmp.eq.s32.totalorder %v78_v4, %v5000_v9  ;;  %vm632_vm6 = vcmp.eq.s32.totalorder %v109_v8, %v5000_v9  ;;  %vm633_vm9 = vcmp.eq.s32.totalorder %v110_v10, %v5000_v9 }
  0x2f   :  { %vm5006_vm4 = vmor %vm338_vm0, %vm600_vm2  ;;  %vm584_vm13 = vcmp.eq.s32.totalorder %v4985_v1, %v5000_v9  ;;  %vm585_vm0 = vcmp.eq.s32.totalorder %v62_v12, %v5000_v9  ;;  %v80_v21 = vadd.s32 152, %v4985_v1  ;;  %v111_v23 = vadd.s32 400, %v4985_v1 }
  0x30   :  { %vm5013_vm7 = vmor %vm339_vm1, %vm601_vm3  ;;  %vm354_vm3 = vcmp.eq.s32.totalorder %v93_v14, %v4993_v5  ;;  %v112_v25 = vadd.s32 408, %v4985_v1  ;;  %v63_v27 = vadd.s32 16, %v4985_v1  ;;  %v64_v29 = vadd.s32 24, %v4985_v1 }
  0x31   :  { %vm9228_vm10 = vmpackc.low %vm5013_vm7, %vm5006_vm4  ;;  %v95_v31 = vadd.s32 272, %v4985_v1  ;;  %v96_v33 = vadd.s32 280, %v4985_v1  ;;  %v81_v35 = vadd.s32 160, %v4985_v1  ;;  %v82_v37 = vadd.s32 168, %v4985_v1 }
  0x32   :  { %4128 = vmatprep.subr.msk.bf16.mxu0 %vm9228_vm10, %v9296_v15  ;;  %vm5030_vm11 = vmor %vm370_vm5, %vm632_vm6  ;;  %vm616_vm5 = vcmp.eq.s32.totalorder %v93_v14, %v5000_v9  ;;  %vm341_vm10 = vcmp.eq.s32.totalorder %v80_v21, %v4993_v5  ;;  %v9841_v38 = vmov 0  ;;  %v113_v39 = vadd.s32 416, %v4985_v1 }
  0x33   :  { %v9820_v16 = vsel %vm5030_vm11, 4294967295, %v9819_v16  ;;  %vm5039_vm14 = vmor %vm371_vm8, %vm633_vm9  ;;  %vm355_vm8 = vcmp.eq.s32.totalorder %v94_v17, %v4993_v5  ;;  %vm617_vm9 = vcmp.eq.s32.totalorder %v94_v17, %v5000_v9  ;;  %v9843_v40 = vmov 0 }
  0x34   :  { %vm9227_vm1 = vmpackc.low %vm5039_vm14, %vm5030_vm11  ;;  %vm603_vm11 = vcmp.eq.s32.totalorder %v80_v21, %v5000_v9  ;;  %v114_v41 = vadd.s32 424, %v4985_v1  ;;  %v9845_v42 = vmov 0  ;;  %v65_v43 = vadd.s32 32, %v4985_v1 }
  0x35   :  { %4168 = vmatprep.subr.msk.bf16.mxu1 %vm9227_vm1, %v9296_v15  ;;  %vm5056_vm2 = vmor %vm322_vm12, %vm584_vm13  ;;  %v9847_v44 = vmov 0  ;;  %v66_v45 = vadd.s32 40, %v4985_v1  ;;  %v9849_v46 = vmov 0  ;;  %v97_v47 = vadd.s32 288, %v4985_v1 }
  0x36   :  { %v9824_v20 = vsel %vm5056_vm2, 4294967295, %v9823_v20  ;;  %vm5063_vm6 = vmor %vm323_vm15, %vm585_vm0  ;;  %vm340_vm15 = vcmp.eq.s32.totalorder %v79_v19, %v4993_v5  ;;  %vm602_vm0 = vcmp.eq.s32.totalorder %v79_v19, %v5000_v9  ;;  %v9851_v48 = vmov 0 }
  0x37   :  { %v9826_v22 = vsel %vm5063_vm6, 4294967295, %v9825_v22  ;;  %vm9230_vm12 = vmpackc.low %vm5063_vm6, %vm5056_vm2  ;;  %vm373_vm2 = vcmp.eq.s32.totalorder %v112_v25, %v4993_v5  ;;  %vm635_vm6 = vcmp.eq.s32.totalorder %v112_v25, %v5000_v9  ;;  %v98_v49 = vadd.s32 296, %v4985_v1 }
  0x38   :  { %4129 = vmatpush3.bf16.msk.msra.mxu0 %vm9230_vm12, %v9296_v15  ;;  %vm5080_vm13 = vmor %vm354_vm3, %vm616_vm5  ;;  %v9853_v50 = vmov 0  ;;  %v83_v51 = vadd.s32 176, %v4985_v1  ;;  %v9855_v52 = vmov 0  ;;  %v84_v53 = vadd.s32 184, %v4985_v1 }
  0x39   :  { %v9828_v24 = vsel %vm5080_vm13, 4294967295, %v9827_v24  ;;  %vm5087_vm1 = vmor %vm355_vm8, %vm617_vm9  ;;  %vm372_vm8 = vcmp.eq.s32.totalorder %v111_v23, %v4993_v5  ;;  %vm634_vm9 = vcmp.eq.s32.totalorder %v111_v23, %v5000_v9  ;;  %v9857_v54 = vmov 0 }
  0x3a   :  { %v9830_v26 = vsel %vm5087_vm1, 4294967295, %v9829_v26  ;;  %vm9233_vm3 = vmpackc.low %vm5087_vm1, %vm5080_vm13  ;;  %vm325_vm13 = vcmp.eq.s32.totalorder %v64_v29, %v4993_v5  ;;  %vm587_vm1 = vcmp.eq.s32.totalorder %v64_v29, %v5000_v9  ;;  %v115_v55 = vadd.s32 432, %v4985_v1 }
  0x3b   :  { %4169 = vmatpush3.bf16.msk.msra.mxu1 %vm9233_vm3, %v9296_v15  ;;  %vm5104_vm5 = vmor %vm340_vm15, %vm602_vm0  ;;  %vm586_vm0 = vcmp.eq.s32.totalorder %v63_v27, %v5000_v9  ;;  %v9859_v56 = vmov 0  ;;  %v116_v57 = vadd.s32 440, %v4985_v1  ;;  %v9861_v58 = vmov 0 }
  0x3c   :  { %v9832_v28 = vsel %vm5104_vm5, 4294967295, %v9831_v28  ;;  %vm5111_vm12 = vmor %vm341_vm10, %vm603_vm11  ;;  %vm324_vm11 = vcmp.eq.s32.totalorder %v63_v27, %v4993_v5  ;;  %v67_v61 = vadd.s32 48, %v4985_v1  ;;  %v9863_v0 = vmov 0 }
  0x3d   :  { %v9834_v30 = vsel %vm5111_vm12, 4294967295, %v9833_v30  ;;  %vm9236_vm15 = vmpackc.low %vm5111_vm12, %vm5104_vm5  ;;  %vm357_vm5 = vcmp.eq.s32.totalorder %v96_v33, %v4993_v5  ;;  %vm619_vm12 = vcmp.eq.s32.totalorder %v96_v33, %v5000_v9  ;;  %v68_v2 = vadd.s32 56, %v4985_v1 }
  0x3e   :  { %4130 = vmatprep.subr.msk.bf16.mxu0 %vm9236_vm15, %v9296_v15  ;;  %vm5128_vm10 = vmor %vm372_vm8, %vm634_vm9  ;;  %vm618_vm9 = vcmp.eq.s32.totalorder %v95_v31, %v5000_v9  ;;  %v9865_v3 = vmov 0  ;;  %v99_v4 = vadd.s32 304, %v4985_v1  ;;  %v3485_v6 = vcombine.high %v5285_v59, %v5287_v60 }
  0x3f   :  { %v9836_v32 = vsel %vm5128_vm10, 4294967295, %v9835_v32  ;;  %vm5135_vm3 = vmor %vm373_vm2, %vm635_vm6  ;;  %vm356_vm6 = vcmp.eq.s32.totalorder %v95_v31, %v4993_v5  ;;  %v3487_v7 = vcombine.high %v5294_v62, %v5296_v63  ;;  %v9867_v8 = vmov 0 }
  0x40   :  { %v9838_v34 = vsel %vm5135_vm3, 4294967295, %v9837_v34  ;;  %vm9239_vm8 = vmpackc.low %vm5135_vm3, %vm5128_vm10  ;;  %vm343_vm10 = vcmp.eq.s32.totalorder %v82_v37, %v4993_v5  ;;  %vm605_vm3 = vcmp.eq.s32.totalorder %v82_v37, %v5000_v9  ;;  %v100_v10 = vadd.s32 312, %v4985_v1  ;;  %1960 = vmatprep.mubr.bf16.mxu0 %v3485_v6 }
  0x41   :  { %4170 = vmatprep.subr.msk.bf16.mxu1 %vm9239_vm8, %v9296_v15  ;;  %vm5152_vm2 = vmor %vm324_vm11, %vm586_vm0  ;;  %vm604_vm0 = vcmp.eq.s32.totalorder %v81_v35, %v5000_v9  ;;  %v9869_v12 = vmov 0  ;;  %v85_v14 = vadd.s32 192, %v4985_v1  ;;  %2025 = vmatprep.mubr.bf16.mxu1 %v3487_v7  ;;  %v9871_v17 = vmov 0 }
  0x42   :  { %v9840_v36 = vsel %vm5152_vm2, 4294967295, %v9839_v36  ;;  %vm5159_vm15 = vmor %vm325_vm13, %vm587_vm1  ;;  %vm342_vm13 = vcmp.eq.s32.totalorder %v81_v35, %v4993_v5  ;;  %v86_v19 = vadd.s32 200, %v4985_v1  ;;  %v9873_v21 = vmov 0 }
  0x43   :  { %v9842_v38 = vsel %vm5159_vm15, 4294967295, %v9841_v38  ;;  %vm9242_vm11 = vmpackc.low %vm5159_vm15, %vm5152_vm2  ;;  %vm375_vm2 = vcmp.eq.s32.totalorder %v114_v41, %v4993_v5  ;;  %vm637_vm15 = vcmp.eq.s32.totalorder %v114_v41, %v5000_v9  ;;  %v117_v23 = vadd.s32 448, %v4985_v1 }
  0x44   :  { %4131 = vmatpush3.bf16.msk.msra.mxu0 %vm9242_vm11, %v9296_v15  ;;  %vm5176_vm1 = vmor %vm356_vm6, %vm618_vm9  ;;  %vm636_vm9 = vcmp.eq.s32.totalorder %v113_v39, %v5000_v9  ;;  %v9875_v25 = vmov 0  ;;  %v118_v27 = vadd.s32 456, %v4985_v1  ;;  %v9877_v29 = vmov 0 }
  0x45   :  { %v9844_v40 = vsel %vm5176_vm1, 4294967295, %v9843_v40  ;;  %vm5183_vm8 = vmor %vm357_vm5, %vm619_vm12  ;;  %vm374_vm5 = vcmp.eq.s32.totalorder %v113_v39, %v4993_v5  ;;  %v69_v31 = vadd.s32 64, %v4985_v1  ;;  %v9879_v33 = vmov 0 }
  0x46   :  { %v9846_v42 = vsel %vm5183_vm8, 4294967295, %v9845_v42  ;;  %vm9245_vm6 = vmpackc.low %vm5183_vm8, %vm5176_vm1  ;;  %vm327_vm1 = vcmp.eq.s32.totalorder %v66_v45, %v4993_v5  ;;  %vm589_vm8 = vcmp.eq.s32.totalorder %v66_v45, %v5000_v9  ;;  %v70_v35 = vadd.s32 72, %v4985_v1 }
  0x47   :  { %4171 = vmatpush3.bf16.msk.msra.mxu1 %vm9245_vm6, %v9296_v15  ;;  %vm5200_vm12 = vmor %vm342_vm13, %vm604_vm0  ;;  %vm588_vm0 = vcmp.eq.s32.totalorder %v65_v43, %v5000_v9  ;;  %v9881_v37 = vmov 0  ;;  %v101_v39 = vadd.s32 320, %v4985_v1  ;;  %v9883_v41 = vmov 0 }
  0x48   :  { %v9848_v44 = vsel %vm5200_vm12, 4294967295, %v9847_v44  ;;  %vm5207_vm11 = vmor %vm343_vm10, %vm605_vm3  ;;  %vm326_vm10 = vcmp.eq.s32.totalorder %v65_v43, %v4993_v5  ;;  %v102_v43 = vadd.s32 328, %v4985_v1  ;;  %v9885_v45 = vmov 0 }
  0x49   :  { %v9850_v46 = vsel %vm5207_vm11, 4294967295, %v9849_v46  ;;  %vm9248_vm13 = vmpackc.low %vm5207_vm11, %vm5200_vm12  ;;  %vm359_vm12 = vcmp.eq.s32.totalorder %v98_v49, %v4993_v5  ;;  %vm621_vm11 = vcmp.eq.s32.totalorder %v98_v49, %v5000_v9  ;;  %v9887_v49 = vmov 0 }
  0x4a   :  { %4132 = vmatprep.subr.msk.bf16.mxu0 %vm9248_vm13, %v9296_v15  ;;  %vm5224_vm3 = vmor %vm374_vm5, %vm636_vm9  ;;  %vm620_vm9 = vcmp.eq.s32.totalorder %v97_v47, %v5000_v9  ;;  %v9897_v6 = vmov 0  ;;  %v72_v7 = vadd.s32 88, %v4985_v1 }
  0x4b   :  { %v9852_v48 = vsel %vm5224_vm3, 4294967295, %v9851_v48  ;;  %vm5231_vm6 = vmor %vm375_vm2, %vm637_vm15  ;;  %vm358_vm2 = vcmp.eq.s32.totalorder %v97_v47, %v4993_v5  ;;  %v87_v47 = vadd.s32 208, %v4985_v1 }
  0x4c   :  { %v9854_v50 = vsel %vm5231_vm6, 4294967295, %v9853_v50  ;;  %vm9251_vm5 = vmpackc.low %vm5231_vm6, %vm5224_vm3  ;;  %vm345_vm3 = vcmp.eq.s32.totalorder %v84_v53, %v4993_v5  ;;  %vm607_vm6 = vcmp.eq.s32.totalorder %v84_v53, %v5000_v9  ;;  %v9889_v53 = vmov 0 }
  0x4d   :  { %4172 = vmatprep.subr.msk.bf16.mxu1 %vm9251_vm5, %v9296_v15  ;;  %vm5248_vm15 = vmor %vm326_vm10, %vm588_vm0  ;;  %vm606_vm0 = vcmp.eq.s32.totalorder %v83_v51, %v5000_v9 }
  0x4e   :  { %v9856_v52 = vsel %vm5248_vm15, 4294967295, %v9855_v52  ;;  %vm5255_vm13 = vmor %vm327_vm1, %vm589_vm8  ;;  %vm344_vm1 = vcmp.eq.s32.totalorder %v83_v51, %v4993_v5  ;;  %v88_v51 = vadd.s32 216, %v4985_v1 }
  0x4f   :  { %v9858_v54 = vsel %vm5255_vm13, 4294967295, %v9857_v54  ;;  %vm9254_vm10 = vmpackc.low %vm5255_vm13, %vm5248_vm15  ;;  %vm377_vm15 = vcmp.eq.s32.totalorder %v116_v57, %v4993_v5  ;;  %vm639_vm13 = vcmp.eq.s32.totalorder %v116_v57, %v5000_v9  ;;  %v9891_v57 = vmov 0 }
  0x50   :  { %4133 = vmatpush3.bf16.msk.msra.mxu0 %vm9254_vm10, %v9296_v15  ;;  %vm5272_vm8 = vmor %vm358_vm2, %vm620_vm9  ;;  %vm638_vm9 = vcmp.eq.s32.totalorder %v115_v55, %v5000_v9 }
  0x51   :  { %v9860_v56 = vsel %vm5272_vm8, 4294967295, %v9859_v56  ;;  %vm5279_vm5 = vmor %vm359_vm12, %vm621_vm11  ;;  %vm376_vm12 = vcmp.eq.s32.totalorder %v115_v55, %v4993_v5  ;;  %v119_v55 = vadd.s32 464, %v4985_v1 }
  0x52   :  { %v9862_v58 = vsel %vm5279_vm5, 4294967295, %v9861_v58  ;;  %vm9257_vm2 = vmpackc.low %vm5279_vm5, %vm5272_vm8  ;;  %vm329_vm8 = vcmp.eq.s32.totalorder %v68_v2, %v4993_v5  ;;  %vm591_vm5 = vcmp.eq.s32.totalorder %v68_v2, %v5000_v9  ;;  %v9894_v2 = vmov 0 }
  0x53   :  { %4173 = vmatpush3.bf16.msk.msra.mxu1 %vm9257_vm2, %v9296_v15  ;;  %vm5304_vm11 = vmor %vm344_vm1, %vm606_vm0  ;;  %vm590_vm0 = vcmp.eq.s32.totalorder %v67_v61, %v5000_v9 }
  0x54   :  { %v9864_v0 = vsel %vm5304_vm11, 4294967295, %v9863_v0  ;;  %vm5311_vm10 = vmor %vm345_vm3, %vm607_vm6  ;;  %vm328_vm3 = vcmp.eq.s32.totalorder %v67_v61, %v4993_v5  ;;  %v120_v61 = vadd.s32 472, %v4985_v1 }
  0x55   :  { %v9866_v3 = vsel %vm5311_vm10, 4294967295, %v9865_v3  ;;  %vm9260_vm1 = vmpackc.low %vm5311_vm10, %vm5304_vm11  ;;  %vm361_vm11 = vcmp.eq.s32.totalorder %v100_v10, %v4993_v5  ;;  %vm623_vm10 = vcmp.eq.s32.totalorder %v100_v10, %v5000_v9  ;;  %v9900_v10 = vmov 0 }
  0x56   :  { %4134 = vmatprep.subr.msk.bf16.mxu0 %vm9260_vm1, %v9296_v15  ;;  %vm5332_vm6 = vmor %vm376_vm12, %vm638_vm9  ;;  %vm622_vm9 = vcmp.eq.s32.totalorder %v99_v4, %v5000_v9 }
  0x57   :  { %v9868_v8 = vsel %vm5332_vm6, 4294967295, %v9867_v8  ;;  %vm5339_vm2 = vmor %vm377_vm15, %vm639_vm13  ;;  %vm360_vm15 = vcmp.eq.s32.totalorder %v99_v4, %v4993_v5  ;;  %v71_v4 = vadd.s32 80, %v4985_v1 }
  0x58   :  { %v9870_v12 = vsel %vm5339_vm2, 4294967295, %v9869_v12  ;;  %vm9263_vm12 = vmpackc.low %vm5339_vm2, %vm5332_vm6  ;;  %vm347_vm6 = vcmp.eq.s32.totalorder %v86_v19, %v4993_v5  ;;  %vm609_vm2 = vcmp.eq.s32.totalorder %v86_v19, %v5000_v9  ;;  %v9902_v19 = vmov 0 }
  0x59   :  { %4174 = vmatprep.subr.msk.bf16.mxu1 %vm9263_vm12, %v9296_v15  ;;  %vm5356_vm13 = vmor %vm328_vm3, %vm590_vm0  ;;  %vm608_vm0 = vcmp.eq.s32.totalorder %v85_v14, %v5000_v9 }
  0x5a   :  { %v9872_v17 = vsel %vm5356_vm13, 4294967295, %v9871_v17  ;;  %vm5363_vm1 = vmor %vm329_vm8, %vm591_vm5  ;;  %vm346_vm8 = vcmp.eq.s32.totalorder %v85_v14, %v4993_v5  ;;  %v103_v14 = vadd.s32 336, %v4985_v1 }
  0x5b   :  { %v9874_v21 = vsel %vm5363_vm1, 4294967295, %v9873_v21  ;;  %vm9266_vm3 = vmpackc.low %vm5363_vm1, %vm5356_vm13  ;;  %vm379_vm13 = vcmp.eq.s32.totalorder %v118_v27, %v4993_v5  ;;  %vm641_vm1 = vcmp.eq.s32.totalorder %v118_v27, %v5000_v9  ;;  %v9905_v27 = vmov 0 }
  0x5c   :  { %4135 = vmatpush3.bf16.msk.msra.mxu0 %vm9266_vm3, %v9296_v15  ;;  %vm5380_vm5 = vmor %vm360_vm15, %vm622_vm9  ;;  %vm640_vm9 = vcmp.eq.s32.totalorder %v117_v23, %v5000_v9 }
  0x5d   :  { %v9876_v25 = vsel %vm5380_vm5, 4294967295, %v9875_v25  ;;  %vm5387_vm12 = vmor %vm361_vm11, %vm623_vm10  ;;  %vm378_vm11 = vcmp.eq.s32.totalorder %v117_v23, %v4993_v5  ;;  %v104_v23 = vadd.s32 344, %v4985_v1 }
  0x5e   :  { %v9878_v29 = vsel %vm5387_vm12, 4294967295, %v9877_v29  ;;  %vm9269_vm15 = vmpackc.low %vm5387_vm12, %vm5380_vm5  ;;  %vm331_vm5 = vcmp.eq.s32.totalorder %v70_v35, %v4993_v5  ;;  %vm593_vm12 = vcmp.eq.s32.totalorder %v70_v35, %v5000_v9  ;;  %v9908_v35 = vmov 0 }
  0x5f   :  { %4175 = vmatpush3.bf16.msk.msra.mxu1 %vm9269_vm15, %v9296_v15  ;;  %vm5404_vm10 = vmor %vm346_vm8, %vm608_vm0  ;;  %vm592_vm0 = vcmp.eq.s32.totalorder %v69_v31, %v5000_v9 }
  0x60   :  { %v9880_v33 = vsel %vm5404_vm10, 4294967295, %v9879_v33  ;;  %vm5411_vm3 = vmor %vm347_vm6, %vm609_vm2  ;;  %vm330_vm6 = vcmp.eq.s32.totalorder %v69_v31, %v4993_v5  ;;  %v89_v31 = vadd.s32 224, %v4985_v1 }
  0x61   :  { %v9882_v37 = vsel %vm5411_vm3, 4294967295, %v9881_v37  ;;  %vm9272_vm8 = vmpackc.low %vm5411_vm3, %vm5404_vm10  ;;  %vm363_vm10 = vcmp.eq.s32.totalorder %v102_v43, %v4993_v5  ;;  %vm625_vm3 = vcmp.eq.s32.totalorder %v102_v43, %v5000_v9  ;;  %v9911_v43 = vmov 0 }
  0x62   :  { %4136 = vmatprep.subr.msk.bf16.mxu0 %vm9272_vm8, %v9296_v15  ;;  %vm5428_vm2 = vmor %vm378_vm11, %vm640_vm9  ;;  %vm624_vm9 = vcmp.eq.s32.totalorder %v101_v39, %v5000_v9 }
  0x63   :  { %v9884_v41 = vsel %vm5428_vm2, 4294967295, %v9883_v41  ;;  %vm5435_vm15 = vmor %vm379_vm13, %vm641_vm1  ;;  %vm362_vm13 = vcmp.eq.s32.totalorder %v101_v39, %v4993_v5  ;;  %v90_v39 = vadd.s32 232, %v4985_v1 }
  0x64   :  { %v9886_v45 = vsel %vm5435_vm15, 4294967295, %v9885_v45  ;;  %vm9275_vm11 = vmpackc.low %vm5435_vm15, %vm5428_vm2  ;;  %vm349_vm2 = vcmp.eq.s32.totalorder %v88_v51, %v4993_v5  ;;  %vm611_vm15 = vcmp.eq.s32.totalorder %v88_v51, %v5000_v9  ;;  %v9914_v51 = vmov 0 }
  0x65   :  { %4176 = vmatprep.subr.msk.bf16.mxu1 %vm9275_vm11, %v9296_v15  ;;  %vm5452_vm1 = vmor %vm330_vm6, %vm592_vm0  ;;  %vm610_vm0 = vcmp.eq.s32.totalorder %v87_v47, %v5000_v9 }
  0x66   :  { %v9888_v49 = vsel %vm5452_vm1, 4294967295, %v9887_v49  ;;  %vm5459_vm8 = vmor %vm331_vm5, %vm593_vm12  ;;  %vm348_vm5 = vcmp.eq.s32.totalorder %v87_v47, %v4993_v5  ;;  %v121_v47 = vadd.s32 480, %v4985_v1 }
  0x67   :  { %v9890_v53 = vsel %vm5459_vm8, 4294967295, %v9889_v53  ;;  %vm9278_vm6 = vmpackc.low %vm5459_vm8, %vm5452_vm1  ;;  %vm381_vm1 = vcmp.eq.s32.totalorder %v120_v61, %v4993_v5  ;;  %vm643_vm8 = vcmp.eq.s32.totalorder %v120_v61, %v5000_v9  ;;  %v9917_v61 = vmov 0 }
  0x68   :  { %4137 = vmatpush3.bf16.msk.msra.mxu0 %vm9278_vm6, %v9296_v15  ;;  %vm5476_vm12 = vmor %vm362_vm13, %vm624_vm9  ;;  %vm642_vm9 = vcmp.eq.s32.totalorder %v119_v55, %v5000_v9 }
  0x69   :  { %v9892_v57 = vsel %vm5476_vm12, 4294967295, %v9891_v57  ;;  %vm5483_vm11 = vmor %vm363_vm10, %vm625_vm3  ;;  %vm380_vm10 = vcmp.eq.s32.totalorder %v119_v55, %v4993_v5  ;;  %v122_v55 = vadd.s32 488, %v4985_v1 }
  0x6a   :  { %9893 = vst [vmem:[#allocation12_spill] sm:$0xff] %v9892_v57  ;;  %v9895_v2 = vsel %vm5483_vm11, 4294967295, %v9894_v2  ;;  %vm9281_vm13 = vmpackc.low %vm5483_vm11, %vm5476_vm12  ;;  %vm333_vm12 = vcmp.eq.s32.totalorder %v72_v7, %v4993_v5  ;;  %vm595_vm11 = vcmp.eq.s32.totalorder %v72_v7, %v5000_v9  ;;  %v9920_v7 = vmov 0  ;;  %v5793_v57 = vld [vmem:[#allocation6 + $0x88] sm:$0xff] }
  0x6b   :  { %9896 = vst [vmem:[#allocation13_spill] sm:$0xff] %v9895_v2  ;;  %4177 = vmatpush3.bf16.msk.msra.mxu1 %vm9281_vm13, %v9296_v15  ;;  %vm5500_vm3 = vmor %vm348_vm5, %vm610_vm0  ;;  %vm594_vm0 = vcmp.eq.s32.totalorder %v71_v4, %v5000_v9  ;;  %v9963_v2 = vmov 0 }
  0x6c   :  { %v9898_v6 = vsel %vm5500_vm3, 4294967295, %v9897_v6  ;;  %vm5507_vm6 = vmor %vm349_vm2, %vm611_vm15  ;;  %vm332_vm2 = vcmp.eq.s32.totalorder %v71_v4, %v4993_v5  ;;  %v73_v4 = vadd.s32 96, %v4985_v1 }
  0x6d   :  { %9899 = vst [vmem:[#allocation14_spill] sm:$0xff] %v9898_v6  ;;  %v9901_v10 = vsel %vm5507_vm6, 4294967295, %v9900_v10  ;;  %vm9284_vm5 = vmpackc.low %vm5507_vm6, %vm5500_vm3  ;;  %vm365_vm3 = vcmp.eq.s32.totalorder %v104_v23, %v4993_v5  ;;  %vm627_vm6 = vcmp.eq.s32.totalorder %v104_v23, %v5000_v9  ;;  %v9923_v23 = vmov 0  ;;  %v5872_v6 = vld [vmem:[#allocation6 + $0x148] sm:$0xff] }
  0x6e   :  { %4138 = vmatprep.subr.msk.bf16.mxu0 %vm9284_vm5, %v9296_v15  ;;  %vm5524_vm15 = vmor %vm380_vm10, %vm642_vm9  ;;  %vm626_vm9 = vcmp.eq.s32.totalorder %v103_v14, %v5000_v9 }
  0x6f   :  { %v9903_v19 = vsel %vm5524_vm15, 4294967295, %v9902_v19  ;;  %vm5531_vm13 = vmor %vm381_vm1, %vm643_vm8  ;;  %vm364_vm1 = vcmp.eq.s32.totalorder %v103_v14, %v4993_v5  ;;  %v74_v14 = vadd.s32 104, %v4985_v1 }
  0x70   :  { %9904 = vst [vmem:[#allocation15_spill] sm:$0xff] %v9903_v19  ;;  %v9906_v27 = vsel %vm5531_vm13, 4294967295, %v9905_v27  ;;  %vm9287_vm10 = vmpackc.low %vm5531_vm13, %vm5524_vm15  ;;  %vm351_vm15 = vcmp.eq.s32.totalorder %v90_v39, %v4993_v5  ;;  %vm613_vm13 = vcmp.eq.s32.totalorder %v90_v39, %v5000_v9  ;;  %v9926_v39 = vmov 0  ;;  %v5755_v19 = vld [vmem:[#allocation6 + $0x80] sm:$0xff] }
  0x71   :  { %9907 = vst [vmem:[#allocation16_spill] sm:$0xff] %v9906_v27  ;;  %4178 = vmatprep.subr.msk.bf16.mxu1 %vm9287_vm10, %v9296_v15  ;;  %vm5548_vm8 = vmor %vm332_vm2, %vm594_vm0  ;;  %vm612_vm0 = vcmp.eq.s32.totalorder %v89_v31, %v5000_v9  ;;  %v5757_v27 = vld [vmem:[#allocation6 + $0xc0] sm:$0xff] }
  0x72   :  { %v9909_v35 = vsel %vm5548_vm8, 4294967295, %v9908_v35  ;;  %vm5555_vm5 = vmor %vm333_vm12, %vm595_vm11  ;;  %vm350_vm12 = vcmp.eq.s32.totalorder %v89_v31, %v4993_v5  ;;  %v105_v31 = vadd.s32 352, %v4985_v1 }
  0x73   :  { %9910 = vst [vmem:[#allocation17_spill] sm:$0xff] %v9909_v35  ;;  %v9912_v43 = vsel %vm5555_vm5, 4294967295, %v9911_v43  ;;  %vm9290_vm2 = vmpackc.low %vm5555_vm5, %vm5548_vm8  ;;  %vm383_vm8 = vcmp.eq.s32.totalorder %v122_v55, %v4993_v5  ;;  %vm645_vm5 = vcmp.eq.s32.totalorder %v122_v55, %v5000_v9  ;;  %v9929_v55 = vmov 0 }
  0x74   :  { %9913 = vst [vmem:[#allocation18_spill] sm:$0xff] %v9912_v43  ;;  %4139 = vmatpush3.bf16.msk.msra.mxu0 %vm9290_vm2, %v9296_v15  ;;  %vm5572_vm11 = vmor %vm364_vm1, %vm626_vm9  ;;  %vm644_vm9 = vcmp.eq.s32.totalorder %v121_v47, %v5000_v9  ;;  %v9957_v35 = vmov 0  ;;  %v142_v43 = vadd.s32 648, %v4985_v1 }
  0x75   :  { %v9915_v51 = vsel %vm5572_vm11, 4294967295, %v9914_v51  ;;  %vm5579_vm10 = vmor %vm365_vm3, %vm627_vm6  ;;  %vm382_vm3 = vcmp.eq.s32.totalorder %v121_v47, %v4993_v5  ;;  %v106_v47 = vadd.s32 360, %v4985_v1 }
  0x76   :  { %9916 = vst [vmem:[#allocation19_spill] sm:$0xff] %v9915_v51  ;;  %v9918_v61 = vsel %vm5579_vm10, 4294967295, %v9917_v61  ;;  %vm9293_vm1 = vmpackc.low %vm5579_vm10, %vm5572_vm11  ;;  %vm335_vm11 = vcmp.eq.s32.totalorder %v74_v14, %v4993_v5  ;;  %vm597_vm10 = vcmp.eq.s32.totalorder %v74_v14, %v5000_v9  ;;  %v9932_v51 = vmov 1.0|1.0  }
  0x77   :  { %9919 = vst [vmem:[#allocation20_spill] sm:$0xff] %v9918_v61  ;;  %4179 = vmatpush3.bf16.msk.msra.mxu1 %vm9293_vm1, %v9296_v15  ;;  %vm5596_vm6 = vmor %vm350_vm12, %vm612_vm0  ;;  %vm596_vm0 = vcmp.eq.s32.totalorder %v73_v4, %v5000_v9  ;;  %v92_v14 = vadd.s32 248, %v4985_v1  ;;  %v9936_v61 = vmov 0 }
  0x78   :  { %v9921_v7 = vsel %vm5596_vm6, 4294967295, %v9920_v7  ;;  %vm5603_vm2 = vmor %vm351_vm15, %vm613_vm13  ;;  %vm334_vm15 = vcmp.eq.s32.totalorder %v73_v4, %v4993_v5  ;;  %v9933_v4 = vmov 0 }
  0x79   :  { %9922 = vst [vmem:[#allocation21_spill] sm:$0xff] %v9921_v7  ;;  %v9924_v23 = vsel %vm5603_vm2, 4294967295, %v9923_v23  ;;  %vm9299_vm12 = vmpackc.low %vm5603_vm2, %vm5596_vm6  ;;  %vm367_vm6 = vcmp.eq.s32.totalorder %v106_v47, %v4993_v5  ;;  %vm629_vm2 = vcmp.eq.s32.totalorder %v106_v47, %v5000_v9  ;;  %v124_v47 = vadd.s32 504, %v4985_v1  ;;  %v5738_v7 = vld [vmem:[#allocation6 + $0x18] sm:$0xff] }
  0x7a   :  { %9925 = vst [vmem:[#allocation22_spill] sm:$0xff] %v9924_v23  ;;  %4140 = vmatprep.subr.msk.bf16.mxu0 %vm9299_vm12, %v9296_v15  ;;  %vm5620_vm13 = vmor %vm382_vm3, %vm644_vm9  ;;  %v91_v15 = vadd.s32 240, %v4985_v1  ;;  %vm628_vm9 = vcmp.eq.s32.totalorder %v105_v31, %v5000_v9  ;;  %v5740_v23 = vld [vmem:[#allocation6 + $0x58] sm:$0xff] }
  0x7b   :  { %v9927_v39 = vsel %vm5620_vm13, 4294967295, %v9926_v39  ;;  %vm5627_vm1 = vmor %vm383_vm8, %vm645_vm5  ;;  %vm366_vm8 = vcmp.eq.s32.totalorder %v105_v31, %v4993_v5  ;;  %v9939_v31 = vmov 0 }
  0x7c   :  { %9928 = vst [vmem:[#allocation23_spill] sm:$0xff] %v9927_v39  ;;  %v9930_v55 = vsel %vm5627_vm1, 4294967295, %v9929_v55  ;;  %vm9304_vm3 = vmpackc.low %vm5627_vm1, %vm5620_vm13  ;;  %v123_v39 = vadd.s32 496, %v4985_v1  ;;  %vm353_vm13 = vcmp.eq.s32.totalorder %v92_v14, %v4993_v5  ;;  %vm615_vm1 = vcmp.eq.s32.totalorder %v92_v14, %v5000_v9 }
  0x7d   :  { %9931 = vst [vmem:[#allocation24_spill] sm:$0xff] %v9930_v55  ;;  %4180 = vmatprep.subr.msk.bf16.mxu1 %vm9304_vm3, %v9932_v51  ;;  %vm5644_vm5 = vmor %vm334_vm15, %vm596_vm0  ;;  %vm614_vm0 = vcmp.eq.s32.totalorder %v91_v15, %v5000_v9  ;;  %v9942_v55 = vmov 0  ;;  %v76_v14 = vadd.s32 120, %v4985_v1 }
  0x7e   :  { %v9934_v4 = vsel %vm5644_vm5, 4294967295, %v9933_v4  ;;  %vm5651_vm12 = vmor %vm335_vm11, %vm597_vm10  ;;  %vm352_vm11 = vcmp.eq.s32.totalorder %v91_v15, %v4993_v5  ;;  %v9945_v15 = vmov 0 }
  0x7f   :  { %9935 = vst [vmem:[#allocation25_spill] sm:$0xff] %v9934_v4  ;;  %v9937_v61 = vsel %vm5651_vm12, 4294967295, %v9936_v61  ;;  %vm9309_vm15 = vmpackc.low %vm5651_vm12, %vm5644_vm5  ;;  %v75_v4 = vadd.s32 112, %v4985_v1  ;;  %vm385_vm5 = vcmp.eq.s32.totalorder %v124_v47, %v4993_v5  ;;  %vm647_vm12 = vcmp.eq.s32.totalorder %v124_v47, %v5000_v9 }
  0x80   :  { %9938 = vst [vmem:[#allocation26_spill] sm:$0xff] %v9937_v61  ;;  %4141 = vmatpush3.bf16.msk.msra.mxu0 %vm9309_vm15, %v9932_v51  ;;  %vm5668_vm10 = vmor %vm366_vm8, %vm628_vm9  ;;  %vm646_vm9 = vcmp.eq.s32.totalorder %v123_v39, %v5000_v9  ;;  %v9948_v61 = vmov 0  ;;  %v108_v47 = vadd.s32 376, %v4985_v1 }
  0x81   :  { %v9940_v31 = vsel %vm5668_vm10, 4294967295, %v9939_v31  ;;  %vm5675_vm3 = vmor %vm367_vm6, %vm629_vm2  ;;  %vm384_vm6 = vcmp.eq.s32.totalorder %v123_v39, %v4993_v5  ;;  %v9951_v39 = vmov 0 }
  0x82   :  { %9941 = vst [vmem:[#allocation27_spill] sm:$0xff] %v9940_v31  ;;  %v9943_v55 = vsel %vm5675_vm3, 4294967295, %v9942_v55  ;;  %vm9314_vm8 = vmpackc.low %vm5675_vm3, %vm5668_vm10  ;;  %v107_v31 = vadd.s32 368, %v4985_v1  ;;  %vm337_vm10 = vcmp.eq.s32.totalorder %v76_v14, %v4993_v5  ;;  %vm599_vm3 = vcmp.eq.s32.totalorder %v76_v14, %v5000_v9  ;;  %v5795_v14 = vld [vmem:[#allocation6 + $0xc8] sm:$0xff] }
  0x83   :  { %9944 = vst [vmem:[#allocation28_spill] sm:$0xff] %v9943_v55  ;;  %4181 = vmatpush3.bf16.msk.msra.mxu1 %vm9314_vm8, %v9932_v51  ;;  %vm5692_vm2 = vmor %vm352_vm11, %vm614_vm0  ;;  %vm598_vm0 = vcmp.eq.s32.totalorder %v75_v4, %v5000_v9  ;;  %v9954_v55 = vmov 0 }
  0x84   :  { %v9946_v15 = vsel %vm5692_vm2, 4294967295, %v9945_v15  ;;  %vm5699_vm15 = vmor %vm353_vm13, %vm615_vm1  ;;  %vm336_vm13 = vcmp.eq.s32.totalorder %v75_v4, %v4993_v5  ;;  %v141_v4 = vadd.s32 640, %v4985_v1 }
  0x85   :  { %9947 = vst [vmem:[#allocation29_spill] sm:$0xff] %v9946_v15  ;;  %v9949_v61 = vsel %vm5699_vm15, 4294967295, %v9948_v61  ;;  %vm9326_vm11 = vmpackc.low %vm5699_vm15, %vm5692_vm2  ;;  %v5729_v15 = vld [vmem:[#allocation6 + $0x10] sm:$0xff] }
  0x86   :  { %9950 = vst [vmem:[#allocation30_spill] sm:$0xff] %v9949_v61  ;;  %4142 = vmatprep.subr.msk.bf16.mxu0 %vm9326_vm11, %v9932_v51  ;;  %vm5716_vm1 = vmor %vm384_vm6, %vm646_vm9  ;;  %v5731_v61 = vld [vmem:[#allocation6 + $0x50] sm:$0xff]  ;;  %vm630_vm9 = vcmp.eq.s32.totalorder %v107_v31, %v5000_v9 }
  0x87   :  { %v9952_v39 = vsel %vm5716_vm1, 4294967295, %v9951_v39  ;;  %vm5723_vm8 = vmor %vm385_vm5, %vm647_vm12  ;;  %vm368_vm5 = vcmp.eq.s32.totalorder %v107_v31, %v4993_v5  ;;  %v3484_v31 = vcombine.low %v5285_v59, %v5287_v60  ;;  %v174_v59 = vadd.s32 904, %v4985_v1 }
  0x88   :  { %9953 = vst [vmem:[#allocation31_spill] sm:$0xff] %v9952_v39  ;;  %v9955_v55 = vsel %vm5723_vm8, 4294967295, %v9954_v55  ;;  %vm9328_vm6 = vmpackc.low %vm5723_vm8, %vm5716_vm1  ;;  %v9960_v39 = vmov 0  ;;  %v3501_v60 = vcombine.high %v5755_v19, %v5757_v27 }
  0x89   :  { %9956 = vst [vmem:[#allocation32_spill] sm:$0xff] %v9955_v55  ;;  %4182 = vmatprep.subr.msk.bf16.mxu1 %vm9328_vm6, %v9932_v51  ;;  %vm5748_vm12 = vmor %vm336_vm13, %vm598_vm0  ;;  %vm631_vm0 = vcmp.eq.s32.totalorder %v108_v47, %v5000_v9  ;;  %v173_v55 = vadd.s32 896, %v4985_v1  ;;  %vm664_vm13 = vcmp.eq.s32.totalorder %v141_v4, %v5000_v9 }
  0x8a   :  { %v9958_v35 = vsel %vm5748_vm12, 4294967295, %v9957_v35  ;;  %vm5761_vm11 = vmor %vm337_vm10, %vm599_vm3  ;;  %vm402_vm10 = vcmp.eq.s32.totalorder %v141_v4, %v4993_v5  ;;  %v3486_v4 = vcombine.low %v5294_v62, %v5296_v63  ;;  %v126_v62 = vadd.s32 520, %v4985_v1 }
  0x8b   :  { %9959 = vst [vmem:[#allocation33_spill] sm:$0xff] %v9958_v35  ;;  %v9961_v39 = vsel %vm5761_vm11, 4294967295, %v9960_v39  ;;  %vm9333_vm6 = vmpackc.low %vm5761_vm11, %vm5748_vm12  ;;  %vm9966_vm12 = vcmp.eq.s32.totalorder %v108_v47, %v4993_v5  ;;  %v9967_v35 = vmov 0  ;;  %vm696_vm1 = vcmp.eq.s32.totalorder %v173_v55, %v5000_v9 }
  0x8c   :  { %9962 = vst [vmem:[#allocation34_spill] sm:$0xff] %v9961_v39  ;;  %4143 = vmatpush3.bf16.msk.msra.mxu0 %vm9333_vm6, %v9932_v51  ;;  %vm5784_vm3 = vmor %vm368_vm5, %vm630_vm9  ;;  %vm403_vm5 = vcmp.eq.s32.totalorder %v142_v43, %v4993_v5  ;;  %vm665_vm9 = vcmp.eq.s32.totalorder %v142_v43, %v5000_v9  ;;  %v125_v39 = vadd.s32 512, %v4985_v1  ;;  %v9970_v43 = vmov 0 }
  0x8d   :  { %v9964_v2 = vsel %vm5784_vm3, 4294967295, %v9963_v2  ;;  %vm5799_vm6 = vmor %vm9966_vm12, %vm631_vm0  ;;  %vm434_vm0 = vcmp.eq.s32.totalorder %v173_v55, %v4993_v5  ;;  %v3503_v63 = vcombine.high %v5793_v57, %v5795_v14  ;;  %v9973_v47 = vmov 0 }
  0x8e   :  { %9965 = vst [vmem:[#allocation35_spill] sm:$0xff] %v9964_v2  ;;  %v9968_v35 = vsel %vm5799_vm6, 4294967295, %v9967_v35  ;;  %vm9339_vm11 = vmpackc.low %vm5799_vm6, %vm5784_vm3  ;;  %v157_v55 = vadd.s32 768, %v4985_v1  ;;  %v5840_v2 = vld [vmem:[#allocation6 + $0x140] sm:$0xff]  ;;  %vm648_vm3 = vcmp.eq.s32.totalorder %v125_v39, %v5000_v9  ;;  %vm387_vm2 = vcmp.eq.s32.totalorder %v126_v62, %v4993_v5 }
  0x8f   :  { %9969 = vst [vmem:[#allocation36_spill] sm:$0xff] %v9968_v35  ;;  %4183 = vmatpush3.bf16.msk.msra.mxu1 %vm9339_vm11, %v9932_v51  ;;  %1961 = vmatmul.mubr.bf16.vlgmr.msra.gmra.mrb[0].mxu0 %v3484_v31  ;;  %vm5818_vm12 = vmor %vm402_vm10, %vm664_vm13  ;;  %vm435_vm11 = vcmp.eq.s32.totalorder %v174_v59, %v4993_v5  ;;  %vm697_vm13 = vcmp.eq.s32.totalorder %v174_v59, %v5000_v9  ;;  %v5838_v31 = vld [vmem:[#allocation6 + $0x100] sm:$0xff]  ;;  %v9976_v59 = vmov 0  ;;  %v9979_v35 = vmov 0 }
  0x90   :  { %v9971_v43 = vsel %vm5818_vm12, 4294967295, %v9970_v43  ;;  %vm5827_vm8 = vmor %vm403_vm5, %vm665_vm9  ;;  %1968 = vmatprep.mubr.bf16.mxu0 %v3501_v60  ;;  %vm386_vm9 = vcmp.eq.s32.totalorder %v125_v39, %v4993_v5  ;;  %v158_v60 = vadd.s32 776, %v4985_v1  ;;  %vm649_vm15 = vcmp.eq.s32.totalorder %v126_v62, %v5000_v9 }
  0x91   :  { %9972 = vst [vmem:[#allocation37_spill] sm:$0xff] %v9971_v43  ;;  %v9974_v47 = vsel %vm5827_vm8, 4294967295, %v9973_v47  ;;  %vm9349_vm10 = vmpackc.low %vm5827_vm8, %vm5818_vm12  ;;  %v143_v39 = vadd.s32 656, %v4985_v1  ;;  %v3517_v43 = vcombine.high %v5838_v31, %v5840_v2  ;;  %v9985_v62 = vmov 0 }
  0x92   :  { %9975 = vst [vmem:[#allocation38_spill] sm:$0xff] %v9974_v47  ;;  %2026 = vmatmul.mubr.bf16.vlgmr.msra.gmra.mrb[0].mxu1 %v3486_v4  ;;  %4208 = vmatprep.subr.msk.bf16.mxu0 %vm9349_vm10, %v9932_v51  ;;  %vm5848_vm5 = vmor %vm434_vm0, %vm696_vm1  ;;  %v3500_v4 = vcombine.low %v5755_v19, %v5757_v27  ;;  %v5870_v47 = vld [vmem:[#allocation6 + $0x108] sm:$0xff]  ;;  %v9982_v19 = vmov 0  ;;  %vm418_vm0 = vcmp.eq.s32.totalorder %v157_v55, %v4993_v5  ;;  %v144_v27 = vadd.s32 664, %v4985_v1 }
  0x93   :  { %v9977_v59 = vsel %vm5848_vm5, 4294967295, %v9976_v59  ;;  %vm5855_vm6 = vmor %vm435_vm11, %vm697_vm13  ;;  %2033 = vmatprep.mubr.bf16.mxu1 %v3503_v63  ;;  %vm680_vm13 = vcmp.eq.s32.totalorder %v157_v55, %v5000_v9  ;;  %vm419_vm12 = vcmp.eq.s32.totalorder %v158_v60, %v4993_v5  ;;  %vm681_vm8 = vcmp.eq.s32.totalorder %v158_v60, %v5000_v9 }
  0x94   :  { %9978 = vst [vmem:[#allocation39_spill] sm:$0xff] %v9977_v59  ;;  %v9980_v35 = vsel %vm5855_vm6, 4294967295, %v9979_v35  ;;  %vm9353_vm1 = vmpackc.low %vm5855_vm6, %vm5848_vm5  ;;  %v3502_v63 = vcombine.low %v5793_v57, %v5795_v14  ;;  %v175_v55 = vadd.s32 912, %v4985_v1  ;;  %v3519_v59 = vcombine.high %v5870_v47, %v5872_v6 }
  0x95   :  { %9981 = vst [vmem:[#allocation40_spill] sm:$0xff] %v9980_v35  ;;  %4248 = vmatprep.subr.msk.bf16.mxu1 %vm9353_vm1, %v9932_v51  ;;  %vm5880_vm11 = vmor %vm386_vm9, %vm648_vm3  ;;  %v9988_v57 = vmov 0  ;;  %vm666_vm9 = vcmp.eq.s32.totalorder %v143_v39, %v5000_v9  ;;  %v176_v14 = vadd.s32 920, %v4985_v1  ;;  %v9991_v60 = vmov 0  ;;  %v1601_v35 = vld [vmem:[#allocation6 + $0x1c8] sm:$0xff] }
  0x96   :  { %v9983_v19 = vsel %vm5880_vm11, 4294967295, %v9982_v19  ;;  %vm5887_vm10 = vmor %vm387_vm2, %vm649_vm15  ;;  %vm404_vm2 = vcmp.eq.s32.totalorder %v143_v39, %v4993_v5  ;;  %vm405_vm5 = vcmp.eq.s32.totalorder %v144_v27, %v4993_v5  ;;  %v127_v39 = vadd.s32 528, %v4985_v1 }
  0x97   :  { %9984 = vst [vmem:[#allocation41_spill] sm:$0xff] %v9983_v19  ;;  %v9986_v62 = vsel %vm5887_vm10, 4294967295, %v9985_v62  ;;  %vm9357_vm3 = vmpackc.low %vm5887_vm10, %vm5880_vm11  ;;  %1969 = vmatmul.mubr.bf16.gmra.mrb[4].mxu0 %v3500_v4  ;;  %vm667_vm11 = vcmp.eq.s32.totalorder %v144_v27, %v5000_v9  ;;  %v5921_v4 = vld [vmem:[#allocation6 + $0x180] sm:$0xff]  ;;  %v128_v27 = vadd.s32 536, %v4985_v1 }
  0x98   :  { %9987 = vst [vmem:[#allocation42_spill] sm:$0xff] %v9986_v62  ;;  %4209 = vmatpush3.bf16.msk.msra.mxu0 %vm9357_vm3, %v9932_v51  ;;  %vm5908_vm15 = vmor %vm418_vm0, %vm680_vm13  ;;  %1976 = vmatprep.mubr.bf16.mxu0 %v3517_v43  ;;  %v5923_v19 = vld [vmem:[#allocation6 + $0x1c0] sm:$0xff]  ;;  %v9994_v43 = vmov 0  ;;  %vm698_vm13 = vcmp.eq.s32.totalorder %v175_v55, %v5000_v9  ;;  %v1593_v62 = vld [vmem:[#allocation6 + $0x188] sm:$0xff] }
  0x99   :  { %v9989_v57 = vsel %vm5908_vm15, 4294967295, %v9988_v57  ;;  %vm5915_vm1 = vmor %vm419_vm12, %vm681_vm8  ;;  %vm436_vm12 = vcmp.eq.s32.totalorder %v175_v55, %v4993_v5  ;;  %v3518_v55 = vcombine.low %v5870_v47, %v5872_v6  ;;  %v10006_v6 = vmov 0 }
  0x9a   :  { %9990 = vst [vmem:[#allocation43_spill] sm:$0xff] %v9989_v57  ;;  %v9992_v60 = vsel %vm5915_vm1, 4294967295, %v9991_v60  ;;  %vm9359_vm0 = vmpackc.low %vm5915_vm1, %vm5908_vm15  ;;  %2034 = vmatmul.mubr.bf16.gmra.mrb[4].mxu1 %v3502_v63  ;;  %v3516_v63 = vcombine.low %v5838_v31, %v5840_v2  ;;  %v3533_v57 = vcombine.high %v5921_v4, %v5923_v19  ;;  %v159_v2 = vadd.s32 784, %v4985_v1 }
  0x9b   :  { %9993 = vst [vmem:[#allocation44_spill] sm:$0xff] %v9992_v60  ;;  %4249 = vmatpush3.bf16.msk.msra.mxu1 %vm9359_vm0, %v9932_v51  ;;  %vm5936_vm8 = vmor %vm404_vm2, %vm666_vm9  ;;  %2041 = vmatprep.mubr.bf16.mxu1 %v3519_v59  ;;  %v9997_v60 = vmov 0  ;;  %vm437_vm0 = vcmp.eq.s32.totalorder %v176_v14, %v4993_v5  ;;  %vm699_vm2 = vcmp.eq.s32.totalorder %v176_v14, %v5000_v9  ;;  %v10000_v31 = vmov 0 }
  0x9c   :  { %v9995_v43 = vsel %vm5936_vm8, 4294967295, %v9994_v43  ;;  %vm5945_vm3 = vmor %vm405_vm5, %vm667_vm11  ;;  %vm388_vm11 = vcmp.eq.s32.totalorder %v127_v39, %v4993_v5  ;;  %vm650_vm15 = vcmp.eq.s32.totalorder %v127_v39, %v5000_v9  ;;  %v160_v59 = vadd.s32 792, %v4985_v1 }
  0x9d   :  { %9996 = vst [vmem:[#allocation45_spill] sm:$0xff] %v9995_v43  ;;  %v9998_v60 = vsel %vm5945_vm3, 4294967295, %v9997_v60  ;;  %vm9367_vm9 = vmpackc.low %vm5945_vm3, %vm5936_vm8  ;;  %v10003_v14 = vmov 0  ;;  %vm389_vm8 = vcmp.eq.s32.totalorder %v128_v27, %v4993_v5  ;;  %v3535_v43 = vcombine.high %v1593_v62, %v1601_v35 }
  0x9e   :  { %9999 = vst [vmem:[#allocation46_spill] sm:$0xff] %v9998_v60  ;;  %4210 = vmatprep.subr.msk.bf16.mxu0 %vm9367_vm9, %v9932_v51  ;;  %vm5964_vm5 = vmor %vm436_vm12, %vm698_vm13  ;;  %vm651_vm12 = vcmp.eq.s32.totalorder %v128_v27, %v5000_v9  ;;  %v145_v39 = vadd.s32 672, %v4985_v1  ;;  %vm682_vm9 = vcmp.eq.s32.totalorder %v159_v2, %v5000_v9  ;;  %v146_v47 = vadd.s32 680, %v4985_v1 }
  0x9f   :  { %v10001_v31 = vsel %vm5964_vm5, 4294967295, %v10000_v31  ;;  %vm5973_vm1 = vmor %vm437_vm0, %vm699_vm2  ;;  %1977 = vmatmul.mubr.bf16.gmra.mrb[8].mxu0 %v3516_v63  ;;  %vm420_vm2 = vcmp.eq.s32.totalorder %v159_v2, %v4993_v5  ;;  %v10009_v27 = vmov 0  ;;  %vm421_vm10 = vcmp.eq.s32.totalorder %v160_v59, %v4993_v5 }
  0xa0   :  { %10002 = vst [vmem:[#allocation47_spill] sm:$0xff] %v10001_v31  ;;  %v10004_v14 = vsel %vm5973_vm1, 4294967295, %v10003_v14  ;;  %vm9371_vm13 = vmpackc.low %vm5973_vm1, %vm5964_vm5  ;;  %1984 = vmatprep.mubr.bf16.mxu0 %v3533_v57  ;;  %vm683_vm6 = vcmp.eq.s32.totalorder %v160_v59, %v5000_v9  ;;  %v177_v57 = vadd.s32 928, %v4985_v1  ;;  %v3532_v63 = vcombine.low %v5921_v4, %v5923_v19  ;;  %v6622_v31 = vld [vmem:[#allocation6 + $0x98] sm:$0xff] }
  0xa1   :  { %10005 = vst [vmem:[#allocation48_spill] sm:$0xff] %v10004_v14  ;;  %4250 = vmatprep.subr.msk.bf16.mxu1 %vm9371_vm13, %v9932_v51  ;;  %vm5990_vm0 = vmor %vm388_vm11, %vm650_vm15  ;;  %v10012_v2 = vmov 0  ;;  %vm406_vm11 = vcmp.eq.s32.totalorder %v145_v39, %v4993_v5  ;;  %v3489_v19 = vcombine.high %v5729_v15, %v5731_v61  ;;  %v10015_v4 = vmov 0  ;;  %v6624_v14 = vld [vmem:[#allocation6 + $0xd8] sm:$0xff] }
  0xa2   :  { %v10007_v6 = vsel %vm5990_vm0, 4294967295, %v10006_v6  ;;  %vm5997_vm3 = vmor %vm389_vm8, %vm651_vm12  ;;  %2042 = vmatmul.mubr.bf16.gmra.mrb[8].mxu1 %v3518_v55  ;;  %vm668_vm12 = vcmp.eq.s32.totalorder %v145_v39, %v5000_v9  ;;  %v129_v59 = vadd.s32 544, %v4985_v1  ;;  %v3534_v55 = vcombine.low %v1593_v62, %v1601_v35 }
  0xa3   :  { %10008 = vst [vmem:[#allocation49_spill] sm:$0xff] %v10007_v6  ;;  %v10010_v27 = vsel %vm5997_vm3, 4294967295, %v10009_v27  ;;  %vm9373_vm15 = vmpackc.low %vm5997_vm3, %vm5990_vm0  ;;  %2049 = vmatprep.mubr.bf16.mxu1 %v3535_v43  ;;  %v178_v43 = vadd.s32 936, %v4985_v1  ;;  %vm407_vm0 = vcmp.eq.s32.totalorder %v146_v47, %v4993_v5  ;;  %v10018_v39 = vmov 0 }
  0xa4   :  { %10011 = vst [vmem:[#allocation50_spill] sm:$0xff] %v10010_v27  ;;  %4211 = vmatpush3.bf16.msk.msra.mxu0 %vm9373_vm15, %v9932_v51  ;;  %vm6016_vm8 = vmor %vm420_vm2, %vm682_vm9  ;;  %vm669_vm9 = vcmp.eq.s32.totalorder %v146_v47, %v5000_v9  ;;  %vm700_vm15 = vcmp.eq.s32.totalorder %v177_v57, %v5000_v9  ;;  %v130_v47 = vadd.s32 552, %v4985_v1  ;;  %v3491_v35 = vcombine.high %v5738_v7, %v5740_v23 }
  0xa5   :  { %v10013_v2 = vsel %vm6016_vm8, 4294967295, %v10012_v2  ;;  %vm6025_vm13 = vmor %vm421_vm10, %vm683_vm6  ;;  %vm438_vm10 = vcmp.eq.s32.totalorder %v177_v57, %v4993_v5  ;;  %v10021_v62 = vmov 0  ;;  %v161_v57 = vadd.s32 800, %v4985_v1 }
  0xa6   :  { %10014 = vst [vmem:[#allocation51_spill] sm:$0xff] %v10013_v2  ;;  %v10016_v4 = vsel %vm6025_vm13, 4294967295, %v10015_v4  ;;  %vm9375_vm2 = vmpackc.low %vm6025_vm13, %vm6016_vm8  ;;  %vm652_vm8 = vcmp.eq.s32.totalorder %v129_v59, %v5000_v9  ;;  %vm391_vm5 = vcmp.eq.s32.totalorder %v130_v47, %v4993_v5  ;;  %v147_v2 = vadd.s32 688, %v4985_v1 }
  0xa7   :  { %10017 = vst [vmem:[#allocation52_spill] sm:$0xff] %v10016_v4  ;;  %4251 = vmatpush3.bf16.msk.msra.mxu1 %vm9375_vm2, %v9932_v51  ;;  %vm6042_vm6 = vmor %vm406_vm11, %vm668_vm12  ;;  %1985 = vmatmul.mubr.bf16.gmra.mrb[12].mxu0 %v3532_v63  ;;  %vm439_vm2 = vcmp.eq.s32.totalorder %v178_v43, %v4993_v5  ;;  %vm701_vm11 = vcmp.eq.s32.totalorder %v178_v43, %v5000_v9  ;;  %v10024_v63 = vmov 0  ;;  %v162_v43 = vadd.s32 808, %v4985_v1  ;;  %v6380_v4 = vld [vmem:[#allocation6 + $0x28] sm:$0xff] }
  0xa8   :  { %v10019_v39 = vsel %vm6042_vm6, 4294967295, %v10018_v39  ;;  %vm6051_vm3 = vmor %vm407_vm0, %vm669_vm9  ;;  %2090 = vmatprep.mubr.bf16.mxu0 %v3489_v19  ;;  %vm390_vm9 = vcmp.eq.s32.totalorder %v129_v59, %v4993_v5  ;;  %v10027_v19 = vmov 0  ;;  %v10030_v59 = vmov 0 }
  0xa9   :  { %10020 = vst [vmem:[#allocation53_spill] sm:$0xff] %v10019_v39  ;;  %v10022_v62 = vsel %vm6051_vm3, 4294967295, %v10021_v62  ;;  %vm9381_vm12 = vmpackc.low %vm6051_vm3, %vm6042_vm6  ;;  %vm653_vm6 = vcmp.eq.s32.totalorder %v130_v47, %v5000_v9  ;;  %v10033_v47 = vmov 0  ;;  %vm423_vm3 = vcmp.eq.s32.totalorder %v162_v43, %v4993_v5  ;;  %v6382_v39 = vld [vmem:[#allocation6 + $0x68] sm:$0xff] }
  0xaa   :  { %10023 = vst [vmem:[#allocation54_spill] sm:$0xff] %v10022_v62  ;;  %4212 = vmatprep.subr.msk.bf16.mxu0 %vm9381_vm12, %v9932_v51  ;;  %vm6068_vm0 = vmor %vm438_vm10, %vm700_vm15  ;;  %2050 = vmatmul.mubr.bf16.gmra.mrb[12].mxu1 %v3534_v55  ;;  %vm422_vm10 = vcmp.eq.s32.totalorder %v161_v57, %v4993_v5  ;;  %v148_v55 = vadd.s32 696, %v4985_v1  ;;  %vm685_vm1 = vcmp.eq.s32.totalorder %v162_v43, %v5000_v9  ;;  %v180_v43 = vadd.s32 952, %v4985_v1 }
  0xab   :  { %v10025_v63 = vsel %vm6068_vm0, 4294967295, %v10024_v63  ;;  %vm6075_vm13 = vmor %vm439_vm2, %vm701_vm11  ;;  %2155 = vmatprep.mubr.bf16.mxu1 %v3491_v35  ;;  %vm684_vm11 = vcmp.eq.s32.totalorder %v161_v57, %v5000_v9  ;;  %v179_v35 = vadd.s32 944, %v4985_v1  ;;  %v10036_v57 = vmov 0 }
  0xac   :  { %10026 = vst [vmem:[#allocation55_spill] sm:$0xff] %v10025_v63  ;;  %v10028_v19 = vsel %vm6075_vm13, 4294967295, %v10027_v19  ;;  %vm9384_vm15 = vmpackc.low %vm6075_vm13, %vm6068_vm0  ;;  %v10039_v63 = vmov 0  ;;  %vm409_vm0 = vcmp.eq.s32.totalorder %v148_v55, %v4993_v5  ;;  %vm671_vm13 = vcmp.eq.s32.totalorder %v148_v55, %v5000_v9 }
  0xad   :  { %10029 = vst [vmem:[#allocation56_spill] sm:$0xff] %v10028_v19  ;;  %4252 = vmatprep.subr.msk.bf16.mxu1 %vm9384_vm15, %v9932_v51  ;;  %vm6092_vm2 = vmor %vm390_vm9, %vm652_vm8  ;;  %vm670_vm9 = vcmp.eq.s32.totalorder %v147_v2, %v5000_v9  ;;  %v132_v55 = vadd.s32 568, %v4985_v1  ;;  %v6370_v19 = vld [vmem:[#allocation6 + $0x60] sm:$0xff]  ;;  %v153_v62 = vadd.s32 736, %v4985_v1  ;;  %v10105_v6 = vmov 0 }
  0xae   :  { %v10031_v59 = vsel %vm6092_vm2, 4294967295, %v10030_v59  ;;  %vm6099_vm12 = vmor %vm391_vm5, %vm653_vm6  ;;  %vm408_vm6 = vcmp.eq.s32.totalorder %v147_v2, %v4993_v5  ;;  %v10042_v2 = vmov 0  ;;  %v10153_v27 = vmov 0 }
  0xaf   :  { %10032 = vst [vmem:[#allocation57_spill] sm:$0xff] %v10031_v59  ;;  %v10034_v47 = vsel %vm6099_vm12, 4294967295, %v10033_v47  ;;  %vm9389_vm8 = vmpackc.low %vm6099_vm12, %vm6092_vm2  ;;  %v131_v59 = vadd.s32 560, %v4985_v1  ;;  %vm655_vm12 = vcmp.eq.s32.totalorder %v132_v55, %v5000_v9  ;;  %v190_v60 = vadd.s32 1032, %v4985_v1 }
  0xb0   :  { %10035 = vst [vmem:[#allocation58_spill] sm:$0xff] %v10034_v47  ;;  %4213 = vmatpush3.bf16.msk.msra.mxu0 %vm9389_vm8, %v9932_v51  ;;  %vm6116_vm5 = vmor %vm422_vm10, %vm684_vm11  ;;  %vm702_vm11 = vcmp.eq.s32.totalorder %v179_v35, %v5000_v9  ;;  %v10045_v47 = vmov 0 }
  0xb1   :  { %v10037_v57 = vsel %vm6116_vm5, 4294967295, %v10036_v57  ;;  %vm6123_vm15 = vmor %vm423_vm3, %vm685_vm1  ;;  %vm440_vm3 = vcmp.eq.s32.totalorder %v179_v35, %v4993_v5  ;;  %v163_v5 = vadd.s32 816, %v4985_v1  ;;  %v10048_v35 = vmov 0 }
  0xb2   :  { %10038 = vst [vmem:[#allocation59_spill] sm:$0xff] %v10037_v57  ;;  %v10040_v63 = vsel %vm6123_vm15, 4294967295, %v10039_v63  ;;  %vm9392_vm10 = vmpackc.low %vm6123_vm15, %vm6116_vm5  ;;  %v6154_v57 = vld [vmem:[%s9218_s0] ss:$0 sm:$0xff]  ;;  %vm654_vm5 = vcmp.eq.s32.totalorder %v131_v59, %v5000_v9 }
  0xb3   :  { %10041 = vst [vmem:[#allocation60_spill] sm:$0xff] %v10040_v63  ;;  %4253 = vmatpush3.bf16.msk.msra.mxu1 %vm9392_vm10, %v9932_v51  ;;  %vm6140_vm1 = vmor %vm408_vm6, %vm670_vm9  ;;  %vm441_vm6 = vcmp.eq.s32.totalorder %v180_v43, %v6154_v57  ;;  %vm703_vm9 = vcmp.eq.s32.totalorder %v180_v43, %v5000_v9  ;;  %v164_v43 = vadd.s32 824, %v4985_v1  ;;  %v10051_v63 = vmov 0 }
  0xb4   :  { %v10043_v2 = vsel %vm6140_vm1, 4294967295, %v10042_v2  ;;  %vm6147_vm8 = vmor %vm409_vm0, %vm671_vm13  ;;  %vm392_vm0 = vcmp.eq.s32.totalorder %v131_v59, %v6154_v57  ;;  %vm393_vm2 = vcmp.eq.s32.totalorder %v132_v55, %v6154_v57  ;;  %v10054_v59 = vmov 0 }
  0xb5   :  { %10044 = vst [vmem:[#allocation61_spill] sm:$0xff] %v10043_v2  ;;  %v10046_v47 = vsel %vm6147_vm8, 4294967295, %v10045_v47  ;;  %vm9399_vm10 = vmpackc.low %vm6147_vm8, %vm6140_vm1  ;;  %v149_v2 = vadd.s32 704, %v4985_v1  ;;  %v150_v55 = vadd.s32 712, %v4985_v1  ;;  %vm425_vm1 = vcmp.eq.s32.totalorder %v164_v43, %v6154_v57 }
  0xb6   :  { %10047 = vst [vmem:[#allocation62_spill] sm:$0xff] %v10046_v47  ;;  %4214 = vmatprep.subr.msk.bf16.mxu0 %vm9399_vm10, %v9932_v51  ;;  %vm6169_vm13 = vmor %vm440_vm3, %vm702_vm11  ;;  %v10057_v47 = vmov 0  ;;  %vm687_vm8 = vcmp.eq.s32.totalorder %v164_v43, %v5000_v9  ;;  %v182_v43 = vadd.s32 968, %v4985_v1 }
  0xb7   :  { %v10049_v35 = vsel %vm6169_vm13, 4294967295, %v10048_v35  ;;  %vm6176_vm15 = vmor %vm441_vm6, %vm703_vm9  ;;  %vm424_vm6 = vcmp.eq.s32.totalorder %v163_v5, %v6154_v57  ;;  %vm686_vm9 = vcmp.eq.s32.totalorder %v163_v5, %v5000_v9  ;;  %v10060_v5 = vmov 0 }
  0xb8   :  { %10050 = vst [vmem:[#allocation63_spill] sm:$0xff] %v10049_v35  ;;  %v10052_v63 = vsel %vm6176_vm15, 4294967295, %v10051_v63  ;;  %vm9404_vm3 = vmpackc.low %vm6176_vm15, %vm6169_vm13  ;;  %v181_v35 = vadd.s32 960, %v4985_v1  ;;  %vm411_vm13 = vcmp.eq.s32.totalorder %v150_v55, %v6154_v57  ;;  %vm673_vm15 = vcmp.eq.s32.totalorder %v150_v55, %v5000_v9 }
  0xb9   :  { %10053 = vst [vmem:[#allocation64_spill] sm:$0xff] %v10052_v63  ;;  %4254 = vmatprep.subr.msk.bf16.mxu1 %vm9404_vm3, %v9932_v51  ;;  %vm6193_vm11 = vmor %vm392_vm0, %vm654_vm5  ;;  %vm672_vm0 = vcmp.eq.s32.totalorder %v149_v2, %v5000_v9  ;;  %v10063_v63 = vmov 0  ;;  %v134_v55 = vadd.s32 584, %v4985_v1 }
  0xba   :  { %v10055_v59 = vsel %vm6193_vm11, 4294967295, %v10054_v59  ;;  %vm6200_vm10 = vmor %vm393_vm2, %vm655_vm12  ;;  %vm410_vm2 = vcmp.eq.s32.totalorder %v149_v2, %v6154_v57  ;;  %v10066_v2 = vmov 0 }
  0xbb   :  { %10056 = vst [vmem:[#allocation65_spill] sm:$0xff] %v10055_v59  ;;  %v10058_v47 = vsel %vm6200_vm10, 4294967295, %v10057_v47  ;;  %vm9409_vm5 = vmpackc.low %vm6200_vm10, %vm6193_vm11  ;;  %v133_v59 = vadd.s32 576, %v4985_v1  ;;  %vm443_vm11 = vcmp.eq.s32.totalorder %v182_v43, %v6154_v57  ;;  %vm705_vm10 = vcmp.eq.s32.totalorder %v182_v43, %v5000_v9 }
  0xbc   :  { %10059 = vst [vmem:[#allocation66_spill] sm:$0xff] %v10058_v47  ;;  %4215 = vmatpush3.bf16.msk.msra.mxu0 %vm9409_vm5, %v9932_v51  ;;  %vm6217_vm12 = vmor %vm424_vm6, %vm686_vm9  ;;  %vm704_vm9 = vcmp.eq.s32.totalorder %v181_v35, %v5000_v9  ;;  %v10069_v47 = vmov 0  ;;  %v166_v43 = vadd.s32 840, %v4985_v1 }
  0xbd   :  { %v10061_v5 = vsel %vm6217_vm12, 4294967295, %v10060_v5  ;;  %vm6224_vm3 = vmor %vm425_vm1, %vm687_vm8  ;;  %vm442_vm1 = vcmp.eq.s32.totalorder %v181_v35, %v6154_v57  ;;  %v10072_v35 = vmov 0 }
  0xbe   :  { %10062 = vst [vmem:[#allocation67_spill] sm:$0xff] %v10061_v5  ;;  %v10064_v63 = vsel %vm6224_vm3, 4294967295, %v10063_v63  ;;  %vm9414_vm6 = vmpackc.low %vm6224_vm3, %vm6217_vm12  ;;  %v165_v5 = vadd.s32 832, %v4985_v1  ;;  %vm395_vm12 = vcmp.eq.s32.totalorder %v134_v55, %v6154_v57  ;;  %vm657_vm3 = vcmp.eq.s32.totalorder %v134_v55, %v5000_v9 }
  0xbf   :  { %10065 = vst [vmem:[#allocation68_spill] sm:$0xff] %v10064_v63  ;;  %4255 = vmatpush3.bf16.msk.msra.mxu1 %vm9414_vm6, %v9932_v51  ;;  %vm6241_vm8 = vmor %vm410_vm2, %vm672_vm0  ;;  %vm656_vm0 = vcmp.eq.s32.totalorder %v133_v59, %v5000_v9  ;;  %v10075_v63 = vmov 0  ;;  %v152_v55 = vadd.s32 728, %v4985_v1 }
  0xc0   :  { %v10067_v2 = vsel %vm6241_vm8, 4294967295, %v10066_v2  ;;  %vm6248_vm5 = vmor %vm411_vm13, %vm673_vm15  ;;  %vm394_vm13 = vcmp.eq.s32.totalorder %v133_v59, %v6154_v57  ;;  %v10078_v59 = vmov 0 }
  0xc1   :  { %10068 = vst [vmem:[#allocation69_spill] sm:$0xff] %v10067_v2  ;;  %v10070_v47 = vsel %vm6248_vm5, 4294967295, %v10069_v47  ;;  %vm9419_vm2 = vmpackc.low %vm6248_vm5, %vm6241_vm8  ;;  %v151_v2 = vadd.s32 720, %v4985_v1  ;;  %vm427_vm8 = vcmp.eq.s32.totalorder %v166_v43, %v6154_v57  ;;  %vm689_vm5 = vcmp.eq.s32.totalorder %v166_v43, %v5000_v9 }
  0xc2   :  { %10071 = vst [vmem:[#allocation70_spill] sm:$0xff] %v10070_v47  ;;  %4216 = vmatprep.subr.msk.bf16.mxu0 %vm9419_vm2, %v9932_v51  ;;  %vm6265_vm15 = vmor %vm442_vm1, %vm704_vm9  ;;  %vm688_vm9 = vcmp.eq.s32.totalorder %v165_v5, %v5000_v9  ;;  %v10081_v47 = vmov 0  ;;  %v184_v43 = vadd.s32 984, %v4985_v1 }
  0xc3   :  { %v10073_v35 = vsel %vm6265_vm15, 4294967295, %v10072_v35  ;;  %vm6272_vm6 = vmor %vm443_vm11, %vm705_vm10  ;;  %vm426_vm11 = vcmp.eq.s32.totalorder %v165_v5, %v6154_v57  ;;  %v10084_v5 = vmov 0 }
  0xc4   :  { %10074 = vst [vmem:[#allocation71_spill] sm:$0xff] %v10073_v35  ;;  %v10076_v63 = vsel %vm6272_vm6, 4294967295, %v10075_v63  ;;  %vm9424_vm1 = vmpackc.low %vm6272_vm6, %vm6265_vm15  ;;  %v183_v35 = vadd.s32 976, %v4985_v1  ;;  %vm413_vm15 = vcmp.eq.s32.totalorder %v152_v55, %v6154_v57  ;;  %vm675_vm6 = vcmp.eq.s32.totalorder %v152_v55, %v5000_v9 }
  0xc5   :  { %10077 = vst [vmem:[#allocation72_spill] sm:$0xff] %v10076_v63  ;;  %4256 = vmatprep.subr.msk.bf16.mxu1 %vm9424_vm1, %v9932_v51  ;;  %vm6289_vm10 = vmor %vm394_vm13, %vm656_vm0  ;;  %vm674_vm0 = vcmp.eq.s32.totalorder %v151_v2, %v5000_v9  ;;  %v10087_v63 = vmov 0  ;;  %v136_v55 = vadd.s32 600, %v4985_v1 }
  0xc6   :  { %v10079_v59 = vsel %vm6289_vm10, 4294967295, %v10078_v59  ;;  %vm6296_vm2 = vmor %vm395_vm12, %vm657_vm3  ;;  %vm412_vm12 = vcmp.eq.s32.totalorder %v151_v2, %v6154_v57  ;;  %v10090_v2 = vmov 0 }
  0xc7   :  { %10080 = vst [vmem:[#allocation73_spill] sm:$0xff] %v10079_v59  ;;  %v10082_v47 = vsel %vm6296_vm2, 4294967295, %v10081_v47  ;;  %vm9429_vm13 = vmpackc.low %vm6296_vm2, %vm6289_vm10  ;;  %v135_v59 = vadd.s32 592, %v4985_v1  ;;  %vm445_vm10 = vcmp.eq.s32.totalorder %v184_v43, %v6154_v57  ;;  %vm707_vm2 = vcmp.eq.s32.totalorder %v184_v43, %v5000_v9 }
  0xc8   :  { %10083 = vst [vmem:[#allocation74_spill] sm:$0xff] %v10082_v47  ;;  %4217 = vmatpush3.bf16.msk.msra.mxu0 %vm9429_vm13, %v9932_v51  ;;  %vm6313_vm3 = vmor %vm426_vm11, %vm688_vm9  ;;  %vm706_vm9 = vcmp.eq.s32.totalorder %v183_v35, %v5000_v9  ;;  %v10093_v47 = vmov 0  ;;  %v168_v43 = vadd.s32 856, %v4985_v1 }
  0xc9   :  { %v10085_v5 = vsel %vm6313_vm3, 4294967295, %v10084_v5  ;;  %vm6320_vm1 = vmor %vm427_vm8, %vm689_vm5  ;;  %vm444_vm8 = vcmp.eq.s32.totalorder %v183_v35, %v6154_v57  ;;  %v10096_v35 = vmov 0 }
  0xca   :  { %10086 = vst [vmem:[#allocation75_spill] sm:$0xff] %v10085_v5  ;;  %v10088_v63 = vsel %vm6320_vm1, 4294967295, %v10087_v63  ;;  %vm9436_vm11 = vmpackc.low %vm6320_vm1, %vm6313_vm3  ;;  %v167_v5 = vadd.s32 848, %v4985_v1 }
  0xcb   :  { %10089 = vst [vmem:[#allocation76_spill] sm:$0xff] %v10088_v63  ;;  %4257 = vmatpush3.bf16.msk.msra.mxu1 %vm9436_vm11, %v9932_v51  ;;  %vm6337_vm5 = vmor %vm412_vm12, %vm674_vm0  ;;  %vm658_vm0 = vcmp.eq.s32.totalorder %v135_v59, %v5000_v9  ;;  %v6368_v63 = vld [vmem:[#allocation6 + $0x20] sm:$0xff] }
  0xcc   :  { %v10091_v2 = vsel %vm6337_vm5, 4294967295, %v10090_v2  ;;  %vm6344_vm13 = vmor %vm413_vm15, %vm675_vm6  ;;  %vm396_vm15 = vcmp.eq.s32.totalorder %v135_v59, %v6154_v57  ;;  %vm690_vm3 = vcmp.eq.s32.totalorder %v167_v5, %v5000_v9  ;;  %v185_v59 = vadd.s32 992, %v4985_v1 }
  0xcd   :  { %10092 = vst [vmem:[#allocation77_spill] sm:$0xff] %v10091_v2  ;;  %v10094_v47 = vsel %vm6344_vm13, 4294967295, %v10093_v47  ;;  %vm9438_vm12 = vmpackc.low %vm6344_vm13, %vm6337_vm5  ;;  %v154_v2 = vadd.s32 744, %v4985_v1  ;;  %vm429_vm5 = vcmp.eq.s32.totalorder %v168_v43, %v6154_v57 }
  0xce   :  { %10095 = vst [vmem:[#allocation78_spill] sm:$0xff] %v10094_v47  ;;  %4218 = vmatprep.subr.msk.bf16.mxu0 %vm9438_vm12, %v9932_v51  ;;  %vm6361_vm6 = vmor %vm444_vm8, %vm706_vm9  ;;  %v10099_v47 = vmov 0  ;;  %vm397_vm12 = vcmp.eq.s32.totalorder %v136_v55, %v6154_v57  ;;  %vm659_vm8 = vcmp.eq.s32.totalorder %v136_v55, %v5000_v9  ;;  %v10102_v55 = vmov 0 }
  0xcf   :  { %v10097_v35 = vsel %vm6361_vm6, 4294967295, %v10096_v35  ;;  %vm6372_vm11 = vmor %vm445_vm10, %vm707_vm2  ;;  %vm428_vm10 = vcmp.eq.s32.totalorder %v167_v5, %v6154_v57  ;;  %v10108_v5 = vmov 0  ;;  %vm677_vm13 = vcmp.eq.s32.totalorder %v154_v2, %v5000_v9 }
  0xd0   :  { %10098 = vst [vmem:[#allocation79_spill] sm:$0xff] %v10097_v35  ;;  %v10100_v47 = vsel %vm6372_vm11, 4294967295, %v10099_v47  ;;  %vm9447_vm9 = vmpackc.low %vm6372_vm11, %vm6361_vm6  ;;  %v10111_v35 = vmov 0  ;;  %vm415_vm11 = vcmp.eq.s32.totalorder %v154_v2, %v6154_v57  ;;  %v138_v2 = vadd.s32 616, %v4985_v1 }
  0xd1   :  { %10101 = vst [vmem:[#allocation80_spill] sm:$0xff] %v10100_v47  ;;  %4258 = vmatprep.subr.msk.bf16.mxu1 %vm9447_vm9, %v9932_v51  ;;  %vm6399_vm2 = vmor %vm396_vm15, %vm658_vm0  ;;  %vm691_vm9 = vcmp.eq.s32.totalorder %v168_v43, %v5000_v9  ;;  %vm414_vm0 = vcmp.eq.s32.totalorder %v153_v62, %v6154_v57  ;;  %v186_v43 = vadd.s32 1000, %v4985_v1  ;;  %v1570_v47 = vld [vmem:[#allocation6 + $0xd0] sm:$0xff] }
  0xd2   :  { %v10103_v55 = vsel %vm6399_vm2, 4294967295, %v10102_v55  ;;  %vm6406_vm1 = vmor %vm397_vm12, %vm659_vm8  ;;  %vm676_vm8 = vcmp.eq.s32.totalorder %v153_v62, %v5000_v9  ;;  %v10114_v62 = vmov 0 }
  0xd3   :  { %10104 = vst [vmem:[#allocation81_spill] sm:$0xff] %v10103_v55  ;;  %v10106_v6 = vsel %vm6406_vm1, 4294967295, %v10105_v6  ;;  %vm9453_vm15 = vmpackc.low %vm6406_vm1, %vm6399_vm2  ;;  %v137_v55 = vadd.s32 608, %v4985_v1  ;;  %vm447_vm2 = vcmp.eq.s32.totalorder %v186_v43, %v6154_v57  ;;  %vm709_vm1 = vcmp.eq.s32.totalorder %v186_v43, %v5000_v9 }
  0xd4   :  { %10107 = vst [vmem:[#allocation82_spill] sm:$0xff] %v10106_v6  ;;  %4219 = vmatpush3.bf16.msk.msra.mxu0 %vm9453_vm15, %v9932_v51  ;;  %vm6423_vm12 = vmor %vm428_vm10, %vm690_vm3  ;;  %vm708_vm10 = vcmp.eq.s32.totalorder %v185_v59, %v5000_v9  ;;  %v10117_v6 = vmov 0  ;;  %v170_v43 = vadd.s32 872, %v4985_v1 }
  0xd5   :  { %v10109_v5 = vsel %vm6423_vm12, 4294967295, %v10108_v5  ;;  %vm6430_vm6 = vmor %vm429_vm5, %vm691_vm9  ;;  %vm446_vm9 = vcmp.eq.s32.totalorder %v185_v59, %v6154_v57  ;;  %v10120_v59 = vmov 0 }
  0xd6   :  { %10110 = vst [vmem:[#allocation83_spill] sm:$0xff] %v10109_v5  ;;  %v10112_v35 = vsel %vm6430_vm6, 4294967295, %v10111_v35  ;;  %vm9458_vm3 = vmpackc.low %vm6430_vm6, %vm6423_vm12  ;;  %v169_v5 = vadd.s32 864, %v4985_v1  ;;  %vm399_vm12 = vcmp.eq.s32.totalorder %v138_v2, %v6154_v57  ;;  %vm661_vm6 = vcmp.eq.s32.totalorder %v138_v2, %v5000_v9 }
  0xd7   :  { %10113 = vst [vmem:[#allocation84_spill] sm:$0xff] %v10112_v35  ;;  %4259 = vmatpush3.bf16.msk.msra.mxu1 %vm9458_vm3, %v9932_v51  ;;  %vm6447_vm5 = vmor %vm414_vm0, %vm676_vm8  ;;  %vm660_vm8 = vcmp.eq.s32.totalorder %v137_v55, %v5000_v9  ;;  %v10123_v35 = vmov 0  ;;  %v156_v2 = vadd.s32 760, %v4985_v1 }
  0xd8   :  { %v10115_v62 = vsel %vm6447_vm5, 4294967295, %v10114_v62  ;;  %vm6454_vm15 = vmor %vm415_vm11, %vm677_vm13  ;;  %vm398_vm11 = vcmp.eq.s32.totalorder %v137_v55, %v6154_v57  ;;  %v10126_v55 = vmov 0 }
  0xd9   :  { %10116 = vst [vmem:[#allocation85_spill] sm:$0xff] %v10115_v62  ;;  %v10118_v6 = vsel %vm6454_vm15, 4294967295, %v10117_v6  ;;  %vm9463_vm0 = vmpackc.low %vm6454_vm15, %vm6447_vm5  ;;  %v155_v62 = vadd.s32 752, %v4985_v1  ;;  %vm431_vm5 = vcmp.eq.s32.totalorder %v170_v43, %v6154_v57  ;;  %vm693_vm15 = vcmp.eq.s32.totalorder %v170_v43, %v5000_v9 }
  0xda   :  { %10119 = vst [vmem:[#allocation86_spill] sm:$0xff] %v10118_v6  ;;  %4220 = vmatprep.subr.msk.bf16.mxu0 %vm9463_vm0, %v9932_v51  ;;  %vm6471_vm13 = vmor %vm446_vm9, %vm708_vm10  ;;  %vm692_vm10 = vcmp.eq.s32.totalorder %v169_v5, %v5000_v9  ;;  %v10129_v6 = vmov 0  ;;  %v188_v43 = vadd.s32 1016, %v4985_v1 }
  0xdb   :  { %v10121_v59 = vsel %vm6471_vm13, 4294967295, %v10120_v59  ;;  %vm6478_vm3 = vmor %vm447_vm2, %vm709_vm1  ;;  %vm430_vm2 = vcmp.eq.s32.totalorder %v169_v5, %v6154_v57  ;;  %v10132_v5 = vmov 0 }
  0xdc   :  { %10122 = vst [vmem:[#allocation87_spill] sm:$0xff] %v10121_v59  ;;  %v10124_v35 = vsel %vm6478_vm3, 4294967295, %v10123_v35  ;;  %vm9468_vm9 = vmpackc.low %vm6478_vm3, %vm6471_vm13  ;;  %v187_v59 = vadd.s32 1008, %v4985_v1  ;;  %vm417_vm13 = vcmp.eq.s32.totalorder %v156_v2, %v6154_v57  ;;  %vm679_vm3 = vcmp.eq.s32.totalorder %v156_v2, %v5000_v9 }
  0xdd   :  { %10125 = vst [vmem:[#allocation88_spill] sm:$0xff] %v10124_v35  ;;  %4260 = vmatprep.subr.msk.bf16.mxu1 %vm9468_vm9, %v9932_v51  ;;  %vm6495_vm1 = vmor %vm398_vm11, %vm660_vm8  ;;  %vm678_vm8 = vcmp.eq.s32.totalorder %v155_v62, %v5000_v9  ;;  %v10135_v35 = vmov 0  ;;  %v140_v2 = vadd.s32 632, %v4985_v1 }
  0xde   :  { %v10127_v55 = vsel %vm6495_vm1, 4294967295, %v10126_v55  ;;  %vm6502_vm0 = vmor %vm399_vm12, %vm661_vm6  ;;  %vm416_vm12 = vcmp.eq.s32.totalorder %v155_v62, %v6154_v57  ;;  %v10138_v62 = vmov 0 }
  0xdf   :  { %10128 = vst [vmem:[#allocation89_spill] sm:$0xff] %v10127_v55  ;;  %v10130_v6 = vsel %vm6502_vm0, 4294967295, %v10129_v6  ;;  %vm9473_vm11 = vmpackc.low %vm6502_vm0, %vm6495_vm1  ;;  %v139_v55 = vadd.s32 624, %v4985_v1  ;;  %vm449_vm1 = vcmp.eq.s32.totalorder %v188_v43, %v6154_v57  ;;  %vm711_vm0 = vcmp.eq.s32.totalorder %v188_v43, %v5000_v9 }
  0xe0   :  { %10131 = vst [vmem:[#allocation90_spill] sm:$0xff] %v10130_v6  ;;  %4221 = vmatpush3.bf16.msk.msra.mxu0 %vm9473_vm11, %v9932_v51  ;;  %vm6519_vm6 = vmor %vm430_vm2, %vm692_vm10  ;;  %vm710_vm10 = vcmp.eq.s32.totalorder %v187_v59, %v5000_v9  ;;  %v10141_v6 = vmov 0  ;;  %v172_v43 = vadd.s32 888, %v4985_v1 }
  0xe1   :  { %v10133_v5 = vsel %vm6519_vm6, 4294967295, %v10132_v5  ;;  %vm6526_vm9 = vmor %vm431_vm5, %vm693_vm15  ;;  %vm448_vm5 = vcmp.eq.s32.totalorder %v187_v59, %v6154_v57  ;;  %v10144_v59 = vmov 0 }
  0xe2   :  { %10134 = vst [vmem:[#allocation91_spill] sm:$0xff] %v10133_v5  ;;  %v10136_v35 = vsel %vm6526_vm9, 4294967295, %v10135_v35  ;;  %vm9478_vm2 = vmpackc.low %vm6526_vm9, %vm6519_vm6  ;;  %v171_v5 = vadd.s32 880, %v4985_v1  ;;  %vm401_vm6 = vcmp.eq.s32.totalorder %v140_v2, %v6154_v57  ;;  %vm663_vm9 = vcmp.eq.s32.totalorder %v140_v2, %v5000_v9 }
  0xe3   :  { %10137 = vst [vmem:[#allocation92_spill] sm:$0xff] %v10136_v35  ;;  %4261 = vmatpush3.bf16.msk.msra.mxu1 %vm9478_vm2, %v9932_v51  ;;  %vm6543_vm15 = vmor %vm416_vm12, %vm678_vm8  ;;  %vm662_vm8 = vcmp.eq.s32.totalorder %v139_v55, %v5000_v9  ;;  %v10147_v35 = vmov 0  ;;  %v206_v2 = vadd.s32 1160, %v4985_v1 }
  0xe4   :  { %v10139_v62 = vsel %vm6543_vm15, 4294967295, %v10138_v62  ;;  %vm6550_vm11 = vmor %vm417_vm13, %vm679_vm3  ;;  %vm400_vm13 = vcmp.eq.s32.totalorder %v139_v55, %v6154_v57  ;;  %v10150_v55 = vmov 0 }
  0xe5   :  { %10140 = vst [vmem:[#allocation93_spill] sm:$0xff] %v10139_v62  ;;  %v10142_v6 = vsel %vm6550_vm11, 4294967295, %v10141_v6  ;;  %vm9485_vm12 = vmpackc.low %vm6550_vm11, %vm6543_vm15  ;;  %v205_v62 = vadd.s32 1152, %v4985_v1  ;;  %vm433_vm15 = vcmp.eq.s32.totalorder %v172_v43, %v6154_v57  ;;  %vm713_vm11 = vcmp.eq.s32.totalorder %v190_v60, %v5000_v9 }
  0xe6   :  { %10143 = vst [vmem:[#allocation94_spill] sm:$0xff] %v10142_v6  ;;  %4222 = vmatprep.subr.msk.bf16.mxu0 %vm9485_vm12, %v9932_v51  ;;  %vm6567_vm3 = vmor %vm448_vm5, %vm710_vm10  ;;  %vm694_vm10 = vcmp.eq.s32.totalorder %v171_v5, %v5000_v9  ;;  %v1562_v6 = vld [vmem:[#allocation6 + $0x90] sm:$0xff] }
  0xe7   :  { %v10145_v59 = vsel %vm6567_vm3, 4294967295, %v10144_v59  ;;  %vm6574_vm2 = vmor %vm449_vm1, %vm711_vm0  ;;  %vm432_vm1 = vcmp.eq.s32.totalorder %v171_v5, %v6154_v57  ;;  %v10156_v5 = vmov 0 }
  0xe8   :  { %10146 = vst [vmem:[#allocation95_spill] sm:$0xff] %v10145_v59  ;;  %v10148_v35 = vsel %vm6574_vm2, 4294967295, %v10147_v35  ;;  %vm9488_vm5 = vmpackc.low %vm6574_vm2, %vm6567_vm3  ;;  %v237_v59 = vadd.s32 1408, %v4985_v1  ;;  %vm451_vm2 = vcmp.eq.s32.totalorder %v190_v60, %v6154_v57  ;;  %v10176_v60 = vmov 0 }
  0xe9   :  { %10149 = vst [vmem:[#allocation96_spill] sm:$0xff] %v10148_v35  ;;  %4262 = vmatprep.subr.msk.bf16.mxu1 %vm9488_vm5, %v9932_v51  ;;  %vm6591_vm0 = vmor %vm400_vm13, %vm662_vm8  ;;  %vm695_vm5 = vcmp.eq.s32.totalorder %v172_v43, %v5000_v9  ;;  %vm728_vm8 = vcmp.eq.s32.totalorder %v205_v62, %v5000_v9  ;;  %v238_v43 = vadd.s32 1416, %v4985_v1  ;;  %v3505_v35 = vcombine.high %v1562_v6, %v1570_v47 }
  0xea   :  { %v10151_v55 = vsel %vm6591_vm0, 4294967295, %v10150_v55  ;;  %vm6598_vm12 = vmor %vm401_vm6, %vm663_vm9  ;;  %vm466_vm6 = vcmp.eq.s32.totalorder %v205_v62, %v6154_v57  ;;  %v189_v62 = vadd.s32 1024, %v4985_v1 }
  0xeb   :  { %10152 = vst [vmem:[#allocation97_spill] sm:$0xff] %v10151_v55  ;;  %v10154_v27 = vsel %vm6598_vm12, 4294967295, %v10153_v27  ;;  %vm9495_vm13 = vmpackc.low %vm6598_vm12, %vm6591_vm0  ;;  %v10162_v55 = vcombine.low %v5729_v15, %v5731_v61  ;;  %vm760_vm0 = vcmp.eq.s32.totalorder %v237_v59, %v5000_v9  ;;  %v221_v61 = vadd.s32 1280, %v4985_v1  ;;  %v6666_v15 = vld [vmem:[#allocation6 + $0x110] sm:$0xff] }
  0xec   :  { %10155 = vst [vmem:[#allocation98_spill] sm:$0xff] %v10154_v27  ;;  %4223 = vmatpush3.bf16.msk.msra.mxu0 %vm9495_vm13, %v9932_v51  ;;  %vm6615_vm9 = vmor %vm432_vm1, %vm694_vm10  ;;  %v10159_v27 = vmov 0  ;;  %vm467_vm1 = vcmp.eq.s32.totalorder %v206_v2, %v6154_v57  ;;  %vm729_vm10 = vcmp.eq.s32.totalorder %v206_v2, %v5000_v9  ;;  %v10163_v2 = vmov 0 }
  0xed   :  { %v10157_v5 = vsel %vm6615_vm9, 4294967295, %v10156_v5  ;;  %vm6626_vm3 = vmor %vm433_vm15, %vm695_vm5  ;;  %vm498_vm5 = vcmp.eq.s32.totalorder %v237_v59, %v6154_v57  ;;  %v6668_v59 = vld [vmem:[#allocation6 + $0x150] sm:$0xff] }
  0xee   :  { %10158 = vst [vmem:[#allocation99_spill] sm:$0xff] %v10157_v5  ;;  %v10160_v27 = vsel %vm6626_vm3, 4294967295, %v10159_v27  ;;  %vm9502_vm13 = vmpackc.low %vm6626_vm3, %vm6615_vm9  ;;  %v10166_v5 = vmov 0  ;;  %vm712_vm9 = vcmp.eq.s32.totalorder %v189_v62, %v5000_v9 }
  0xef   :  { %10161 = vst [vmem:[#allocation100_spill] sm:$0xff] %v10160_v27  ;;  %4263 = vmatpush3.bf16.msk.msra.mxu1 %vm9502_vm13, %v9932_v51  ;;  %2091 = vmatmul.mubr.bf16.vlgmr.msra.gmra.mrb[16].mxu0 %v10162_v55  ;;  %vm6646_vm15 = vmor %vm466_vm6, %vm728_vm8  ;;  %v3507_v27 = vcombine.high %v6622_v31, %v6624_v14  ;;  %vm499_vm13 = vcmp.eq.s32.totalorder %v238_v43, %v6154_v57 }
  0xf0   :  { %v10164_v2 = vsel %vm6646_vm15, 4294967295, %v10163_v2  ;;  %vm6655_vm12 = vmor %vm467_vm1, %vm729_vm10  ;;  %vm761_vm6 = vcmp.eq.s32.totalorder %v238_v43, %v5000_v9  ;;  %2098 = vmatprep.mubr.bf16.mxu0 %v3505_v35  ;;  %v10169_v55 = vcombine.low %v5738_v7, %v5740_v23  ;;  %v10170_v35 = vmov 0 }
  0xf1   :  { %10165 = vst [vmem:[#allocation101_spill] sm:$0xff] %v10164_v2  ;;  %v10167_v5 = vsel %vm6655_vm12, 4294967295, %v10166_v5  ;;  %vm9509_vm8 = vmpackc.low %vm6655_vm12, %vm6646_vm15  ;;  %vm450_vm10 = vcmp.eq.s32.totalorder %v189_v62, %v6154_v57  ;;  %v222_v43 = vadd.s32 1288, %v4985_v1  ;;  %v10173_v7 = vmov 0  ;;  %v6699_v2 = vld [vmem:[#allocation6 + $0x118] sm:$0xff] }
  0xf2   :  { %10168 = vst [vmem:[#allocation102_spill] sm:$0xff] %v10167_v5  ;;  %2156 = vmatmul.mubr.bf16.vlgmr.msra.gmra.mrb[16].mxu1 %v10169_v55  ;;  %4288 = vmatprep.subr.msk.bf16.mxu0 %vm9509_vm8, %v9932_v51  ;;  %vm6679_vm1 = vmor %vm498_vm5, %vm760_vm0  ;;  %v3504_v23 = vcombine.low %v1562_v6, %v1570_v47  ;;  %v207_v55 = vadd.s32 1168, %v4985_v1  ;;  %v3521_v62 = vcombine.high %v6666_v15, %v6668_v59  ;;  %v6701_v5 = vld [vmem:[#allocation6 + $0x158] sm:$0xff]  ;;  %v208_v6 = vadd.s32 1176, %v4985_v1 }
  0xf3   :  { %v10171_v35 = vsel %vm6679_vm1, 4294967295, %v10170_v35  ;;  %vm6686_vm3 = vmor %vm499_vm13, %vm761_vm6  ;;  %2163 = vmatprep.mubr.bf16.mxu1 %v3507_v27  ;;  %vm482_vm5 = vcmp.eq.s32.totalorder %v221_v61, %v6154_v57  ;;  %vm744_vm6 = vcmp.eq.s32.totalorder %v221_v61, %v5000_v9  ;;  %v10179_v27 = vmov 0 }
  0xf4   :  { %10172 = vst [vmem:[#allocation103_spill] sm:$0xff] %v10171_v35  ;;  %v10174_v7 = vsel %vm6686_vm3, 4294967295, %v10173_v7  ;;  %vm9513_vm0 = vmpackc.low %vm6686_vm3, %vm6679_vm1  ;;  %vm483_vm15 = vcmp.eq.s32.totalorder %v222_v43, %v6154_v57  ;;  %vm745_vm12 = vcmp.eq.s32.totalorder %v222_v43, %v5000_v9  ;;  %v3506_v47 = vcombine.low %v6622_v31, %v6624_v14 }
  0xf5   :  { %10175 = vst [vmem:[#allocation104_spill] sm:$0xff] %v10174_v7  ;;  %4328 = vmatprep.subr.msk.bf16.mxu1 %vm9513_vm0, %v9932_v51  ;;  %vm6709_vm13 = vmor %vm450_vm10, %vm712_vm9  ;;  %v239_v61 = vadd.s32 1424, %v4985_v1  ;;  %v3523_v35 = vcombine.high %v6699_v2, %v6701_v5  ;;  %v10182_v31 = vmov 0  ;;  %vm730_vm10 = vcmp.eq.s32.totalorder %v207_v55, %v5000_v9  ;;  %v1603_v7 = vld [vmem:[#allocation6 + $0x1d8] sm:$0xff] }
  0xf6   :  { %v10177_v60 = vsel %vm6709_vm13, 4294967295, %v10176_v60  ;;  %vm6716_vm8 = vmor %vm451_vm2, %vm713_vm11  ;;  %vm468_vm2 = vcmp.eq.s32.totalorder %v207_v55, %v6154_v57  ;;  %v240_v14 = vadd.s32 1432, %v4985_v1  ;;  %v10185_v43 = vmov 0 }
  0xf7   :  { %10178 = vst [vmem:[#allocation105_spill] sm:$0xff] %v10177_v60  ;;  %v10180_v27 = vsel %vm6716_vm8, 4294967295, %v10179_v27  ;;  %vm9517_vm9 = vmpackc.low %vm6716_vm8, %vm6709_vm13  ;;  %2099 = vmatmul.mubr.bf16.gmra.mrb[20].mxu0 %v3504_v23  ;;  %vm469_vm1 = vcmp.eq.s32.totalorder %v208_v6, %v6154_v57  ;;  %vm731_vm13 = vcmp.eq.s32.totalorder %v208_v6, %v5000_v9  ;;  %v6750_v23 = vld [vmem:[#allocation6 + $0x190] sm:$0xff]  ;;  %v191_v55 = vadd.s32 1040, %v4985_v1 }
  0xf8   :  { %10181 = vst [vmem:[#allocation106_spill] sm:$0xff] %v10180_v27  ;;  %4289 = vmatpush3.bf16.msk.msra.mxu0 %vm9517_vm9, %v9932_v51  ;;  %vm6737_vm11 = vmor %vm482_vm5, %vm744_vm6  ;;  %2106 = vmatprep.mubr.bf16.mxu0 %v3521_v62  ;;  %v6752_v60 = vld [vmem:[#allocation6 + $0x1d0] sm:$0xff]  ;;  %v10188_v62 = vmov 0  ;;  %vm762_vm6 = vcmp.eq.s32.totalorder %v239_v61, %v5000_v9  ;;  %v192_v6 = vadd.s32 1048, %v4985_v1  ;;  %v1595_v27 = vld [vmem:[#allocation6 + $0x198] sm:$0xff] }
  0xf9   :  { %v10183_v31 = vsel %vm6737_vm11, 4294967295, %v10182_v31  ;;  %vm6744_vm0 = vmor %vm483_vm15, %vm745_vm12  ;;  %vm500_vm15 = vcmp.eq.s32.totalorder %v239_v61, %v6154_v57  ;;  %v3522_v61 = vcombine.low %v6699_v2, %v6701_v5  ;;  %v10200_v5 = vmov 0 }
  0xfa   :  { %10184 = vst [vmem:[#allocation107_spill] sm:$0xff] %v10183_v31  ;;  %v10186_v43 = vsel %vm6744_vm0, 4294967295, %v10185_v43  ;;  %vm9519_vm5 = vmpackc.low %vm6744_vm0, %vm6737_vm11  ;;  %2164 = vmatmul.mubr.bf16.gmra.mrb[20].mxu1 %v3506_v47  ;;  %v3520_v47 = vcombine.low %v6666_v15, %v6668_v59  ;;  %v3537_v31 = vcombine.high %v6750_v23, %v6752_v60  ;;  %v223_v15 = vadd.s32 1296, %v4985_v1 }
  0xfb   :  { %10187 = vst [vmem:[#allocation108_spill] sm:$0xff] %v10186_v43  ;;  %4329 = vmatpush3.bf16.msk.msra.mxu1 %vm9519_vm5, %v9932_v51  ;;  %vm6765_vm12 = vmor %vm468_vm2, %vm730_vm10  ;;  %2171 = vmatprep.mubr.bf16.mxu1 %v3523_v35  ;;  %v10191_v43 = vmov 0  ;;  %vm501_vm5 = vcmp.eq.s32.totalorder %v240_v14, %v6154_v57  ;;  %vm763_vm2 = vcmp.eq.s32.totalorder %v240_v14, %v5000_v9  ;;  %v10194_v59 = vmov 0 }
  0xfc   :  { %v10189_v62 = vsel %vm6765_vm12, 4294967295, %v10188_v62  ;;  %vm6774_vm9 = vmor %vm469_vm1, %vm731_vm13  ;;  %vm452_vm13 = vcmp.eq.s32.totalorder %v191_v55, %v6154_v57  ;;  %vm714_vm11 = vcmp.eq.s32.totalorder %v191_v55, %v5000_v9  ;;  %v224_v35 = vadd.s32 1304, %v4985_v1 }
  0xfd   :  { %10190 = vst [vmem:[#allocation109_spill] sm:$0xff] %v10189_v62  ;;  %v10192_v43 = vsel %vm6774_vm9, 4294967295, %v10191_v43  ;;  %vm9527_vm10 = vmpackc.low %vm6774_vm9, %vm6765_vm12  ;;  %v10197_v14 = vmov 0  ;;  %vm453_vm12 = vcmp.eq.s32.totalorder %v192_v6, %v6154_v57  ;;  %v3539_v62 = vcombine.high %v1595_v27, %v1603_v7 }
  0xfe   :  { %10193 = vst [vmem:[#allocation110_spill] sm:$0xff] %v10192_v43  ;;  %4290 = vmatprep.subr.msk.bf16.mxu0 %vm9527_vm10, %v9932_v51  ;;  %vm6793_vm1 = vmor %vm500_vm15, %vm762_vm6  ;;  %vm715_vm15 = vcmp.eq.s32.totalorder %v192_v6, %v5000_v9  ;;  %v209_v55 = vadd.s32 1184, %v4985_v1  ;;  %vm746_vm10 = vcmp.eq.s32.totalorder %v223_v15, %v5000_v9  ;;  %v210_v2 = vadd.s32 1192, %v4985_v1 }
  0xff   :  { %v10195_v59 = vsel %vm6793_vm1, 4294967295, %v10194_v59  ;;  %vm6802_vm0 = vmor %vm501_vm5, %vm763_vm2  ;;  %2107 = vmatmul.mubr.bf16.gmra.mrb[24].mxu0 %v3520_v47  ;;  %vm484_vm2 = vcmp.eq.s32.totalorder %v223_v15, %v6154_v57  ;;  %v10203_v6 = vmov 0  ;;  %vm485_vm8 = vcmp.eq.s32.totalorder %v224_v35, %v6154_v57 }
 0x100   :  { %10196 = vst [vmem:[#allocation111_spill] sm:$0xff] %v10195_v59  ;;  %v10198_v14 = vsel %vm6802_vm0, 4294967295, %v10197_v14  ;;  %vm9531_vm6 = vmpackc.low %vm6802_vm0, %vm6793_vm1  ;;  %2114 = vmatprep.mubr.bf16.mxu0 %v3537_v31  ;;  %vm747_vm3 = vcmp.eq.s32.totalorder %v224_v35, %v5000_v9  ;;  %v241_v31 = vadd.s32 1440, %v4985_v1  ;;  %v3536_v47 = vcombine.low %v6750_v23, %v6752_v60  ;;  %v7451_v59 = vld [vmem:[#allocation6 + $0xa8] sm:$0xff] }
 0x101   :  { %10199 = vst [vmem:[#allocation112_spill] sm:$0xff] %v10198_v14  ;;  %4330 = vmatprep.subr.msk.bf16.mxu1 %vm9531_vm6, %v9932_v51  ;;  %vm6819_vm5 = vmor %vm452_vm13, %vm714_vm11  ;;  %v10206_v15 = vmov 0  ;;  %vm470_vm13 = vcmp.eq.s32.totalorder %v209_v55, %v6154_v57  ;;  %v3493_v60 = vcombine.high %v6368_v63, %v6370_v19  ;;  %v10209_v23 = vmov 0  ;;  %v7453_v14 = vld [vmem:[#allocation6 + $0xe8] sm:$0xff] }
 0x102   :  { %v10201_v5 = vsel %vm6819_vm5, 4294967295, %v10200_v5  ;;  %vm6826_vm9 = vmor %vm453_vm12, %vm715_vm15  ;;  %2172 = vmatmul.mubr.bf16.gmra.mrb[24].mxu1 %v3522_v61  ;;  %vm732_vm15 = vcmp.eq.s32.totalorder %v209_v55, %v5000_v9  ;;  %v193_v35 = vadd.s32 1056, %v4985_v1  ;;  %v3538_v61 = vcombine.low %v1595_v27, %v1603_v7 }
 0x103   :  { %10202 = vst [vmem:[#allocation113_spill] sm:$0xff] %v10201_v5  ;;  %v10204_v6 = vsel %vm6826_vm9, 4294967295, %v10203_v6  ;;  %vm9533_vm11 = vmpackc.low %vm6826_vm9, %vm6819_vm5  ;;  %2179 = vmatprep.mubr.bf16.mxu1 %v3539_v62  ;;  %v242_v62 = vadd.s32 1448, %v4985_v1  ;;  %vm471_vm5 = vcmp.eq.s32.totalorder %v210_v2, %v6154_v57  ;;  %v10212_v55 = vmov 0 }
 0x104   :  { %10205 = vst [vmem:[#allocation114_spill] sm:$0xff] %v10204_v6  ;;  %4291 = vmatpush3.bf16.msk.msra.mxu0 %vm9533_vm11, %v9932_v51  ;;  %vm6845_vm12 = vmor %vm484_vm2, %vm746_vm10  ;;  %vm733_vm10 = vcmp.eq.s32.totalorder %v210_v2, %v5000_v9  ;;  %vm764_vm11 = vcmp.eq.s32.totalorder %v241_v31, %v5000_v9  ;;  %v194_v2 = vadd.s32 1064, %v4985_v1  ;;  %v3495_v7 = vcombine.high %v6380_v4, %v6382_v39 }
 0x105   :  { %v10207_v15 = vsel %vm6845_vm12, 4294967295, %v10206_v15  ;;  %vm6854_vm6 = vmor %vm485_vm8, %vm747_vm3  ;;  %vm502_vm8 = vcmp.eq.s32.totalorder %v241_v31, %v6154_v57  ;;  %v10215_v27 = vmov 0  ;;  %v225_v31 = vadd.s32 1312, %v4985_v1 }
 0x106   :  { %10208 = vst [vmem:[#allocation115_spill] sm:$0xff] %v10207_v15  ;;  %v10210_v23 = vsel %vm6854_vm6, 4294967295, %v10209_v23  ;;  %vm9535_vm2 = vmpackc.low %vm6854_vm6, %vm6845_vm12  ;;  %vm716_vm12 = vcmp.eq.s32.totalorder %v193_v35, %v5000_v9  ;;  %vm455_vm1 = vcmp.eq.s32.totalorder %v194_v2, %v6154_v57  ;;  %v211_v15 = vadd.s32 1200, %v4985_v1 }
 0x107   :  { %10211 = vst [vmem:[#allocation116_spill] sm:$0xff] %v10210_v23  ;;  %4331 = vmatpush3.bf16.msk.msra.mxu1 %vm9535_vm2, %v9932_v51  ;;  %vm6871_vm3 = vmor %vm470_vm13, %vm732_vm15  ;;  %2115 = vmatmul.mubr.bf16.gmra.mrb[28].mxu0 %v3536_v47  ;;  %vm503_vm2 = vcmp.eq.s32.totalorder %v242_v62, %v6154_v57  ;;  %vm765_vm13 = vcmp.eq.s32.totalorder %v242_v62, %v5000_v9  ;;  %v10218_v47 = vmov 0  ;;  %v226_v62 = vadd.s32 1320, %v4985_v1  ;;  %v7204_v23 = vld [vmem:[#allocation6 + $0x38] sm:$0xff] }
 0x108   :  { %v10213_v55 = vsel %vm6871_vm3, 4294967295, %v10212_v55  ;;  %vm6880_vm9 = vmor %vm471_vm5, %vm733_vm10  ;;  %2220 = vmatprep.mubr.bf16.mxu0 %v3493_v60  ;;  %vm454_vm10 = vcmp.eq.s32.totalorder %v193_v35, %v6154_v57  ;;  %v10221_v60 = vmov 0  ;;  %v10224_v35 = vmov 0 }
 0x109   :  { %10214 = vst [vmem:[#allocation117_spill] sm:$0xff] %v10213_v55  ;;  %v10216_v27 = vsel %vm6880_vm9, 4294967295, %v10215_v27  ;;  %vm9541_vm15 = vmpackc.low %vm6880_vm9, %vm6871_vm3  ;;  %vm717_vm3 = vcmp.eq.s32.totalorder %v194_v2, %v5000_v9  ;;  %v10227_v2 = vmov 0  ;;  %vm487_vm9 = vcmp.eq.s32.totalorder %v226_v62, %v6154_v57  ;;  %v7206_v55 = vld [vmem:[#allocation6 + $0x78] sm:$0xff] }
 0x10a   :  { %10217 = vst [vmem:[#allocation118_spill] sm:$0xff] %v10216_v27  ;;  %4292 = vmatprep.subr.msk.bf16.mxu0 %vm9541_vm15, %v9932_v51  ;;  %vm6897_vm5 = vmor %vm502_vm8, %vm764_vm11  ;;  %2180 = vmatmul.mubr.bf16.gmra.mrb[28].mxu1 %v3538_v61  ;;  %vm486_vm8 = vcmp.eq.s32.totalorder %v225_v31, %v6154_v57  ;;  %v212_v61 = vadd.s32 1208, %v4985_v1  ;;  %vm749_vm0 = vcmp.eq.s32.totalorder %v226_v62, %v5000_v9  ;;  %v244_v62 = vadd.s32 1464, %v4985_v1 }
 0x10b   :  { %v10219_v47 = vsel %vm6897_vm5, 4294967295, %v10218_v47  ;;  %vm6904_vm6 = vmor %vm503_vm2, %vm765_vm13  ;;  %2285 = vmatprep.mubr.bf16.mxu1 %v3495_v7  ;;  %vm748_vm13 = vcmp.eq.s32.totalorder %v225_v31, %v5000_v9  ;;  %v243_v7 = vadd.s32 1456, %v4985_v1  ;;  %v10230_v31 = vmov 0 }
 0x10c   :  { %10220 = vst [vmem:[#allocation119_spill] sm:$0xff] %v10219_v47  ;;  %v10222_v60 = vsel %vm6904_vm6, 4294967295, %v10221_v60  ;;  %vm9544_vm11 = vmpackc.low %vm6904_vm6, %vm6897_vm5  ;;  %v10233_v47 = vmov 0  ;;  %vm473_vm5 = vcmp.eq.s32.totalorder %v212_v61, %v6154_v57  ;;  %vm735_vm6 = vcmp.eq.s32.totalorder %v212_v61, %v5000_v9 }
 0x10d   :  { %10223 = vst [vmem:[#allocation120_spill] sm:$0xff] %v10222_v60  ;;  %4332 = vmatprep.subr.msk.bf16.mxu1 %vm9544_vm11, %v9932_v51  ;;  %vm6921_vm2 = vmor %vm454_vm10, %vm716_vm12  ;;  %vm734_vm10 = vcmp.eq.s32.totalorder %v211_v15, %v5000_v9  ;;  %v196_v61 = vadd.s32 1080, %v4985_v1  ;;  %v7194_v60 = vld [vmem:[#allocation6 + $0x70] sm:$0xff]  ;;  %v217_v27 = vadd.s32 1248, %v4985_v1  ;;  %v10299_v5 = vmov 0 }
 0x10e   :  { %v10225_v35 = vsel %vm6921_vm2, 4294967295, %v10224_v35  ;;  %vm6928_vm15 = vmor %vm455_vm1, %vm717_vm3  ;;  %vm472_vm3 = vcmp.eq.s32.totalorder %v211_v15, %v6154_v57  ;;  %v10236_v15 = vmov 0  ;;  %v10347_v6 = vmov 0 }
 0x10f   :  { %10226 = vst [vmem:[#allocation121_spill] sm:$0xff] %v10225_v35  ;;  %v10228_v2 = vsel %vm6928_vm15, 4294967295, %v10227_v2  ;;  %vm9549_vm12 = vmpackc.low %vm6928_vm15, %vm6921_vm2  ;;  %v195_v35 = vadd.s32 1072, %v4985_v1  ;;  %vm505_vm2 = vcmp.eq.s32.totalorder %v244_v62, %v6154_v57  ;;  %vm767_vm15 = vcmp.eq.s32.totalorder %v244_v62, %v5000_v9 }
 0x110   :  { %10229 = vst [vmem:[#allocation122_spill] sm:$0xff] %v10228_v2  ;;  %4293 = vmatpush3.bf16.msk.msra.mxu0 %vm9549_vm12, %v9932_v51  ;;  %vm6945_vm1 = vmor %vm486_vm8, %vm748_vm13  ;;  %vm766_vm13 = vcmp.eq.s32.totalorder %v243_v7, %v5000_v9  ;;  %v10239_v2 = vmov 0  ;;  %v228_v62 = vadd.s32 1336, %v4985_v1  ;;  %v254_v43 = vadd.s32 1544, %v4985_v1 }
 0x111   :  { %v10231_v31 = vsel %vm6945_vm1, 4294967295, %v10230_v31  ;;  %vm6952_vm11 = vmor %vm487_vm9, %vm749_vm0  ;;  %vm504_vm9 = vcmp.eq.s32.totalorder %v243_v7, %v6154_v57  ;;  %v10242_v7 = vmov 0 }
 0x112   :  { %10232 = vst [vmem:[#allocation123_spill] sm:$0xff] %v10231_v31  ;;  %v10234_v47 = vsel %vm6952_vm11, 4294967295, %v10233_v47  ;;  %vm9554_vm8 = vmpackc.low %vm6952_vm11, %vm6945_vm1  ;;  %v227_v31 = vadd.s32 1328, %v4985_v1  ;;  %vm457_vm1 = vcmp.eq.s32.totalorder %v196_v61, %v6154_v57  ;;  %vm719_vm11 = vcmp.eq.s32.totalorder %v196_v61, %v5000_v9 }
 0x113   :  { %10235 = vst [vmem:[#allocation124_spill] sm:$0xff] %v10234_v47  ;;  %4333 = vmatpush3.bf16.msk.msra.mxu1 %vm9554_vm8, %v9932_v51  ;;  %vm6969_vm0 = vmor %vm472_vm3, %vm734_vm10  ;;  %vm718_vm10 = vcmp.eq.s32.totalorder %v195_v35, %v5000_v9  ;;  %v10245_v47 = vmov 0  ;;  %v214_v61 = vadd.s32 1224, %v4985_v1 }
 0x114   :  { %v10237_v15 = vsel %vm6969_vm0, 4294967295, %v10236_v15  ;;  %vm6976_vm12 = vmor %vm473_vm5, %vm735_vm6  ;;  %vm456_vm5 = vcmp.eq.s32.totalorder %v195_v35, %v6154_v57  ;;  %v10248_v35 = vmov 0 }
 0x115   :  { %10238 = vst [vmem:[#allocation125_spill] sm:$0xff] %v10237_v15  ;;  %v10240_v2 = vsel %vm6976_vm12, 4294967295, %v10239_v2  ;;  %vm9559_vm3 = vmpackc.low %vm6976_vm12, %vm6969_vm0  ;;  %v213_v15 = vadd.s32 1216, %v4985_v1  ;;  %vm489_vm0 = vcmp.eq.s32.totalorder %v228_v62, %v6154_v57  ;;  %vm751_vm12 = vcmp.eq.s32.totalorder %v228_v62, %v5000_v9 }
 0x116   :  { %10241 = vst [vmem:[#allocation126_spill] sm:$0xff] %v10240_v2  ;;  %4294 = vmatprep.subr.msk.bf16.mxu0 %vm9559_vm3, %v9932_v51  ;;  %vm6993_vm6 = vmor %vm504_vm9, %vm766_vm13  ;;  %vm750_vm13 = vcmp.eq.s32.totalorder %v227_v31, %v5000_v9  ;;  %v10251_v2 = vmov 0  ;;  %v246_v62 = vadd.s32 1480, %v4985_v1 }
 0x117   :  { %v10243_v7 = vsel %vm6993_vm6, 4294967295, %v10242_v7  ;;  %vm7000_vm8 = vmor %vm505_vm2, %vm767_vm15  ;;  %vm488_vm2 = vcmp.eq.s32.totalorder %v227_v31, %v6154_v57  ;;  %v10254_v31 = vmov 0 }
 0x118   :  { %10244 = vst [vmem:[#allocation127_spill] sm:$0xff] %v10243_v7  ;;  %v10246_v47 = vsel %vm7000_vm8, 4294967295, %v10245_v47  ;;  %vm9564_vm9 = vmpackc.low %vm7000_vm8, %vm6993_vm6  ;;  %v245_v7 = vadd.s32 1472, %v4985_v1  ;;  %vm475_vm6 = vcmp.eq.s32.totalorder %v214_v61, %v6154_v57  ;;  %vm737_vm8 = vcmp.eq.s32.totalorder %v214_v61, %v5000_v9 }
 0x119   :  { %10247 = vst [vmem:[#allocation128_spill] sm:$0xff] %v10246_v47  ;;  %4334 = vmatprep.subr.msk.bf16.mxu1 %vm9564_vm9, %v9932_v51  ;;  %vm7017_vm15 = vmor %vm456_vm5, %vm718_vm10  ;;  %vm736_vm10 = vcmp.eq.s32.totalorder %v213_v15, %v5000_v9  ;;  %v10257_v47 = vmov 0  ;;  %v198_v61 = vadd.s32 1096, %v4985_v1 }
 0x11a   :  { %v10249_v35 = vsel %vm7017_vm15, 4294967295, %v10248_v35  ;;  %vm7024_vm3 = vmor %vm457_vm1, %vm719_vm11  ;;  %vm474_vm1 = vcmp.eq.s32.totalorder %v213_v15, %v6154_v57  ;;  %v10260_v15 = vmov 0 }
 0x11b   :  { %10250 = vst [vmem:[#allocation129_spill] sm:$0xff] %v10249_v35  ;;  %v10252_v2 = vsel %vm7024_vm3, 4294967295, %v10251_v2  ;;  %vm9569_vm5 = vmpackc.low %vm7024_vm3, %vm7017_vm15  ;;  %v197_v35 = vadd.s32 1088, %v4985_v1  ;;  %vm507_vm15 = vcmp.eq.s32.totalorder %v246_v62, %v6154_v57  ;;  %vm769_vm3 = vcmp.eq.s32.totalorder %v246_v62, %v5000_v9 }
 0x11c   :  { %10253 = vst [vmem:[#allocation130_spill] sm:$0xff] %v10252_v2  ;;  %4295 = vmatpush3.bf16.msk.msra.mxu0 %vm9569_vm5, %v9932_v51  ;;  %vm7041_vm11 = vmor %vm488_vm2, %vm750_vm13  ;;  %vm768_vm13 = vcmp.eq.s32.totalorder %v245_v7, %v5000_v9  ;;  %v10263_v2 = vmov 0  ;;  %v230_v62 = vadd.s32 1352, %v4985_v1 }
 0x11d   :  { %v10255_v31 = vsel %vm7041_vm11, 4294967295, %v10254_v31  ;;  %vm7048_vm9 = vmor %vm489_vm0, %vm751_vm12  ;;  %vm506_vm0 = vcmp.eq.s32.totalorder %v245_v7, %v6154_v57  ;;  %v10266_v7 = vmov 0 }
 0x11e   :  { %10256 = vst [vmem:[#allocation131_spill] sm:$0xff] %v10255_v31  ;;  %v10258_v47 = vsel %vm7048_vm9, 4294967295, %v10257_v47  ;;  %vm9574_vm2 = vmpackc.low %vm7048_vm9, %vm7041_vm11  ;;  %v229_v31 = vadd.s32 1344, %v4985_v1  ;;  %vm459_vm11 = vcmp.eq.s32.totalorder %v198_v61, %v6154_v57  ;;  %vm721_vm9 = vcmp.eq.s32.totalorder %v198_v61, %v5000_v9 }
 0x11f   :  { %10259 = vst [vmem:[#allocation132_spill] sm:$0xff] %v10258_v47  ;;  %4335 = vmatpush3.bf16.msk.msra.mxu1 %vm9574_vm2, %v9932_v51  ;;  %vm7065_vm12 = vmor %vm474_vm1, %vm736_vm10  ;;  %vm720_vm10 = vcmp.eq.s32.totalorder %v197_v35, %v5000_v9  ;;  %v10269_v47 = vmov 0  ;;  %v216_v61 = vadd.s32 1240, %v4985_v1 }
 0x120   :  { %v10261_v15 = vsel %vm7065_vm12, 4294967295, %v10260_v15  ;;  %vm7072_vm5 = vmor %vm475_vm6, %vm737_vm8  ;;  %vm458_vm6 = vcmp.eq.s32.totalorder %v197_v35, %v6154_v57  ;;  %v10272_v35 = vmov 0 }
 0x121   :  { %10262 = vst [vmem:[#allocation133_spill] sm:$0xff] %v10261_v15  ;;  %v10264_v2 = vsel %vm7072_vm5, 4294967295, %v10263_v2  ;;  %vm9579_vm1 = vmpackc.low %vm7072_vm5, %vm7065_vm12  ;;  %v215_v15 = vadd.s32 1232, %v4985_v1  ;;  %vm491_vm12 = vcmp.eq.s32.totalorder %v230_v62, %v6154_v57  ;;  %vm753_vm5 = vcmp.eq.s32.totalorder %v230_v62, %v5000_v9 }
 0x122   :  { %10265 = vst [vmem:[#allocation134_spill] sm:$0xff] %v10264_v2  ;;  %4296 = vmatprep.subr.msk.bf16.mxu0 %vm9579_vm1, %v9932_v51  ;;  %vm7089_vm8 = vmor %vm506_vm0, %vm768_vm13  ;;  %vm752_vm13 = vcmp.eq.s32.totalorder %v229_v31, %v5000_v9  ;;  %v10275_v2 = vmov 0  ;;  %v248_v62 = vadd.s32 1496, %v4985_v1 }
 0x123   :  { %v10267_v7 = vsel %vm7089_vm8, 4294967295, %v10266_v7  ;;  %vm7096_vm2 = vmor %vm507_vm15, %vm769_vm3  ;;  %vm490_vm15 = vcmp.eq.s32.totalorder %v229_v31, %v6154_v57  ;;  %v10278_v31 = vmov 0 }
 0x124   :  { %10268 = vst [vmem:[#allocation135_spill] sm:$0xff] %v10267_v7  ;;  %v10270_v47 = vsel %vm7096_vm2, 4294967295, %v10269_v47  ;;  %vm9584_vm0 = vmpackc.low %vm7096_vm2, %vm7089_vm8  ;;  %v247_v7 = vadd.s32 1488, %v4985_v1  ;;  %vm477_vm8 = vcmp.eq.s32.totalorder %v216_v61, %v6154_v57  ;;  %vm739_vm2 = vcmp.eq.s32.totalorder %v216_v61, %v5000_v9 }
 0x125   :  { %10271 = vst [vmem:[#allocation136_spill] sm:$0xff] %v10270_v47  ;;  %4336 = vmatprep.subr.msk.bf16.mxu1 %vm9584_vm0, %v9932_v51  ;;  %vm7113_vm3 = vmor %vm458_vm6, %vm720_vm10  ;;  %vm738_vm10 = vcmp.eq.s32.totalorder %v215_v15, %v5000_v9  ;;  %v10281_v47 = vmov 0  ;;  %v200_v61 = vadd.s32 1112, %v4985_v1 }
 0x126   :  { %v10273_v35 = vsel %vm7113_vm3, 4294967295, %v10272_v35  ;;  %vm7120_vm1 = vmor %vm459_vm11, %vm721_vm9  ;;  %vm476_vm11 = vcmp.eq.s32.totalorder %v215_v15, %v6154_v57  ;;  %v10284_v15 = vmov 0 }
 0x127   :  { %10274 = vst [vmem:[#allocation137_spill] sm:$0xff] %v10273_v35  ;;  %v10276_v2 = vsel %vm7120_vm1, 4294967295, %v10275_v2  ;;  %vm9589_vm6 = vmpackc.low %vm7120_vm1, %vm7113_vm3  ;;  %v199_v35 = vadd.s32 1104, %v4985_v1  ;;  %vm509_vm3 = vcmp.eq.s32.totalorder %v248_v62, %v6154_v57  ;;  %vm771_vm1 = vcmp.eq.s32.totalorder %v248_v62, %v5000_v9 }
 0x128   :  { %10277 = vst [vmem:[#allocation138_spill] sm:$0xff] %v10276_v2  ;;  %4297 = vmatpush3.bf16.msk.msra.mxu0 %vm9589_vm6, %v9932_v51  ;;  %vm7137_vm9 = vmor %vm490_vm15, %vm752_vm13  ;;  %vm770_vm13 = vcmp.eq.s32.totalorder %v247_v7, %v5000_v9  ;;  %v10287_v2 = vmov 0  ;;  %v232_v62 = vadd.s32 1368, %v4985_v1 }
 0x129   :  { %v10279_v31 = vsel %vm7137_vm9, 4294967295, %v10278_v31  ;;  %vm7144_vm0 = vmor %vm491_vm12, %vm753_vm5  ;;  %vm508_vm12 = vcmp.eq.s32.totalorder %v247_v7, %v6154_v57  ;;  %v10290_v7 = vmov 0 }
 0x12a   :  { %10280 = vst [vmem:[#allocation139_spill] sm:$0xff] %v10279_v31  ;;  %v10282_v47 = vsel %vm7144_vm0, 4294967295, %v10281_v47  ;;  %vm9596_vm15 = vmpackc.low %vm7144_vm0, %vm7137_vm9  ;;  %v231_v31 = vadd.s32 1360, %v4985_v1 }
 0x12b   :  { %10283 = vst [vmem:[#allocation140_spill] sm:$0xff] %v10282_v47  ;;  %4337 = vmatpush3.bf16.msk.msra.mxu1 %vm9596_vm15, %v9932_v51  ;;  %vm7161_vm5 = vmor %vm476_vm11, %vm738_vm10  ;;  %vm722_vm10 = vcmp.eq.s32.totalorder %v199_v35, %v5000_v9  ;;  %v7192_v47 = vld [vmem:[#allocation6 + $0x30] sm:$0xff] }
 0x12c   :  { %v10285_v15 = vsel %vm7161_vm5, 4294967295, %v10284_v15  ;;  %vm7168_vm6 = vmor %vm477_vm8, %vm739_vm2  ;;  %vm460_vm8 = vcmp.eq.s32.totalorder %v199_v35, %v6154_v57  ;;  %vm754_vm9 = vcmp.eq.s32.totalorder %v231_v31, %v5000_v9  ;;  %v249_v35 = vadd.s32 1504, %v4985_v1 }
 0x12d   :  { %10286 = vst [vmem:[#allocation141_spill] sm:$0xff] %v10285_v15  ;;  %v10288_v2 = vsel %vm7168_vm6, 4294967295, %v10287_v2  ;;  %vm9598_vm11 = vmpackc.low %vm7168_vm6, %vm7161_vm5  ;;  %v218_v15 = vadd.s32 1256, %v4985_v1  ;;  %vm493_vm5 = vcmp.eq.s32.totalorder %v232_v62, %v6154_v57  ;;  %v10546_v11 = vcombine.low %v7192_v47, %v7194_v60 }
 0x12e   :  { %10289 = vst [vmem:[#allocation142_spill] sm:$0xff] %v10288_v2  ;;  %4298 = vmatprep.subr.msk.bf16.mxu0 %vm9598_vm11, %v9932_v51  ;;  %vm7185_vm2 = vmor %vm508_vm12, %vm770_vm13  ;;  %v10293_v2 = vmov 0  ;;  %vm461_vm11 = vcmp.eq.s32.totalorder %v200_v61, %v6154_v57  ;;  %vm723_vm12 = vcmp.eq.s32.totalorder %v200_v61, %v5000_v9  ;;  %v10296_v61 = vmov 0 }
 0x12f   :  { %v10291_v7 = vsel %vm7185_vm2, 4294967295, %v10290_v7  ;;  %vm7196_vm15 = vmor %vm509_vm3, %vm771_vm1  ;;  %vm492_vm3 = vcmp.eq.s32.totalorder %v231_v31, %v6154_v57  ;;  %v10302_v31 = vmov 0  ;;  %vm741_vm6 = vcmp.eq.s32.totalorder %v218_v15, %v5000_v9 }
 0x130   :  { %10292 = vst [vmem:[#allocation143_spill] sm:$0xff] %v10291_v7  ;;  %v10294_v2 = vsel %vm7196_vm15, 4294967295, %v10293_v2  ;;  %vm9607_vm13 = vmpackc.low %vm7196_vm15, %vm7185_vm2  ;;  %v10305_v7 = vmov 0  ;;  %vm479_vm15 = vcmp.eq.s32.totalorder %v218_v15, %v6154_v57  ;;  %v202_v15 = vadd.s32 1128, %v4985_v1 }
 0x131   :  { %10295 = vst [vmem:[#allocation144_spill] sm:$0xff] %v10294_v2  ;;  %4338 = vmatprep.subr.msk.bf16.mxu1 %vm9607_vm13, %v9932_v51  ;;  %vm7223_vm1 = vmor %vm460_vm8, %vm722_vm10  ;;  %vm755_vm13 = vcmp.eq.s32.totalorder %v232_v62, %v5000_v9  ;;  %vm478_vm10 = vcmp.eq.s32.totalorder %v217_v27, %v6154_v57  ;;  %v250_v62 = vadd.s32 1512, %v4985_v1  ;;  %v1572_v2 = vld [vmem:[#allocation6 + $0xe0] sm:$0xff] }
 0x132   :  { %v10297_v61 = vsel %vm7223_vm1, 4294967295, %v10296_v61  ;;  %vm7230_vm0 = vmor %vm461_vm11, %vm723_vm12  ;;  %vm740_vm12 = vcmp.eq.s32.totalorder %v217_v27, %v5000_v9  ;;  %v10308_v27 = vmov 0 }
 0x133   :  { %10298 = vst [vmem:[#allocation145_spill] sm:$0xff] %v10297_v61  ;;  %v10300_v5 = vsel %vm7230_vm0, 4294967295, %v10299_v5  ;;  %vm9613_vm8 = vmpackc.low %vm7230_vm0, %vm7223_vm1  ;;  %v201_v61 = vadd.s32 1120, %v4985_v1  ;;  %vm511_vm1 = vcmp.eq.s32.totalorder %v250_v62, %v6154_v57  ;;  %vm773_vm0 = vcmp.eq.s32.totalorder %v250_v62, %v5000_v9 }
 0x134   :  { %10301 = vst [vmem:[#allocation146_spill] sm:$0xff] %v10300_v5  ;;  %4299 = vmatpush3.bf16.msk.msra.mxu0 %vm9613_vm8, %v9932_v51  ;;  %vm7247_vm11 = vmor %vm492_vm3, %vm754_vm9  ;;  %vm772_vm3 = vcmp.eq.s32.totalorder %v249_v35, %v5000_v9  ;;  %v10311_v5 = vmov 0  ;;  %v234_v62 = vadd.s32 1384, %v4985_v1 }
 0x135   :  { %v10303_v31 = vsel %vm7247_vm11, 4294967295, %v10302_v31  ;;  %vm7254_vm2 = vmor %vm493_vm5, %vm755_vm13  ;;  %vm510_vm13 = vcmp.eq.s32.totalorder %v249_v35, %v6154_v57  ;;  %v10314_v35 = vmov 0 }
 0x136   :  { %10304 = vst [vmem:[#allocation147_spill] sm:$0xff] %v10303_v31  ;;  %v10306_v7 = vsel %vm7254_vm2, 4294967295, %v10305_v7  ;;  %vm9618_vm9 = vmpackc.low %vm7254_vm2, %vm7247_vm11  ;;  %v233_v31 = vadd.s32 1376, %v4985_v1  ;;  %vm463_vm11 = vcmp.eq.s32.totalorder %v202_v15, %v6154_v57  ;;  %vm725_vm2 = vcmp.eq.s32.totalorder %v202_v15, %v5000_v9 }
 0x137   :  { %10307 = vst [vmem:[#allocation148_spill] sm:$0xff] %v10306_v7  ;;  %4339 = vmatpush3.bf16.msk.msra.mxu1 %vm9618_vm9, %v9932_v51  ;;  %vm7271_vm5 = vmor %vm478_vm10, %vm740_vm12  ;;  %vm724_vm12 = vcmp.eq.s32.totalorder %v201_v61, %v5000_v9  ;;  %v10317_v7 = vmov 0  ;;  %v220_v15 = vadd.s32 1272, %v4985_v1 }
 0x138   :  { %v10309_v27 = vsel %vm7271_vm5, 4294967295, %v10308_v27  ;;  %vm7278_vm8 = vmor %vm479_vm15, %vm741_vm6  ;;  %vm462_vm15 = vcmp.eq.s32.totalorder %v201_v61, %v6154_v57  ;;  %v10320_v61 = vmov 0 }
 0x139   :  { %10310 = vst [vmem:[#allocation149_spill] sm:$0xff] %v10309_v27  ;;  %v10312_v5 = vsel %vm7278_vm8, 4294967295, %v10311_v5  ;;  %vm9623_vm10 = vmpackc.low %vm7278_vm8, %vm7271_vm5  ;;  %v219_v27 = vadd.s32 1264, %v4985_v1  ;;  %vm743_vm8 = vcmp.eq.s32.totalorder %v220_v15, %v5000_v9 }
 0x13a   :  { %10313 = vst [vmem:[#allocation150_spill] sm:$0xff] %v10312_v5  ;;  %4300 = vmatprep.subr.msk.bf16.mxu0 %vm9623_vm10, %v9932_v51  ;;  %vm7295_vm6 = vmor %vm510_vm13, %vm772_vm3  ;;  %vm756_vm3 = vcmp.eq.s32.totalorder %v233_v31, %v5000_v9  ;;  %v10323_v5 = vmov 0 }
 0x13b   :  { %v10315_v35 = vsel %vm7295_vm6, 4294967295, %v10314_v35  ;;  %vm7302_vm9 = vmor %vm511_vm1, %vm773_vm0  ;;  %vm494_vm1 = vcmp.eq.s32.totalorder %v233_v31, %v6154_v57  ;;  %v251_v57 = vadd.s32 1520, %v4985_v1  ;;  %v10326_v31 = vmov 0 }
 0x13c   :  { %10316 = vst [vmem:[#allocation151_spill] sm:$0xff] %v10315_v35  ;;  %v10318_v7 = vsel %vm7302_vm9, 4294967295, %v10317_v7  ;;  %vm9626_vm13 = vmpackc.low %vm7302_vm9, %vm7295_vm6  ;;  %v7333_v35 = vld [vmem:[%s9218_s0] ss:$0 sm:$0xff]  ;;  %vm742_vm6 = vcmp.eq.s32.totalorder %v219_v27, %v5000_v9  ;;  %s4885_s0 = scalar_lea.vmem %s3474_s12, 32 }
 0x13d   :  { %10319 = vst [vmem:[#allocation152_spill] sm:$0xff] %v10318_v7  ;;  %4340 = vmatprep.subr.msk.bf16.mxu1 %vm9626_vm13, %v9932_v51  ;;  %vm7319_vm0 = vmor %vm462_vm15, %vm724_vm12  ;;  %vm495_vm15 = vcmp.eq.s32.totalorder %v234_v62, %v7333_v35  ;;  %vm757_vm12 = vcmp.eq.s32.totalorder %v234_v62, %v5000_v9  ;;  %v252_v62 = vadd.s32 1528, %v4985_v1  ;;  %v10329_v7 = vmov 0  ;;  %p4887_p4 = scmp.lt.s32.totalorder %s4885_s0, %s4881_s13 }
 0x13e   :  { %v10321_v61 = vsel %vm7319_vm0, 4294967295, %v10320_v61  ;;  %vm7326_vm10 = vmor %vm463_vm11, %vm725_vm2  ;;  %vm480_vm11 = vcmp.eq.s32.totalorder %v219_v27, %v7333_v35  ;;  %vm481_vm5 = vcmp.eq.s32.totalorder %v220_v15, %v7333_v35  ;;  %v10332_v27 = vmov 0 }
 0x13f   :  { %10322 = vst [vmem:[#allocation153_spill] sm:$0xff] %v10321_v61  ;;  %v10324_v5 = vsel %vm7326_vm10, 4294967295, %v10323_v5  ;;  %vm9633_vm13 = vmpackc.low %vm7326_vm10, %vm7319_vm0  ;;  %v203_v61 = vadd.s32 1136, %v4985_v1  ;;  %v204_v15 = vadd.s32 1144, %v4985_v1  ;;  %vm513_vm0 = vcmp.eq.s32.totalorder %v252_v62, %v7333_v35  ;;  %p4888_p5 = por %p4887_p4, %p4886_p3 }
 0x140   :  { %10325 = vst [vmem:[#allocation154_spill] sm:$0xff] %v10324_v5  ;;  %4301 = vmatpush3.bf16.msk.msra.mxu0 %vm9633_vm13, %v9932_v51  ;;  %vm7348_vm2 = vmor %vm494_vm1, %vm756_vm3  ;;  %v10335_v5 = vmov 0  ;;  %vm775_vm10 = vcmp.eq.s32.totalorder %v252_v62, %v5000_v9  ;;  %v236_v62 = vadd.s32 1400, %v4985_v1 }
 0x141   :  { %v10327_v31 = vsel %vm7348_vm2, 4294967295, %v10326_v31  ;;  %vm7355_vm9 = vmor %vm495_vm15, %vm757_vm12  ;;  %vm512_vm15 = vcmp.eq.s32.totalorder %v251_v57, %v7333_v35  ;;  %vm774_vm12 = vcmp.eq.s32.totalorder %v251_v57, %v5000_v9  ;;  %v10338_v57 = vmov 0  ;;  %p4889_p6 = pnand %p4888_p5, %p4882_p2 }
 0x142   :  { %10328 = vst [vmem:[#allocation155_spill] sm:$0xff] %v10327_v31  ;;  %v10330_v7 = vsel %vm7355_vm9, 4294967295, %v10329_v7  ;;  %vm9638_vm1 = vmpackc.low %vm7355_vm9, %vm7348_vm2  ;;  %v235_v31 = vadd.s32 1392, %v4985_v1  ;;  %vm465_vm2 = vcmp.eq.s32.totalorder %v204_v15, %v7333_v35  ;;  %vm727_vm9 = vcmp.eq.s32.totalorder %v204_v15, %v5000_v9 }
 0x143   :  { %10331 = vst [vmem:[#allocation156_spill] sm:$0xff] %v10330_v7  ;;  %4341 = vmatpush3.bf16.msk.msra.mxu1 %vm9638_vm1, %v9932_v51  ;;  %vm7372_vm3 = vmor %vm480_vm11, %vm742_vm6  ;;  %vm726_vm11 = vcmp.eq.s32.totalorder %v203_v61, %v5000_v9  ;;  %v10341_v7 = vmov 0  ;;  %v270_v15 = vadd.s32 1672, %v4985_v1 }
 0x144   :  { %v10333_v27 = vsel %vm7372_vm3, 4294967295, %v10332_v27  ;;  %vm7379_vm13 = vmor %vm481_vm5, %vm743_vm8  ;;  %vm464_vm5 = vcmp.eq.s32.totalorder %v203_v61, %v7333_v35  ;;  %v10344_v61 = vmov 0 }
 0x145   :  { %10334 = vst [vmem:[#allocation157_spill] sm:$0xff] %v10333_v27  ;;  %v10336_v5 = vsel %vm7379_vm13, 4294967295, %v10335_v5  ;;  %vm9645_vm6 = vmpackc.low %vm7379_vm13, %vm7372_vm3  ;;  %v269_v27 = vadd.s32 1664, %v4985_v1  ;;  %vm497_vm3 = vcmp.eq.s32.totalorder %v236_v62, %v7333_v35  ;;  %vm777_vm13 = vcmp.eq.s32.totalorder %v254_v43, %v5000_v9 }
 0x146   :  { %10337 = vst [vmem:[#allocation158_spill] sm:$0xff] %v10336_v5  ;;  %4302 = vmatprep.subr.msk.bf16.mxu0 %vm9645_vm6, %v9932_v51  ;;  %vm7396_vm8 = vmor %vm512_vm15, %vm774_vm12  ;;  %vm758_vm12 = vcmp.eq.s32.totalorder %v235_v31, %v5000_v9  ;;  %v1564_v5 = vld [vmem:[#allocation6 + $0xa0] sm:$0xff] }
 0x147   :  { %v10339_v57 = vsel %vm7396_vm8, 4294967295, %v10338_v57  ;;  %vm7403_vm1 = vmor %vm513_vm0, %vm775_vm10  ;;  %vm496_vm0 = vcmp.eq.s32.totalorder %v235_v31, %v7333_v35  ;;  %v10350_v31 = vmov 0 }
 0x148   :  { %10340 = vst [vmem:[#allocation159_spill] sm:$0xff] %v10339_v57  ;;  %v10342_v7 = vsel %vm7403_vm1, 4294967295, %v10341_v7  ;;  %vm9648_vm15 = vmpackc.low %vm7403_vm1, %vm7396_vm8  ;;  %v301_v57 = vadd.s32 1920, %v4985_v1  ;;  %vm515_vm1 = vcmp.eq.s32.totalorder %v254_v43, %v7333_v35  ;;  %v10370_v43 = vmov 0 }
 0x149   :  { %10343 = vst [vmem:[#allocation160_spill] sm:$0xff] %v10342_v7  ;;  %4342 = vmatprep.subr.msk.bf16.mxu1 %vm9648_vm15, %v9932_v51  ;;  %vm7420_vm10 = vmor %vm464_vm5, %vm726_vm11  ;;  %vm759_vm15 = vcmp.eq.s32.totalorder %v236_v62, %v5000_v9  ;;  %vm792_vm11 = vcmp.eq.s32.totalorder %v269_v27, %v5000_v9  ;;  %v302_v62 = vadd.s32 1928, %v4985_v1  ;;  %v3509_v7 = vcombine.high %v1564_v5, %v1572_v2 }
 0x14a   :  { %v10345_v61 = vsel %vm7420_vm10, 4294967295, %v10344_v61  ;;  %vm7427_vm6 = vmor %vm465_vm2, %vm727_vm9  ;;  %vm530_vm2 = vcmp.eq.s32.totalorder %v269_v27, %v7333_v35  ;;  %v253_v27 = vadd.s32 1536, %v4985_v1 }
 0x14b   :  { %10346 = vst [vmem:[#allocation161_spill] sm:$0xff] %v10345_v61  ;;  %v10348_v6 = vsel %vm7427_vm6, 4294967295, %v10347_v6  ;;  %vm9655_vm5 = vmpackc.low %vm7427_vm6, %vm7420_vm10  ;;  %v10356_v61 = vcombine.low %v6368_v63, %v6370_v19  ;;  %vm824_vm10 = vcmp.eq.s32.totalorder %v301_v57, %v5000_v9  ;;  %v285_v63 = vadd.s32 1792, %v4985_v1  ;;  %v7495_v19 = vld [vmem:[#allocation6 + $0x120] sm:$0xff] }
 0x14c   :  { %10349 = vst [vmem:[#allocation162_spill] sm:$0xff] %v10348_v6  ;;  %4303 = vmatpush3.bf16.msk.msra.mxu0 %vm9655_vm5, %v9932_v51  ;;  %vm7444_vm9 = vmor %vm496_vm0, %vm758_vm12  ;;  %v10353_v6 = vmov 0  ;;  %vm531_vm0 = vcmp.eq.s32.totalorder %v270_v15, %v7333_v35  ;;  %vm793_vm12 = vcmp.eq.s32.totalorder %v270_v15, %v5000_v9  ;;  %v10357_v15 = vmov 0 }
 0x14d   :  { %v10351_v31 = vsel %vm7444_vm9, 4294967295, %v10350_v31  ;;  %vm7455_vm8 = vmor %vm497_vm3, %vm759_vm15  ;;  %vm562_vm15 = vcmp.eq.s32.totalorder %v301_v57, %v7333_v35  ;;  %v7497_v57 = vld [vmem:[#allocation6 + $0x160] sm:$0xff] }
 0x14e   :  { %10352 = vst [vmem:[#allocation163_spill] sm:$0xff] %v10351_v31  ;;  %v10354_v6 = vsel %vm7455_vm8, 4294967295, %v10353_v6  ;;  %vm9662_vm5 = vmpackc.low %vm7455_vm8, %vm7444_vm9  ;;  %v10360_v31 = vmov 0  ;;  %vm776_vm9 = vcmp.eq.s32.totalorder %v253_v27, %v5000_v9 }
 0x14f   :  { %10355 = vst [vmem:[#allocation164_spill] sm:$0xff] %v10354_v6  ;;  %4343 = vmatpush3.bf16.msk.msra.mxu1 %vm9662_vm5, %v9932_v51  ;;  %2221 = vmatmul.mubr.bf16.vlgmr.msra.gmra.mrb[32].mxu0 %v10356_v61  ;;  %vm7475_vm3 = vmor %vm530_vm2, %vm792_vm11  ;;  %v3511_v6 = vcombine.high %v7451_v59, %v7453_v14  ;;  %vm563_vm5 = vcmp.eq.s32.totalorder %v302_v62, %v7333_v35 }
 0x150   :  { %v10358_v15 = vsel %vm7475_vm3, 4294967295, %v10357_v15  ;;  %vm7484_vm6 = vmor %vm531_vm0, %vm793_vm12  ;;  %vm825_vm2 = vcmp.eq.s32.totalorder %v302_v62, %v5000_v9  ;;  %2228 = vmatprep.mubr.bf16.mxu0 %v3509_v7  ;;  %v10363_v61 = vcombine.low %v6380_v4, %v6382_v39  ;;  %v10364_v7 = vmov 0 }
 0x151   :  { %10359 = vst [vmem:[#allocation165_spill] sm:$0xff] %v10358_v15  ;;  %v10361_v31 = vsel %vm7484_vm6, 4294967295, %v10360_v31  ;;  %vm9669_vm11 = vmpackc.low %vm7484_vm6, %vm7475_vm3  ;;  %vm514_vm12 = vcmp.eq.s32.totalorder %v253_v27, %v7333_v35  ;;  %v286_v62 = vadd.s32 1800, %v4985_v1  ;;  %v10367_v4 = vmov 0  ;;  %v7528_v15 = vld [vmem:[#allocation6 + $0x128] sm:$0xff] }
 0x152   :  { %10362 = vst [vmem:[#allocation166_spill] sm:$0xff] %v10361_v31  ;;  %2286 = vmatmul.mubr.bf16.vlgmr.msra.gmra.mrb[32].mxu1 %v10363_v61  ;;  %4368 = vmatprep.subr.msk.bf16.mxu0 %vm9669_vm11, %v9932_v51  ;;  %vm7508_vm0 = vmor %vm562_vm15, %vm824_vm10  ;;  %v3508_v39 = vcombine.low %v1564_v5, %v1572_v2  ;;  %v271_v61 = vadd.s32 1680, %v4985_v1  ;;  %v3525_v27 = vcombine.high %v7495_v19, %v7497_v57  ;;  %v7530_v31 = vld [vmem:[#allocation6 + $0x168] sm:$0xff]  ;;  %v272_v5 = vadd.s32 1688, %v4985_v1 }
 0x153   :  { %v10365_v7 = vsel %vm7508_vm0, 4294967295, %v10364_v7  ;;  %vm7515_vm8 = vmor %vm563_vm5, %vm825_vm2  ;;  %2293 = vmatprep.mubr.bf16.mxu1 %v3511_v6  ;;  %vm546_vm15 = vcmp.eq.s32.totalorder %v285_v63, %v7333_v35  ;;  %vm808_vm2 = vcmp.eq.s32.totalorder %v285_v63, %v5000_v9  ;;  %v10373_v6 = vmov 0 }
 0x154   :  { %10366 = vst [vmem:[#allocation167_spill] sm:$0xff] %v10365_v7  ;;  %v10368_v4 = vsel %vm7515_vm8, 4294967295, %v10367_v4  ;;  %vm9673_vm10 = vmpackc.low %vm7515_vm8, %vm7508_vm0  ;;  %vm547_vm3 = vcmp.eq.s32.totalorder %v286_v62, %v7333_v35  ;;  %vm809_vm6 = vcmp.eq.s32.totalorder %v286_v62, %v5000_v9  ;;  %v3510_v2 = vcombine.low %v7451_v59, %v7453_v14 }
 0x155   :  { %10369 = vst [vmem:[#allocation168_spill] sm:$0xff] %v10368_v4  ;;  %4408 = vmatprep.subr.msk.bf16.mxu1 %vm9673_vm10, %v9932_v51  ;;  %vm7538_vm5 = vmor %vm514_vm12, %vm776_vm9  ;;  %v303_v63 = vadd.s32 1936, %v4985_v1  ;;  %v3527_v7 = vcombine.high %v7528_v15, %v7530_v31  ;;  %v10376_v59 = vmov 0  ;;  %vm794_vm12 = vcmp.eq.s32.totalorder %v271_v61, %v5000_v9  ;;  %v1605_v4 = vld [vmem:[#allocation6 + $0x1e8] sm:$0xff] }
 0x156   :  { %v10371_v43 = vsel %vm7538_vm5, 4294967295, %v10370_v43  ;;  %vm7545_vm11 = vmor %vm515_vm1, %vm777_vm13  ;;  %vm532_vm1 = vcmp.eq.s32.totalorder %v271_v61, %v7333_v35  ;;  %v304_v14 = vadd.s32 1944, %v4985_v1  ;;  %v10379_v62 = vmov 0 }
 0x157   :  { %10372 = vst [vmem:[#allocation169_spill] sm:$0xff] %v10371_v43  ;;  %v10374_v6 = vsel %vm7545_vm11, 4294967295, %v10373_v6  ;;  %vm9677_vm9 = vmpackc.low %vm7545_vm11, %vm7538_vm5  ;;  %2229 = vmatmul.mubr.bf16.gmra.mrb[36].mxu0 %v3508_v39  ;;  %vm533_vm0 = vcmp.eq.s32.totalorder %v272_v5, %v7333_v35  ;;  %vm795_vm5 = vcmp.eq.s32.totalorder %v272_v5, %v5000_v9  ;;  %v7579_v39 = vld [vmem:[#allocation6 + $0x1a0] sm:$0xff]  ;;  %v255_v61 = vadd.s32 1552, %v4985_v1 }
 0x158   :  { %10375 = vst [vmem:[#allocation170_spill] sm:$0xff] %v10374_v6  ;;  %4369 = vmatpush3.bf16.msk.msra.mxu0 %vm9677_vm9, %v9932_v51  ;;  %vm7566_vm13 = vmor %vm546_vm15, %vm808_vm2  ;;  %2236 = vmatprep.mubr.bf16.mxu0 %v3525_v27  ;;  %v7581_v43 = vld [vmem:[#allocation6 + $0x1e0] sm:$0xff]  ;;  %v10382_v27 = vmov 0  ;;  %vm826_vm2 = vcmp.eq.s32.totalorder %v303_v63, %v5000_v9  ;;  %v256_v5 = vadd.s32 1560, %v4985_v1  ;;  %v1597_v6 = vld [vmem:[#allocation6 + $0x1a8] sm:$0xff] }
 0x159   :  { %v10377_v59 = vsel %vm7566_vm13, 4294967295, %v10376_v59  ;;  %vm7573_vm10 = vmor %vm547_vm3, %vm809_vm6  ;;  %vm564_vm3 = vcmp.eq.s32.totalorder %v303_v63, %v7333_v35  ;;  %v3526_v63 = vcombine.low %v7528_v15, %v7530_v31  ;;  %v10393_v31 = vmov 0 }
 0x15a   :  { %10378 = vst [vmem:[#allocation171_spill] sm:$0xff] %v10377_v59  ;;  %v10380_v62 = vsel %vm7573_vm10, 4294967295, %v10379_v62  ;;  %vm9679_vm15 = vmpackc.low %vm7573_vm10, %vm7566_vm13  ;;  %2294 = vmatmul.mubr.bf16.gmra.mrb[36].mxu1 %v3510_v2  ;;  %v3524_v2 = vcombine.low %v7495_v19, %v7497_v57  ;;  %v3541_v59 = vcombine.high %v7579_v39, %v7581_v43  ;;  %v287_v19 = vadd.s32 1808, %v4985_v1 }
 0x15b   :  { %10381 = vst [vmem:[#allocation172_spill] sm:$0xff] %v10380_v62  ;;  %4409 = vmatpush3.bf16.msk.msra.mxu1 %vm9679_vm15, %v9932_v51  ;;  %vm7594_vm6 = vmor %vm532_vm1, %vm794_vm12  ;;  %2301 = vmatprep.mubr.bf16.mxu1 %v3527_v7  ;;  %v10385_v62 = vmov 0  ;;  %vm565_vm15 = vcmp.eq.s32.totalorder %v304_v14, %v7333_v35  ;;  %vm827_vm1 = vcmp.eq.s32.totalorder %v304_v14, %v5000_v9  ;;  %v10387_v57 = vmov 0 }
 0x15c   :  { %v10383_v27 = vsel %vm7594_vm6, 4294967295, %v10382_v27  ;;  %vm7603_vm9 = vmor %vm533_vm0, %vm795_vm5  ;;  %vm516_vm5 = vcmp.eq.s32.totalorder %v255_v61, %v7333_v35  ;;  %vm778_vm13 = vcmp.eq.s32.totalorder %v255_v61, %v5000_v9  ;;  %v288_v7 = vadd.s32 1816, %v4985_v1 }
 0x15d   :  { %10384 = vst [vmem:[#allocation173_spill] sm:$0xff] %v10383_v27  ;;  %v10386_v62 = vsel %vm7603_vm9, 4294967295, %v10385_v62  ;;  %vm9687_vm12 = vmpackc.low %vm7603_vm9, %vm7594_vm6  ;;  %v10390_v14 = vmov 0  ;;  %vm517_vm6 = vcmp.eq.s32.totalorder %v256_v5, %v7333_v35  ;;  %v3543_v27 = vcombine.high %v1597_v6, %v1605_v4 }
 0x15e   :  { %4370 = vmatprep.subr.msk.bf16.mxu0 %vm9687_vm12, %v9932_v51  ;;  %vm7622_vm0 = vmor %vm564_vm3, %vm826_vm2  ;;  %vm779_vm3 = vcmp.eq.s32.totalorder %v256_v5, %v5000_v9  ;;  %v273_v61 = vadd.s32 1696, %v4985_v1  ;;  %vm810_vm12 = vcmp.eq.s32.totalorder %v287_v19, %v5000_v9  ;;  %v274_v15 = vadd.s32 1704, %v4985_v1 }
 0x15f   :  { %v10388_v57 = vsel %vm7622_vm0, 4294967295, %v10387_v57  ;;  %vm7631_vm10 = vmor %vm565_vm15, %vm827_vm1  ;;  %2237 = vmatmul.mubr.bf16.gmra.mrb[40].mxu0 %v3524_v2  ;;  %vm548_vm1 = vcmp.eq.s32.totalorder %v287_v19, %v7333_v35  ;;  %v10396_v5 = vmov 0  ;;  %vm549_vm11 = vcmp.eq.s32.totalorder %v288_v7, %v7333_v35 }
 0x160   :  { %10389 = vst [vmem:[#allocation174_spill] sm:$0xff] %v10388_v57  ;;  %v10391_v14 = vsel %vm7631_vm10, 4294967295, %v10390_v14  ;;  %vm9691_vm2 = vmpackc.low %vm7631_vm10, %vm7622_vm0  ;;  %2244 = vmatprep.mubr.bf16.mxu0 %v3541_v59  ;;  %vm811_vm8 = vcmp.eq.s32.totalorder %v288_v7, %v5000_v9  ;;  %v305_v59 = vadd.s32 1952, %v4985_v1  ;;  %v3540_v2 = vcombine.low %v7579_v39, %v7581_v43 }
 0x161   :  { %10392 = vst [vmem:[#allocation175_spill] sm:$0xff] %v10391_v14  ;;  %4410 = vmatprep.subr.msk.bf16.mxu1 %vm9691_vm2, %v9932_v51  ;;  %vm7648_vm15 = vmor %vm516_vm5, %vm778_vm13  ;;  %v10399_v19 = vmov 0  ;;  %vm534_vm5 = vcmp.eq.s32.totalorder %v273_v61, %v7333_v35  ;;  %v3497_v43 = vcombine.high %v7192_v47, %v7194_v60  ;;  %v10402_v39 = vmov 0 }
 0x162   :  { %v10394_v31 = vsel %vm7648_vm15, 4294967295, %v10393_v31  ;;  %vm7655_vm9 = vmor %vm517_vm6, %vm779_vm3  ;;  %2302 = vmatmul.mubr.bf16.gmra.mrb[40].mxu1 %v3526_v63  ;;  %vm796_vm3 = vcmp.eq.s32.totalorder %v273_v61, %v5000_v9  ;;  %v257_v7 = vadd.s32 1568, %v4985_v1  ;;  %v3542_v63 = vcombine.low %v1597_v6, %v1605_v4 }
 0x163   :  { %10395 = vst [vmem:[#allocation176_spill] sm:$0xff] %v10394_v31  ;;  %v10397_v5 = vsel %vm7655_vm9, 4294967295, %v10396_v5  ;;  %vm9693_vm13 = vmpackc.low %vm7655_vm9, %vm7648_vm15  ;;  %2309 = vmatprep.mubr.bf16.mxu1 %v3543_v27  ;;  %v306_v27 = vadd.s32 1960, %v4985_v1  ;;  %vm535_vm15 = vcmp.eq.s32.totalorder %v274_v15, %v7333_v35  ;;  %v10405_v61 = vmov 0 }
 0x164   :  { %10398 = vst [vmem:[#allocation177_spill] sm:$0xff] %v10397_v5  ;;  %4371 = vmatpush3.bf16.msk.msra.mxu0 %vm9693_vm13, %v9932_v51  ;;  %vm7674_vm6 = vmor %vm548_vm1, %vm810_vm12  ;;  %vm797_vm12 = vcmp.eq.s32.totalorder %v274_v15, %v5000_v9  ;;  %vm828_vm13 = vcmp.eq.s32.totalorder %v305_v59, %v5000_v9  ;;  %v258_v15 = vadd.s32 1576, %v4985_v1  ;;  %v3499_v4 = vcombine.high %v7204_v23, %v7206_v55 }
 0x165   :  { %v10400_v19 = vsel %vm7674_vm6, 4294967295, %v10399_v19  ;;  %vm7683_vm2 = vmor %vm549_vm11, %vm811_vm8  ;;  %vm566_vm11 = vcmp.eq.s32.totalorder %v305_v59, %v7333_v35  ;;  %v10408_v6 = vmov 0  ;;  %v289_v59 = vadd.s32 1824, %v4985_v1 }
 0x166   :  { %10401 = vst [vmem:[#allocation178_spill] sm:$0xff] %v10400_v19  ;;  %v10403_v39 = vsel %vm7683_vm2, 4294967295, %v10402_v39  ;;  %vm9695_vm1 = vmpackc.low %vm7683_vm2, %vm7674_vm6  ;;  %vm780_vm6 = vcmp.eq.s32.totalorder %v257_v7, %v5000_v9  ;;  %vm519_vm0 = vcmp.eq.s32.totalorder %v258_v15, %v7333_v35  ;;  %v275_v19 = vadd.s32 1712, %v4985_v1 }
 0x167   :  { %10404 = vst [vmem:[#allocation179_spill] sm:$0xff] %v10403_v39  ;;  %4411 = vmatpush3.bf16.msk.msra.mxu1 %vm9695_vm1, %v9932_v51  ;;  %vm7700_vm8 = vmor %vm534_vm5, %vm796_vm3  ;;  %2245 = vmatmul.mubr.bf16.gmra.mrb[44].mxu0 %v3540_v2  ;;  %vm567_vm1 = vcmp.eq.s32.totalorder %v306_v27, %v7333_v35  ;;  %vm829_vm5 = vcmp.eq.s32.totalorder %v306_v27, %v5000_v9  ;;  %v10411_v2 = vmov 0  ;;  %v290_v27 = vadd.s32 1832, %v4985_v1 }
 0x168   :  { %v10406_v61 = vsel %vm7700_vm8, 4294967295, %v10405_v61  ;;  %vm7709_vm9 = vmor %vm535_vm15, %vm797_vm12  ;;  %2350 = vmatprep.mubr.bf16.mxu0 %v3497_v43  ;;  %vm518_vm12 = vcmp.eq.s32.totalorder %v257_v7, %v7333_v35  ;;  %v10414_v43 = vmov 0  ;;  %v10417_v7 = vmov 0 }
 0x169   :  { %10407 = vst [vmem:[#allocation180_spill] sm:$0xff] %v10406_v61  ;;  %v10409_v6 = vsel %vm7709_vm9, 4294967295, %v10408_v6  ;;  %vm9701_vm3 = vmpackc.low %vm7709_vm9, %vm7700_vm8  ;;  %vm781_vm8 = vcmp.eq.s32.totalorder %v258_v15, %v5000_v9  ;;  %v10420_v15 = vmov 0  ;;  %vm551_vm9 = vcmp.eq.s32.totalorder %v290_v27, %v7333_v35 }
 0x16a   :  { %10410 = vst [vmem:[#allocation181_spill] sm:$0xff] %v10409_v6  ;;  %4372 = vmatprep.subr.msk.bf16.mxu0 %vm9701_vm3, %v9932_v51  ;;  %vm7726_vm15 = vmor %vm566_vm11, %vm828_vm13  ;;  %2310 = vmatmul.mubr.bf16.gmra.mrb[44].mxu1 %v3542_v63  ;;  %vm550_vm11 = vcmp.eq.s32.totalorder %v289_v59, %v7333_v35  ;;  %v276_v63 = vadd.s32 1720, %v4985_v1  ;;  %vm813_vm10 = vcmp.eq.s32.totalorder %v290_v27, %v5000_v9  ;;  %v308_v27 = vadd.s32 1976, %v4985_v1 }
 0x16b   :  { %v10412_v2 = vsel %vm7726_vm15, 4294967295, %v10411_v2  ;;  %vm7733_vm2 = vmor %vm567_vm1, %vm829_vm5  ;;  %2415 = vmatprep.mubr.bf16.mxu1 %v3499_v4  ;;  %vm812_vm5 = vcmp.eq.s32.totalorder %v289_v59, %v5000_v9  ;;  %v307_v4 = vadd.s32 1968, %v4985_v1  ;;  %v10423_v59 = vmov 0 }
 0x16c   :  { %10413 = vst [vmem:[#allocation182_spill] sm:$0xff] %v10412_v2  ;;  %v10415_v43 = vsel %vm7733_vm2, 4294967295, %v10414_v43  ;;  %vm9704_vm13 = vmpackc.low %vm7733_vm2, %vm7726_vm15  ;;  %v10426_v2 = vmov 0  ;;  %vm537_vm15 = vcmp.eq.s32.totalorder %v276_v63, %v7333_v35  ;;  %vm799_vm2 = vcmp.eq.s32.totalorder %v276_v63, %v5000_v9 }
 0x16d   :  { %10416 = vst [vmem:[#allocation183_spill] sm:$0xff] %v10415_v43  ;;  %4412 = vmatprep.subr.msk.bf16.mxu1 %vm9704_vm13, %v9932_v51  ;;  %vm7750_vm1 = vmor %vm518_vm12, %vm780_vm6  ;;  %vm798_vm12 = vcmp.eq.s32.totalorder %v275_v19, %v5000_v9  ;;  %v260_v63 = vadd.s32 1592, %v4985_v1  ;;  %v4184_v43 = vpop.f32.mrb[0].mxu1  ;;  %v10527_v39 = vmov 0  ;;  %v299_v61 = vadd.s32 1904, %v4985_v1 }
 0x16e   :  { %v10418_v7 = vsel %vm7750_vm1, 4294967295, %v10417_v7  ;;  %vm7757_vm3 = vmor %vm519_vm0, %vm781_vm8  ;;  %vm536_vm8 = vcmp.eq.s32.totalorder %v275_v19, %v7333_v35  ;;  %v10429_v19 = vmov 0  ;;  %v10529_v14 = vmov 0 }
 0x16f   :  { %10419 = vst [vmem:[#allocation184_spill] sm:$0xff] %v10418_v7  ;;  %v10421_v15 = vsel %vm7757_vm3, 4294967295, %v10420_v15  ;;  %vm9709_vm6 = vmpackc.low %vm7757_vm3, %vm7750_vm1  ;;  %v259_v7 = vadd.s32 1584, %v4985_v1  ;;  %vm569_vm1 = vcmp.eq.s32.totalorder %v308_v27, %v7333_v35  ;;  %vm831_vm3 = vcmp.eq.s32.totalorder %v308_v27, %v5000_v9 }
 0x170   :  { %10422 = vst [vmem:[#allocation185_spill] sm:$0xff] %v10421_v15  ;;  %4373 = vmatpush3.bf16.msk.msra.mxu0 %vm9709_vm6, %v9932_v51  ;;  %vm7774_vm0 = vmor %vm550_vm11, %vm812_vm5  ;;  %vm830_vm5 = vcmp.eq.s32.totalorder %v307_v4, %v5000_v9  ;;  %v10432_v15 = vmov 0  ;;  %v292_v27 = vadd.s32 1848, %v4985_v1 }
 0x171   :  { %v10424_v59 = vsel %vm7774_vm0, 4294967295, %v10423_v59  ;;  %vm7781_vm13 = vmor %vm551_vm9, %vm813_vm10  ;;  %vm568_vm9 = vcmp.eq.s32.totalorder %v307_v4, %v7333_v35  ;;  %v10435_v4 = vmov 0 }
 0x172   :  { %10425 = vst [vmem:[#allocation186_spill] sm:$0xff] %v10424_v59  ;;  %v10427_v2 = vsel %vm7781_vm13, 4294967295, %v10426_v2  ;;  %vm9714_vm11 = vmpackc.low %vm7781_vm13, %vm7774_vm0  ;;  %v291_v59 = vadd.s32 1840, %v4985_v1  ;;  %vm521_vm0 = vcmp.eq.s32.totalorder %v260_v63, %v7333_v35  ;;  %vm783_vm13 = vcmp.eq.s32.totalorder %v260_v63, %v5000_v9 }
 0x173   :  { %10428 = vst [vmem:[#allocation187_spill] sm:$0xff] %v10427_v2  ;;  %4413 = vmatpush3.bf16.msk.msra.mxu1 %vm9714_vm11, %v9932_v51  ;;  %vm7798_vm10 = vmor %vm536_vm8, %vm798_vm12  ;;  %vm782_vm12 = vcmp.eq.s32.totalorder %v259_v7, %v5000_v9  ;;  %v10438_v2 = vmov 0  ;;  %v278_v63 = vadd.s32 1736, %v4985_v1 }
 0x174   :  { %v10430_v19 = vsel %vm7798_vm10, 4294967295, %v10429_v19  ;;  %vm7805_vm6 = vmor %vm537_vm15, %vm799_vm2  ;;  %vm520_vm15 = vcmp.eq.s32.totalorder %v259_v7, %v7333_v35  ;;  %v10441_v7 = vmov 0 }
 0x175   :  { %10431 = vst [vmem:[#allocation188_spill] sm:$0xff] %v10430_v19  ;;  %v10433_v15 = vsel %vm7805_vm6, 4294967295, %v10432_v15  ;;  %vm9719_vm8 = vmpackc.low %vm7805_vm6, %vm7798_vm10  ;;  %v277_v19 = vadd.s32 1728, %v4985_v1  ;;  %vm553_vm10 = vcmp.eq.s32.totalorder %v292_v27, %v7333_v35  ;;  %vm815_vm6 = vcmp.eq.s32.totalorder %v292_v27, %v5000_v9 }
 0x176   :  { %10434 = vst [vmem:[#allocation189_spill] sm:$0xff] %v10433_v15  ;;  %4374 = vmatprep.subr.msk.bf16.mxu0 %vm9719_vm8, %v9932_v51  ;;  %vm7822_vm2 = vmor %vm568_vm9, %vm830_vm5  ;;  %vm814_vm5 = vcmp.eq.s32.totalorder %v291_v59, %v5000_v9  ;;  %v10444_v15 = vmov 0  ;;  %v310_v27 = vadd.s32 1992, %v4985_v1 }
 0x177   :  { %v10436_v4 = vsel %vm7822_vm2, 4294967295, %v10435_v4  ;;  %vm7829_vm11 = vmor %vm569_vm1, %vm831_vm3  ;;  %vm552_vm1 = vcmp.eq.s32.totalorder %v291_v59, %v7333_v35  ;;  %v10447_v59 = vmov 0 }
 0x178   :  { %10437 = vst [vmem:[#allocation190_spill] sm:$0xff] %v10436_v4  ;;  %v10439_v2 = vsel %vm7829_vm11, 4294967295, %v10438_v2  ;;  %vm9724_vm9 = vmpackc.low %vm7829_vm11, %vm7822_vm2  ;;  %v309_v4 = vadd.s32 1984, %v4985_v1  ;;  %vm539_vm2 = vcmp.eq.s32.totalorder %v278_v63, %v7333_v35  ;;  %vm801_vm11 = vcmp.eq.s32.totalorder %v278_v63, %v5000_v9 }
 0x179   :  { %10440 = vst [vmem:[#allocation191_spill] sm:$0xff] %v10439_v2  ;;  %4414 = vmatprep.subr.msk.bf16.mxu1 %vm9724_vm9, %v9932_v51  ;;  %vm7846_vm3 = vmor %vm520_vm15, %vm782_vm12  ;;  %vm800_vm12 = vcmp.eq.s32.totalorder %v277_v19, %v5000_v9  ;;  %v10450_v2 = vmov 0  ;;  %v262_v63 = vadd.s32 1608, %v4985_v1 }
 0x17a   :  { %v10442_v7 = vsel %vm7846_vm3, 4294967295, %v10441_v7  ;;  %vm7853_vm8 = vmor %vm521_vm0, %vm783_vm13  ;;  %vm538_vm0 = vcmp.eq.s32.totalorder %v277_v19, %v7333_v35  ;;  %v10453_v19 = vmov 0 }
 0x17b   :  { %10443 = vst [vmem:[#allocation192_spill] sm:$0xff] %v10442_v7  ;;  %v10445_v15 = vsel %vm7853_vm8, 4294967295, %v10444_v15  ;;  %vm9729_vm15 = vmpackc.low %vm7853_vm8, %vm7846_vm3  ;;  %v261_v7 = vadd.s32 1600, %v4985_v1  ;;  %vm571_vm3 = vcmp.eq.s32.totalorder %v310_v27, %v7333_v35  ;;  %vm833_vm8 = vcmp.eq.s32.totalorder %v310_v27, %v5000_v9 }
 0x17c   :  { %10446 = vst [vmem:[#allocation193_spill] sm:$0xff] %v10445_v15  ;;  %4375 = vmatpush3.bf16.msk.msra.mxu0 %vm9729_vm15, %v9932_v51  ;;  %vm7870_vm13 = vmor %vm552_vm1, %vm814_vm5  ;;  %vm832_vm5 = vcmp.eq.s32.totalorder %v309_v4, %v5000_v9  ;;  %v10456_v15 = vmov 0  ;;  %v294_v27 = vadd.s32 1864, %v4985_v1 }
 0x17d   :  { %v10448_v59 = vsel %vm7870_vm13, 4294967295, %v10447_v59  ;;  %vm7877_vm9 = vmor %vm553_vm10, %vm815_vm6  ;;  %vm570_vm10 = vcmp.eq.s32.totalorder %v309_v4, %v7333_v35  ;;  %v10459_v4 = vmov 0 }
 0x17e   :  { %10449 = vst [vmem:[#allocation194_spill] sm:$0xff] %v10448_v59  ;;  %v10451_v2 = vsel %vm7877_vm9, 4294967295, %v10450_v2  ;;  %vm9734_vm1 = vmpackc.low %vm7877_vm9, %vm7870_vm13  ;;  %v293_v59 = vadd.s32 1856, %v4985_v1  ;;  %vm523_vm13 = vcmp.eq.s32.totalorder %v262_v63, %v7333_v35  ;;  %vm785_vm9 = vcmp.eq.s32.totalorder %v262_v63, %v5000_v9 }
 0x17f   :  { %10452 = vst [vmem:[#allocation195_spill] sm:$0xff] %v10451_v2  ;;  %4415 = vmatpush3.bf16.msk.msra.mxu1 %vm9734_vm1, %v9932_v51  ;;  %vm7894_vm6 = vmor %vm538_vm0, %vm800_vm12  ;;  %vm784_vm12 = vcmp.eq.s32.totalorder %v261_v7, %v5000_v9  ;;  %v10462_v2 = vmov 0  ;;  %v280_v63 = vadd.s32 1752, %v4985_v1 }
 0x180   :  { %v10454_v19 = vsel %vm7894_vm6, 4294967295, %v10453_v19  ;;  %vm7901_vm15 = vmor %vm539_vm2, %vm801_vm11  ;;  %vm522_vm2 = vcmp.eq.s32.totalorder %v261_v7, %v7333_v35  ;;  %v10465_v7 = vmov 0 }
 0x181   :  { %10455 = vst [vmem:[#allocation196_spill] sm:$0xff] %v10454_v19  ;;  %v10457_v15 = vsel %vm7901_vm15, 4294967295, %v10456_v15  ;;  %vm9739_vm0 = vmpackc.low %vm7901_vm15, %vm7894_vm6  ;;  %v279_v19 = vadd.s32 1744, %v4985_v1  ;;  %vm555_vm6 = vcmp.eq.s32.totalorder %v294_v27, %v7333_v35  ;;  %vm817_vm15 = vcmp.eq.s32.totalorder %v294_v27, %v5000_v9 }
 0x182   :  { %10458 = vst [vmem:[#allocation197_spill] sm:$0xff] %v10457_v15  ;;  %4376 = vmatprep.subr.msk.bf16.mxu0 %vm9739_vm0, %v9932_v51  ;;  %vm7918_vm11 = vmor %vm570_vm10, %vm832_vm5  ;;  %vm816_vm5 = vcmp.eq.s32.totalorder %v293_v59, %v5000_v9  ;;  %v10468_v15 = vmov 0  ;;  %v312_v27 = vadd.s32 2008, %v4985_v1 }
 0x183   :  { %v10460_v4 = vsel %vm7918_vm11, 4294967295, %v10459_v4  ;;  %vm7925_vm1 = vmor %vm571_vm3, %vm833_vm8  ;;  %vm554_vm3 = vcmp.eq.s32.totalorder %v293_v59, %v7333_v35  ;;  %v10471_v59 = vmov 0 }
 0x184   :  { %10461 = vst [vmem:[#allocation198_spill] sm:$0xff] %v10460_v4  ;;  %v10463_v2 = vsel %vm7925_vm1, 4294967295, %v10462_v2  ;;  %vm9744_vm10 = vmpackc.low %vm7925_vm1, %vm7918_vm11  ;;  %v311_v4 = vadd.s32 2000, %v4985_v1  ;;  %vm541_vm11 = vcmp.eq.s32.totalorder %v280_v63, %v7333_v35  ;;  %vm803_vm1 = vcmp.eq.s32.totalorder %v280_v63, %v5000_v9 }
 0x185   :  { %10464 = vst [vmem:[#allocation199_spill] sm:$0xff] %v10463_v2  ;;  %4416 = vmatprep.subr.msk.bf16.mxu1 %vm9744_vm10, %v9932_v51  ;;  %vm7942_vm8 = vmor %vm522_vm2, %vm784_vm12  ;;  %vm802_vm12 = vcmp.eq.s32.totalorder %v279_v19, %v5000_v9  ;;  %v10474_v2 = vmov 0  ;;  %v264_v63 = vadd.s32 1624, %v4985_v1 }
 0x186   :  { %v10466_v7 = vsel %vm7942_vm8, 4294967295, %v10465_v7  ;;  %vm7949_vm0 = vmor %vm523_vm13, %vm785_vm9  ;;  %vm540_vm13 = vcmp.eq.s32.totalorder %v279_v19, %v7333_v35  ;;  %v10477_v19 = vmov 0 }
 0x187   :  { %10467 = vst [vmem:[#allocation200_spill] sm:$0xff] %v10466_v7  ;;  %v10469_v15 = vsel %vm7949_vm0, 4294967295, %v10468_v15  ;;  %vm9749_vm2 = vmpackc.low %vm7949_vm0, %vm7942_vm8  ;;  %v263_v7 = vadd.s32 1616, %v4985_v1  ;;  %vm573_vm8 = vcmp.eq.s32.totalorder %v312_v27, %v7333_v35  ;;  %vm835_vm0 = vcmp.eq.s32.totalorder %v312_v27, %v5000_v9 }
 0x188   :  { %10470 = vst [vmem:[#allocation201_spill] sm:$0xff] %v10469_v15  ;;  %4377 = vmatpush3.bf16.msk.msra.mxu0 %vm9749_vm2, %v9932_v51  ;;  %vm7966_vm9 = vmor %vm554_vm3, %vm816_vm5  ;;  %vm834_vm5 = vcmp.eq.s32.totalorder %v311_v4, %v5000_v9  ;;  %v10480_v15 = vmov 0  ;;  %v296_v27 = vadd.s32 1880, %v4985_v1 }
 0x189   :  { %v10472_v59 = vsel %vm7966_vm9, 4294967295, %v10471_v59  ;;  %vm7973_vm10 = vmor %vm555_vm6, %vm817_vm15  ;;  %vm572_vm6 = vcmp.eq.s32.totalorder %v311_v4, %v7333_v35  ;;  %v10483_v4 = vmov 0 }
 0x18a   :  { %10473 = vst [vmem:[#allocation202_spill] sm:$0xff] %v10472_v59  ;;  %v10475_v2 = vsel %vm7973_vm10, 4294967295, %v10474_v2  ;;  %vm9754_vm3 = vmpackc.low %vm7973_vm10, %vm7966_vm9  ;;  %v295_v59 = vadd.s32 1872, %v4985_v1  ;;  %vm525_vm9 = vcmp.eq.s32.totalorder %v264_v63, %v7333_v35  ;;  %vm787_vm10 = vcmp.eq.s32.totalorder %v264_v63, %v5000_v9 }
 0x18b   :  { %10476 = vst [vmem:[#allocation203_spill] sm:$0xff] %v10475_v2  ;;  %4417 = vmatpush3.bf16.msk.msra.mxu1 %vm9754_vm3, %v9932_v51  ;;  %vm7990_vm15 = vmor %vm540_vm13, %vm802_vm12  ;;  %vm786_vm12 = vcmp.eq.s32.totalorder %v263_v7, %v5000_v9  ;;  %v10486_v2 = vmov 0  ;;  %v282_v63 = vadd.s32 1768, %v4985_v1 }
 0x18c   :  { %v10478_v19 = vsel %vm7990_vm15, 4294967295, %v10477_v19  ;;  %vm7997_vm2 = vmor %vm541_vm11, %vm803_vm1  ;;  %vm524_vm11 = vcmp.eq.s32.totalorder %v263_v7, %v7333_v35  ;;  %v10489_v7 = vmov 0 }
 0x18d   :  { %10479 = vst [vmem:[#allocation204_spill] sm:$0xff] %v10478_v19  ;;  %v10481_v15 = vsel %vm7997_vm2, 4294967295, %v10480_v15  ;;  %vm9759_vm13 = vmpackc.low %vm7997_vm2, %vm7990_vm15  ;;  %v281_v19 = vadd.s32 1760, %v4985_v1  ;;  %vm557_vm15 = vcmp.eq.s32.totalorder %v296_v27, %v7333_v35  ;;  %vm819_vm2 = vcmp.eq.s32.totalorder %v296_v27, %v5000_v9 }
 0x18e   :  { %10482 = vst [vmem:[#allocation205_spill] sm:$0xff] %v10481_v15  ;;  %4378 = vmatprep.subr.msk.bf16.mxu0 %vm9759_vm13, %v9932_v51  ;;  %vm8014_vm1 = vmor %vm572_vm6, %vm834_vm5  ;;  %vm818_vm5 = vcmp.eq.s32.totalorder %v295_v59, %v5000_v9  ;;  %v10492_v15 = vmov 0  ;;  %v314_v27 = vadd.s32 2024, %v4985_v1 }
 0x18f   :  { %v10484_v4 = vsel %vm8014_vm1, 4294967295, %v10483_v4  ;;  %vm8021_vm3 = vmor %vm573_vm8, %vm835_vm0  ;;  %vm556_vm8 = vcmp.eq.s32.totalorder %v295_v59, %v7333_v35  ;;  %v10495_v59 = vmov 0 }
 0x190   :  { %10485 = vst [vmem:[#allocation206_spill] sm:$0xff] %v10484_v4  ;;  %v10487_v2 = vsel %vm8021_vm3, 4294967295, %v10486_v2  ;;  %vm9764_vm6 = vmpackc.low %vm8021_vm3, %vm8014_vm1  ;;  %v313_v4 = vadd.s32 2016, %v4985_v1  ;;  %vm543_vm1 = vcmp.eq.s32.totalorder %v282_v63, %v7333_v35  ;;  %vm805_vm3 = vcmp.eq.s32.totalorder %v282_v63, %v5000_v9 }
 0x191   :  { %10488 = vst [vmem:[#allocation207_spill] sm:$0xff] %v10487_v2  ;;  %4418 = vmatprep.subr.msk.bf16.mxu1 %vm9764_vm6, %v9932_v51  ;;  %vm8038_vm0 = vmor %vm524_vm11, %vm786_vm12  ;;  %vm804_vm12 = vcmp.eq.s32.totalorder %v281_v19, %v5000_v9  ;;  %v10498_v2 = vmov 0  ;;  %v266_v63 = vadd.s32 1640, %v4985_v1 }
 0x192   :  { %v10490_v7 = vsel %vm8038_vm0, 4294967295, %v10489_v7  ;;  %vm8045_vm13 = vmor %vm525_vm9, %vm787_vm10  ;;  %vm542_vm9 = vcmp.eq.s32.totalorder %v281_v19, %v7333_v35  ;;  %v10501_v19 = vmov 0 }
 0x193   :  { %10491 = vst [vmem:[#allocation208_spill] sm:$0xff] %v10490_v7  ;;  %v10493_v15 = vsel %vm8045_vm13, 4294967295, %v10492_v15  ;;  %vm9769_vm11 = vmpackc.low %vm8045_vm13, %vm8038_vm0  ;;  %v265_v7 = vadd.s32 1632, %v4985_v1  ;;  %vm575_vm0 = vcmp.eq.s32.totalorder %v314_v27, %v7333_v35  ;;  %vm837_vm13 = vcmp.eq.s32.totalorder %v314_v27, %v5000_v9 }
 0x194   :  { %10494 = vst [vmem:[#allocation209_spill] sm:$0xff] %v10493_v15  ;;  %4379 = vmatpush3.bf16.msk.msra.mxu0 %vm9769_vm11, %v9932_v51  ;;  %vm8062_vm10 = vmor %vm556_vm8, %vm818_vm5  ;;  %vm836_vm5 = vcmp.eq.s32.totalorder %v313_v4, %v5000_v9  ;;  %v10504_v15 = vmov 0  ;;  %v298_v27 = vadd.s32 1896, %v4985_v1 }
 0x195   :  { %v10496_v59 = vsel %vm8062_vm10, 4294967295, %v10495_v59  ;;  %vm8069_vm6 = vmor %vm557_vm15, %vm819_vm2  ;;  %vm574_vm15 = vcmp.eq.s32.totalorder %v313_v4, %v7333_v35  ;;  %v10507_v4 = vmov 0 }
 0x196   :  { %10497 = vst [vmem:[#allocation210_spill] sm:$0xff] %v10496_v59  ;;  %v10499_v2 = vsel %vm8069_vm6, 4294967295, %v10498_v2  ;;  %vm9774_vm8 = vmpackc.low %vm8069_vm6, %vm8062_vm10  ;;  %v297_v59 = vadd.s32 1888, %v4985_v1  ;;  %vm527_vm10 = vcmp.eq.s32.totalorder %v266_v63, %v7333_v35  ;;  %vm789_vm6 = vcmp.eq.s32.totalorder %v266_v63, %v5000_v9 }
 0x197   :  { %10500 = vst [vmem:[#allocation211_spill] sm:$0xff] %v10499_v2  ;;  %4419 = vmatpush3.bf16.msk.msra.mxu1 %vm9774_vm8, %v9932_v51  ;;  %vm8086_vm2 = vmor %vm542_vm9, %vm804_vm12  ;;  %vm788_vm12 = vcmp.eq.s32.totalorder %v265_v7, %v5000_v9  ;;  %v10510_v2 = vmov 0  ;;  %v284_v63 = vadd.s32 1784, %v4985_v1 }
 0x198   :  { %v10502_v19 = vsel %vm8086_vm2, 4294967295, %v10501_v19  ;;  %vm8093_vm11 = vmor %vm543_vm1, %vm805_vm3  ;;  %vm526_vm1 = vcmp.eq.s32.totalorder %v265_v7, %v7333_v35  ;;  %v10513_v7 = vmov 0 }
 0x199   :  { %10503 = vst [vmem:[#allocation212_spill] sm:$0xff] %v10502_v19  ;;  %v10505_v15 = vsel %vm8093_vm11, 4294967295, %v10504_v15  ;;  %vm9779_vm9 = vmpackc.low %vm8093_vm11, %vm8086_vm2  ;;  %v283_v19 = vadd.s32 1776, %v4985_v1  ;;  %vm559_vm2 = vcmp.eq.s32.totalorder %v298_v27, %v7333_v35  ;;  %vm821_vm11 = vcmp.eq.s32.totalorder %v298_v27, %v5000_v9 }
 0x19a   :  { %10506 = vst [vmem:[#allocation213_spill] sm:$0xff] %v10505_v15  ;;  %4380 = vmatprep.subr.msk.bf16.mxu0 %vm9779_vm9, %v9932_v51  ;;  %vm8110_vm3 = vmor %vm574_vm15, %vm836_vm5  ;;  %vm820_vm5 = vcmp.eq.s32.totalorder %v297_v59, %v5000_v9  ;;  %v10516_v15 = vmov 0  ;;  %v316_v27 = vadd.s32 2040, %v4985_v1 }
 0x19b   :  { %v10508_v4 = vsel %vm8110_vm3, 4294967295, %v10507_v4  ;;  %vm8117_vm8 = vmor %vm575_vm0, %vm837_vm13  ;;  %vm558_vm0 = vcmp.eq.s32.totalorder %v297_v59, %v7333_v35  ;;  %v10519_v59 = vmov 0 }
 0x19c   :  { %10509 = vst [vmem:[#allocation214_spill] sm:$0xff] %v10508_v4  ;;  %v10511_v2 = vsel %vm8117_vm8, 4294967295, %v10510_v2  ;;  %vm9784_vm15 = vmpackc.low %vm8117_vm8, %vm8110_vm3  ;;  %v315_v4 = vadd.s32 2032, %v4985_v1  ;;  %vm545_vm3 = vcmp.eq.s32.totalorder %v284_v63, %v7333_v35  ;;  %vm807_vm8 = vcmp.eq.s32.totalorder %v284_v63, %v5000_v9 }
 0x19d   :  { %10512 = vst [vmem:[#allocation215_spill] sm:$0xff] %v10511_v2  ;;  %4420 = vmatprep.subr.msk.bf16.mxu1 %vm9784_vm15, %v9932_v51  ;;  %vm8134_vm13 = vmor %vm526_vm1, %vm788_vm12  ;;  %vm806_vm12 = vcmp.eq.s32.totalorder %v283_v19, %v5000_v9  ;;  %v10522_v2 = vmov 0  ;;  %v268_v63 = vadd.s32 1656, %v4985_v1 }
 0x19e   :  { %v10514_v7 = vsel %vm8134_vm13, 4294967295, %v10513_v7  ;;  %vm8141_vm9 = vmor %vm527_vm10, %vm789_vm6  ;;  %vm544_vm10 = vcmp.eq.s32.totalorder %v283_v19, %v7333_v35  ;;  %v10525_v19 = vmov 0 }
 0x19f   :  { %10515 = vst [vmem:[#allocation216_spill] sm:$0xff] %v10514_v7  ;;  %v10517_v15 = vsel %vm8141_vm9, 4294967295, %v10516_v15  ;;  %vm9791_vm1 = vmpackc.low %vm8141_vm9, %vm8134_vm13  ;;  %v267_v7 = vadd.s32 1648, %v4985_v1  ;;  %vm577_vm13 = vcmp.eq.s32.totalorder %v316_v27, %v7333_v35 }
 0x1a0   :  { %10518 = vst [vmem:[#allocation217_spill] sm:$0xff] %v10517_v15  ;;  %4381 = vmatpush3.bf16.msk.msra.mxu0 %vm9791_vm1, %v9932_v51  ;;  %vm8158_vm6 = vmor %vm558_vm0, %vm820_vm5  ;;  %vm838_vm5 = vcmp.eq.s32.totalorder %v315_v4, %v5000_v9  ;;  %v4144_v15 = vpop.f32.mrb[0].mxu0 }
 0x1a1   :  { %v10520_v59 = vsel %vm8158_vm6, 4294967295, %v10519_v59  ;;  %vm8165_vm15 = vmor %vm559_vm2, %vm821_vm11  ;;  %vm576_vm2 = vcmp.eq.s32.totalorder %v315_v4, %v7333_v35 }
 0x1a2   :  { %10521 = vst [vmem:[#allocation218_spill] sm:$0xff] %v10520_v59  ;;  %v10523_v2 = vsel %vm8165_vm15, 4294967295, %v10522_v2  ;;  %vm9794_vm0 = vmpackc.low %vm8165_vm15, %vm8158_vm6  ;;  %v4145_v59 = vpop.f32.mrb[1].mxu0  ;;  %vm791_vm15 = vcmp.eq.s32.totalorder %v268_v63, %v5000_v9 }
 0x1a3   :  { %10524 = vst [vmem:[#allocation219_spill] sm:$0xff] %v10523_v2  ;;  %4421 = vmatpush3.bf16.msk.msra.mxu1 %vm9794_vm0, %v9932_v51  ;;  %vm8182_vm11 = vmor %vm544_vm10, %vm806_vm12  ;;  %vm839_vm0 = vcmp.eq.s32.totalorder %v316_v27, %v5000_v9  ;;  %v4185_v2 = vpop.f32.mrb[1].mxu1  ;;  %v4146_v6 = vadd.f32 %v4145_v59, %v4144_v15  ;;  %v4147_v5 = vpop.f32.mrb[2].mxu0  ;;  %vm790_vm12 = vcmp.eq.s32.totalorder %v267_v7, %v5000_v9  ;;  %v10535_v27 = vmov 0 }
 0x1a4   :  { %v10526_v19 = vsel %vm8182_vm11, 4294967295, %v10525_v19  ;;  %vm8189_vm1 = vmor %vm545_vm3, %vm807_vm8  ;;  %v4186_v31 = vadd.f32 %v4185_v2, %v4184_v43  ;;  %v4187_v57 = vpop.f32.mrb[2].mxu1  ;;  %vm528_vm3 = vcmp.eq.s32.totalorder %v267_v7, %v7333_v35  ;;  %v300_v2 = vadd.s32 1912, %v4985_v1  ;;  %v4148_v4 = vpop.f32.mrb[3].mxu0 }
 0x1a5   :  { %v10528_v39 = vsel %vm8189_vm1, 4294967295, %v10527_v39  ;;  %vm9804_vm10 = vmpackc.low %vm8189_vm1, %vm8182_vm11  ;;  %v10532_v43 = vmov 0  ;;  %v4188_v59 = vpop.f32.mrb[3].mxu1  ;;  %v4149_v1 = vadd.f32 %v4148_v4, %v4147_v5  ;;  %v1574_v5 = vld [vmem:[#allocation6 + $0xf0] sm:$0xff] }
 0x1a6   :  { %4382 = vmatprep.subr.msk.bf16.mxu0 %vm9804_vm10, %v9932_v51  ;;  %vm8210_vm8 = vmor %vm576_vm2, %vm838_vm5  ;;  %vm529_vm10 = vcmp.eq.s32.totalorder %v268_v63, %v7333_v35  ;;  %v8225_v15 = vadd.f32 %v4186_v31, %v4146_v6  ;;  %v4189_v7 = vadd.f32 %v4188_v59, %v4187_v57  ;;  %vm822_vm5 = vcmp.eq.s32.totalorder %v299_v61, %v5000_v9  ;;  %v1566_v57 = vld [vmem:[#allocation6 + $0xb0] sm:$0xff]  ;;  %v4150_v63 = vpop.f32.mrb[4].mxu0  ;;  %v4190_v4 = vpop.f32.mrb[4].mxu1 }
 0x1a7   :  { %v10530_v14 = vsel %vm8210_vm8, 4294967295, %v10529_v14  ;;  %vm8219_vm6 = vmor %vm577_vm13, %vm839_vm0  ;;  %vm560_vm0 = vcmp.eq.s32.totalorder %v299_v61, %v7333_v35  ;;  %v10538_v31 = vmov 0  ;;  %vm561_vm1 = vcmp.eq.s32.totalorder %v300_v2, %v7333_v35  ;;  %v1567_v35 = vld [vmem:[#allocation6 + $0xb8] sm:$0xff]  ;;  %v4191_v59 = vpop.f32.mrb[5].mxu1 }
 0x1a8   :  { %10531 = vst [vmem:[#allocation220_spill] sm:$0xff] %v10530_v14  ;;  %v10533_v43 = vsel %vm8219_vm6, 4294967295, %v10532_v43  ;;  %vm3802_vm2 = vmpackc.low %vm8219_vm6, %vm8210_vm8  ;;  %vm823_vm9 = vcmp.eq.s32.totalorder %v300_v2, %v5000_v9  ;;  %v8249_v6 = vadd.f32 %v4189_v7, %v4149_v1  ;;  %v1575_v61 = vld [vmem:[#allocation6 + $0xf8] sm:$0xff]  ;;  %v4151_v2 = vpop.f32.mrb[5].mxu0  ;;  %v3513_v7 = vcombine.high %v1566_v57, %v1574_v5 }
 0x1a9   :  { %10534 = vst [vmem:[#allocation221_spill] sm:$0xff] %v10533_v43  ;;  %4422 = vmatprep.subr.msk.bf16.mxu1 %vm3802_vm2, %v9932_v51  ;;  %vm8237_vm13 = vmor %vm528_vm3, %vm790_vm12  ;;  %v4153_v14 = vpop.f32.mrb[6].mxu0  ;;  %v4193_v43 = vpop.f32.mrb[6].mxu1  ;;  %v3515_v13 = vcombine.high %v1567_v35, %v1575_v61 }
 0x1aa   :  { %v10536_v27 = vsel %vm8237_vm13, 4294967295, %v10535_v27  ;;  %vm8243_vm11 = vmor %vm529_vm10, %vm791_vm15 }
 0x1ab   :  { %10537 = vst [vmem:[#allocation222_spill] sm:$0xff] %v10536_v27  ;;  %v10539_v31 = vsel %vm8243_vm11, 4294967295, %v10538_v31  ;;  %vm9814_vm3 = vmpackc.low %vm8243_vm11, %vm8237_vm13  ;;  %v4152_v27 = vadd.f32 %v4151_v2, %v4150_v63  ;;  %v4194_v2 = vpop.f32.mrb[7].mxu1 }
 0x1ac   :  { %10540 = vst [vmem:[#allocation223_spill] sm:$0xff] %v10539_v31  ;;  %4383 = vmatpush3.bf16.msk.msra.mxu0 %vm9814_vm3, %v9932_v51  ;;  %vm8261_vm15 = vmor %vm560_vm0, %vm822_vm5  ;;  %v4192_v31 = vadd.f32 %v4191_v59, %v4190_v4  ;;  %v4154_v4 = vpop.f32.mrb[7].mxu0  ;;  %vm10550_vm0 = vnez %v9824_v20  ;;  %v4195_v60 = vadd.f32 %v4194_v2, %v4193_v43 }
 0x1ad   :  { %vm8265_vm10 = vmor %vm561_vm1, %vm823_vm9  ;;  %vm10549_vm1 = vnez %v9826_v22  ;;  %v4155_v47 = vadd.f32 %v4154_v4, %v4153_v14  ;;  %v1590_v22 = vld [vmem:[#allocation6 + $0x170] sm:$0xff]  ;;  %v4156_v20 = vpop.f32.mrb[8].mxu0 }
 0x1ae   :  { %vm10545_vm12 = vmpackc.low %vm5013_vm7, %vm5006_vm4  ;;  %v8288_v63 = vadd.f32 %v4192_v31, %v4152_v27  ;;  %vm10547_vm4 = vnez %v9820_v16  ;;  %v10555_v16 = vcombine.low %v7204_v23, %v7206_v55  ;;  %v4196_v31 = vpop.f32.mrb[8].mxu1 }
 0x1af   :  { %4448 = vmatprep.subr.msk.bf16.mxu0 %vm10545_vm12, %v9932_v51  ;;  %vm9813_vm9 = vmpackc.low %vm8265_vm10, %vm8261_vm15  ;;  %2351 = vmatmul.mubr.bf16.vlgmr.msra.gmra.mrb[48].mxu0 %v10546_v11  ;;  %vm10552_vm12 = vnez %v9834_v30  ;;  %v8311_v27 = vadd.f32 %v4195_v60, %v4155_v47  ;;  %v4157_v30 = vpop.f32.mrb[9].mxu0  ;;  %v4197_v14 = vpop.f32.mrb[9].mxu1 }
 0x1b0   :  { %4423 = vmatpush3.bf16.msk.msra.mxu1 %vm9813_vm9, %v9932_v51  ;;  %vm10548_vm7 = vmpackc.low %vm5039_vm14, %vm10547_vm4  ;;  %vm10553_vm9 = vnez %v9832_v28  ;;  %2358 = vmatprep.mubr.bf16.mxu0 %v3513_v7  ;;  %vm10556_vm14 = vnez %v9830_v26  ;;  %vm10557_vm4 = vnez %v9828_v24  ;;  %v3512_v28 = vcombine.low %v1566_v57, %v1574_v5  ;;  %v1583_v24 = vld [vmem:[#allocation6 + $0x138] sm:$0xff]  ;;  %v4159_v43 = vpop.f32.mrb[10].mxu0  ;;  %v4199_v57 = vpop.f32.mrb[10].mxu1 }
 0x1b1   :  { %4488 = vmatprep.subr.msk.bf16.mxu1 %vm10548_vm7, %v9932_v51  ;;  %vm10551_vm5 = vmpackc.low %vm10549_vm1, %vm10550_vm0  ;;  %vm10562_vm0 = vnez %v9842_v38  ;;  %v1591_v26 = vld [vmem:[#allocation6 + $0x178] sm:$0xff]  ;;  %v4158_v23 = vadd.f32 %v4157_v30, %v4156_v20  ;;  %v4198_v55 = vadd.f32 %v4197_v14, %v4196_v31  ;;  %v4200_v38 = vpop.f32.mrb[11].mxu1  ;;  %v3514_v5 = vcombine.low %v1567_v35, %v1575_v61  ;;  %v1481_v20 = vld [vmem:[#allocation3 + $0x8] sm:$0xff] }
 0x1b2   :  { %4449 = vmatpush3.bf16.msk.msra.mxu0 %vm10551_vm5, %v9932_v51  ;;  %vm10554_vm3 = vmpackc.low %vm10552_vm12, %vm10553_vm9  ;;  %vm10560_vm9 = vnez %v9836_v32  ;;  %vm10563_vm5 = vnez %v9840_v36  ;;  %v3529_v32 = vcombine.high %v1582_v18, %v1590_v22  ;;  %v4201_v7 = vadd.f32 %v4200_v38, %v4199_v57  ;;  %v1489_v31 = vld [vmem:[#allocation3 + $0x48] sm:$0xff]  ;;  %v10620_v14 = vld [vmem:[#allocation22_spill] sm:$0xff] }
 0x1b3   :  { %4450 = vmatprep.subr.msk.bf16.mxu0 %vm10554_vm3, %v9932_v51  ;;  %2416 = vmatmul.mubr.bf16.vlgmr.msra.gmra.mrb[48].mxu1 %v10555_v16  ;;  %vm10558_vm7 = vmpackc.low %vm10556_vm14, %vm10557_vm4  ;;  %vm10559_vm3 = vnez %v9838_v34  ;;  %vm10565_vm14 = vnez %v9850_v46  ;;  %vm10566_vm4 = vnez %v9848_v44  ;;  %v4160_v34 = vpop.f32.mrb[11].mxu0  ;;  %v8337_v36 = vadd.f32 %v4198_v55, %v4158_v23  ;;  %v1606_v44 = vld [vmem:[#allocation6 + $0x1f0] sm:$0xff]  ;;  %v10612_v16 = vld [vmem:[#allocation15_spill] sm:$0xff] }
 0x1b4   :  { %4489 = vmatpush3.bf16.msk.msra.mxu1 %vm10558_vm7, %v9932_v51  ;;  %2423 = vmatprep.mubr.bf16.mxu1 %v3515_v13  ;;  %vm10561_vm1 = vmpackc.low %vm10559_vm3, %vm10560_vm9  ;;  %v4161_v59 = vadd.f32 %v4160_v34, %v4159_v43  ;;  %vm10568_vm3 = vnez %v9846_v42  ;;  %vm10569_vm9 = vnez %v9844_v40  ;;  %v3531_v46 = vcombine.high %v1583_v24, %v1591_v26  ;;  %v1598_v40 = vld [vmem:[#allocation6 + $0x1b0] sm:$0xff]  ;;  %v10625_v38 = vld [vmem:[#allocation20_spill] sm:$0xff] }
 0x1b5   :  { %4490 = vmatprep.subr.msk.bf16.mxu1 %vm10561_vm1, %v9932_v51  ;;  %vm10564_vm12 = vmpackc.low %vm10562_vm0, %vm10563_vm5  ;;  %vm10571_vm0 = vnez %v9854_v50  ;;  %vm10572_vm5 = vnez %v9852_v48  ;;  %v4162_v48 = vpop.f32.mrb[12].mxu0  ;;  %v4202_v50 = vpop.f32.mrb[12].mxu1  ;;  %v3530_v13 = vcombine.low %v1583_v24, %v1591_v26  ;;  %v3544_v47 = vcombine.low %v1598_v40, %v1606_v44  ;;  %v10622_v24 = vld [vmem:[#allocation21_spill] sm:$0xff] }
 0x1b6   :  { %4451 = vmatpush3.bf16.msk.msra.mxu0 %vm10564_vm12, %v9932_v51  ;;  %vm10567_vm7 = vmpackc.low %vm10565_vm14, %vm10566_vm4  ;;  %vm10574_vm14 = vnez %v9858_v54  ;;  %vm10575_vm4 = vnez %v9856_v52  ;;  %v8357_v42 = vadd.f32 %v4201_v7, %v4161_v59  ;;  %v3528_v52 = vcombine.low %v1582_v18, %v1590_v22  ;;  %v4163_v54 = vpop.f32.mrb[13].mxu0  ;;  %v10615_v18 = vld [vmem:[#allocation18_spill] sm:$0xff]  ;;  %v10617_v22 = vld [vmem:[#allocation17_spill] sm:$0xff] }
 0x1b7   :  { %4452 = vmatprep.subr.msk.bf16.mxu0 %vm10567_vm7, %v9932_v51  ;;  %vm10570_vm1 = vmpackc.low %vm10568_vm3, %vm10569_vm9  ;;  %2359 = vmatmul.mubr.bf16.gmra.mrb[52].mxu0 %v3512_v28  ;;  %vm10577_vm3 = vnez %v9866_v3  ;;  %vm10578_vm9 = vnez %v9864_v0  ;;  %v4203_v3 = vpop.f32.mrb[13].mxu1  ;;  %v4164_v0 = vadd.f32 %v4163_v54, %v4162_v48  ;;  %v4165_v61 = vpop.f32.mrb[14].mxu0  ;;  %v3807_v59 = vcombine.high %v1481_v20, %v1489_v31  ;;  %v10637_v48 = vld [vmem:[#allocation25_spill] sm:$0xff]  ;;  %v10640_v54 = vld [vmem:[#allocation30_spill] sm:$0xff] }
 0x1b8   :  { %4491 = vmatpush3.bf16.msk.msra.mxu1 %vm10570_vm1, %v9932_v51  ;;  %vm10573_vm12 = vmpackc.low %vm10571_vm0, %vm10572_vm5  ;;  %2366 = vmatprep.mubr.bf16.mxu0 %v3529_v32  ;;  %vm10580_vm0 = vnez %v9862_v58  ;;  %vm10581_vm5 = vnez %v9860_v56  ;;  %v1599_v56 = vld [vmem:[#allocation6 + $0x1b8] sm:$0xff]  ;;  %v4204_v35 = vadd.f32 %v4203_v3, %v4202_v50  ;;  %v4205_v11 = vpop.f32.mrb[14].mxu1  ;;  %v10642_v3 = vld [vmem:[#allocation29_spill] sm:$0xff] }
 0x1b9   :  { %4492 = vmatprep.subr.msk.bf16.mxu1 %vm10573_vm12, %v9932_v51  ;;  %vm10576_vm7 = vmpackc.low %vm10574_vm14, %vm10575_vm4  ;;  %vm10583_vm14 = vnez %v9870_v12  ;;  %vm10584_vm4 = vnez %v9868_v8  ;;  %v1607_v58 = vld [vmem:[#allocation6 + $0x1f8] sm:$0xff]  ;;  %v3545_v8 = vcombine.high %v1598_v40, %v1606_v44  ;;  %v4166_v12 = vpop.f32.mrb[15].mxu0  ;;  %v10630_v40 = vld [vmem:[#allocation24_spill] sm:$0xff] }
 0x1ba   :  { %4453 = vmatpush3.bf16.msk.msra.mxu0 %vm10576_vm7, %v9932_v51  ;;  %vm10579_vm1 = vmpackc.low %vm10577_vm3, %vm10578_vm9  ;;  %vm10586_vm3 = vnez %v9874_v21  ;;  %vm10587_vm9 = vnez %v9872_v17  ;;  %v4206_v21 = vpop.f32.mrb[15].mxu1  ;;  %v8389_v17 = vadd.f32 %v4204_v35, %v4164_v0  ;;  %v4167_v4 = vadd.f32 %v4166_v12, %v4165_v61  ;;  %v10632_v44 = vld [vmem:[#allocation23_spill] sm:$0xff] }
 0x1bb   :  { %4454 = vmatprep.subr.msk.bf16.mxu0 %vm10579_vm1, %v9932_v51  ;;  %2424 = vmatmul.mubr.bf16.gmra.mrb[52].mxu1 %v3514_v5  ;;  %vm10582_vm12 = vmpackc.low %vm10580_vm0, %vm10581_vm5  ;;  %vm10589_vm0 = vnez %v9882_v37  ;;  %vm10590_vm5 = vnez %v9880_v33  ;;  %v4207_v2 = vadd.f32 %v4206_v21, %v4205_v11  ;;  %v3547_v37 = vcombine.high %v1599_v56, %v1607_v58  ;;  %v1480_v33 = vld [vmem:[#allocation3] sm:$0xff] }
 0x1bc   :  { %4493 = vmatpush3.bf16.msk.msra.mxu1 %vm10582_vm12, %v9932_v51  ;;  %2431 = vmatprep.mubr.bf16.mxu1 %v3531_v46  ;;  %vm10585_vm7 = vmpackc.low %vm10583_vm14, %vm10584_vm4  ;;  %vm10592_vm14 = vnez %v9878_v29  ;;  %vm10593_vm4 = vnez %v9876_v25  ;;  %v10602_v25 = vld [vmem:[#allocation14_spill] sm:$0xff]  ;;  %v3546_v43 = vcombine.low %v1599_v56, %v1607_v58  ;;  %v10627_v5 = vld [vmem:[#allocation19_spill] sm:$0xff] }
 0x1bd   :  { %4494 = vmatprep.subr.msk.bf16.mxu1 %vm10585_vm7, %v9932_v51  ;;  %vm10588_vm1 = vmpackc.low %vm10586_vm3, %vm10587_vm9  ;;  %vm10595_vm3 = vnez %v9886_v45  ;;  %vm10596_vm9 = vnez %v9884_v41  ;;  %v8409_v29 = vadd.f32 %v4207_v2, %v4167_v4  ;;  %v1488_v41 = vld [vmem:[#allocation3 + $0x40] sm:$0xff]  ;;  %v10655_v2 = vld [vmem:[#allocation34_spill] sm:$0xff] }
 0x1be   :  { %4455 = vmatpush3.bf16.msk.msra.mxu0 %vm10588_vm1, %v9932_v51  ;;  %vm10591_vm12 = vmpackc.low %vm10589_vm0, %vm10590_vm5  ;;  %vm10598_vm0 = vnez %v9890_v53  ;;  %vm10599_vm5 = vnez %v9888_v49  ;;  %v10605_v53 = vld [vmem:[#allocation13_spill] sm:$0xff]  ;;  %v10607_v49 = vld [vmem:[#allocation12_spill] sm:$0xff]  ;;  %v3805_v26 = vcombine.high %v1480_v33, %v1488_v41 }
 0x1bf   :  { %4456 = vmatprep.subr.msk.bf16.mxu0 %vm10591_vm12, %v9932_v51  ;;  %vm10594_vm7 = vmpackc.low %vm10592_vm14, %vm10593_vm4  ;;  %2367 = vmatmul.mubr.bf16.gmra.mrb[56].mxu0 %v3528_v52  ;;  %vm10601_vm14 = vnez %v9901_v10  ;;  %vm10603_vm4 = vnez %v10602_v25  ;;  %v10610_v10 = vld [vmem:[#allocation16_spill] sm:$0xff]  ;;  %v10652_v4 = vld [vmem:[#allocation31_spill] sm:$0xff] }
 0x1c0   :  { %4495 = vmatpush3.bf16.msk.msra.mxu1 %vm10594_vm7, %v9932_v51  ;;  %vm10597_vm1 = vmpackc.low %vm10595_vm3, %vm10596_vm9  ;;  %2374 = vmatprep.mubr.bf16.mxu0 %v3545_v8  ;;  %vm10606_vm3 = vnez %v10605_v53  ;;  %vm10608_vm9 = vnez %v10607_v49  ;;  %v1496_v0 = vld [vmem:[#allocation3 + $0x80] sm:$0xff]  ;;  %v3804_v8 = vcombine.low %v1480_v33, %v1488_v41  ;;  %v1497_v25 = vld [vmem:[#allocation3 + $0x88] sm:$0xff] }
 0x1c1   :  { %4496 = vmatprep.subr.msk.bf16.mxu1 %vm10597_vm1, %v9932_v51  ;;  %vm10600_vm12 = vmpackc.low %vm10598_vm0, %vm10599_vm5  ;;  %vm10611_vm0 = vnez %v10610_v10  ;;  %vm10613_vm5 = vnez %v10612_v16  ;;  %v1504_v35 = vld [vmem:[#allocation3 + $0xc0] sm:$0xff]  ;;  %v1505_v33 = vld [vmem:[#allocation3 + $0xc8] sm:$0xff]  ;;  %v3806_v16 = vcombine.low %v1481_v20, %v1489_v31 }
 0x1c2   :  { %4457 = vmatpush3.bf16.msk.msra.mxu0 %vm10600_vm12, %v9932_v51  ;;  %vm10604_vm7 = vmpackc.low %vm10601_vm14, %vm10603_vm4  ;;  %v4224_v45 = vpop.f32.mrb[16].mxu0  ;;  %vm10616_vm14 = vnez %v10615_v18  ;;  %vm10618_vm4 = vnez %v10617_v22  ;;  %v10645_v11 = vld [vmem:[#allocation28_spill] sm:$0xff]  ;;  %v10660_v53 = vld [vmem:[#allocation38_spill] sm:$0xff] }
 0x1c3   :  { %4458 = vmatprep.subr.msk.bf16.mxu0 %vm10604_vm7, %v9932_v51  ;;  %2432 = vmatmul.mubr.bf16.gmra.mrb[56].mxu1 %v3530_v13  ;;  %vm10609_vm1 = vmpackc.low %vm10606_vm3, %vm10608_vm9  ;;  %v4225_v60 = vpop.f32.mrb[17].mxu0  ;;  %vm10621_vm3 = vnez %v10620_v14  ;;  %vm10623_vm9 = vnez %v10622_v24  ;;  %v10650_v13 = vld [vmem:[#allocation32_spill] sm:$0xff]  ;;  %v10662_v49 = vld [vmem:[#allocation37_spill] sm:$0xff]  ;;  %v3823_v24 = vcombine.high %v1497_v25, %v1505_v33 }
 0x1c4   :  { %4497 = vmatpush3.bf16.msk.msra.mxu1 %vm10609_vm1, %v9932_v51  ;;  %2439 = vmatprep.mubr.bf16.mxu1 %v3547_v37  ;;  %vm10614_vm12 = vmpackc.low %vm10611_vm0, %vm10613_vm5  ;;  %v4226_v28 = vadd.f32 %v4225_v60, %v4224_v45  ;;  %v4227_v30 = vpop.f32.mrb[18].mxu0  ;;  %vm10626_vm0 = vnez %v10625_v38  ;;  %vm10628_vm5 = vnez %v10627_v5  ;;  %v10657_v37 = vld [vmem:[#allocation33_spill] sm:$0xff]  ;;  %v10667_v14 = vld [vmem:[#allocation35_spill] sm:$0xff] }
 0x1c5   :  { %4498 = vmatprep.subr.msk.bf16.mxu1 %vm10614_vm12, %v9932_v51  ;;  %vm10619_vm7 = vmpackc.low %vm10616_vm14, %vm10618_vm4  ;;  %v4264_v23 = vpop.f32.mrb[16].mxu1  ;;  %v4228_v55 = vpop.f32.mrb[19].mxu0  ;;  %vm10631_vm14 = vnez %v10630_v40  ;;  %vm10633_vm4 = vnez %v10632_v44  ;;  %v10677_v20 = vld [vmem:[#allocation41_spill] sm:$0xff]  ;;  %v10685_v40 = vld [vmem:[#allocation44_spill] sm:$0xff]  ;;  %v3820_v44 = vcombine.low %v1496_v0, %v1504_v35 }
 0x1c6   :  { %4459 = vmatpush3.bf16.msk.msra.mxu0 %vm10619_vm7, %v9932_v51  ;;  %vm10624_vm1 = vmpackc.low %vm10621_vm3, %vm10623_vm9  ;;  %v2093_v57 = vadd.f32 %v4226_v28, %v8225_v15  ;;  %v4265_v32 = vpop.f32.mrb[17].mxu1  ;;  %v4229_v34 = vadd.f32 %v4228_v55, %v4227_v30  ;;  %v10635_v15 = vld [vmem:[#allocation26_spill] sm:$0xff]  ;;  %vm10638_vm9 = vnez %v10637_v48  ;;  %v10665_v30 = vld [vmem:[#allocation36_spill] sm:$0xff] }
 0x1c7   :  { %4460 = vmatprep.subr.msk.bf16.mxu0 %vm10624_vm1, %v9932_v51  ;;  %vm10629_vm12 = vmpackc.low %vm10626_vm0, %vm10628_vm5  ;;  %2375 = vmatmul.mubr.bf16.gmra.mrb[60].mxu0 %v3544_v47  ;;  %v4266_v7 = vadd.f32 %v4265_v32, %v4264_v23  ;;  %v4267_v46 = vpop.f32.mrb[18].mxu1  ;;  %vm10636_vm3 = vnez %v10635_v15  ;;  %vm10641_vm0 = vnez %v10640_v54  ;;  %vm10643_vm5 = vnez %v10642_v3  ;;  %v10670_v55 = vld [vmem:[#allocation40_spill] sm:$0xff]  ;;  %v10680_v32 = vld [vmem:[#allocation46_spill] sm:$0xff] }
 0x1c8   :  { %4499 = vmatpush3.bf16.msk.msra.mxu1 %vm10629_vm12, %v9932_v51  ;;  %vm10634_vm7 = vmpackc.low %vm10631_vm14, %vm10633_vm4  ;;  %v2096_v50 = vadd.f32 %v4229_v34, %v8249_v6  ;;  %v4268_v52 = vpop.f32.mrb[19].mxu1  ;;  %2800 = vmatprep.mubr.bf16.mxu0 %v3805_v26  ;;  %vm10646_vm14 = vnez %v10645_v11  ;;  %v10647_v6 = vld [vmem:[#allocation27_spill] sm:$0xff]  ;;  %v3821_v47 = vcombine.high %v1496_v0, %v1504_v35  ;;  %v10682_v34 = vld [vmem:[#allocation45_spill] sm:$0xff] }
 0x1c9   :  { %4500 = vmatprep.subr.msk.bf16.mxu1 %vm10634_vm7, %v9932_v51  ;;  %vm10639_vm1 = vmpackc.low %vm10636_vm3, %vm10638_vm9  ;;  %v8467_v56 = vadd.f32 %v4266_v7, %v2093_v57  ;;  %v4269_v58 = vadd.f32 %v4268_v52, %v4267_v46  ;;  %vm10648_vm4 = vnez %v10647_v6  ;;  %vm10651_vm3 = vnez %v10650_v13  ;;  %v1520_v7 = vld [vmem:[#allocation3 + $0x140] sm:$0xff]  ;;  %v10695_v54 = vld [vmem:[#allocation50_spill] sm:$0xff] }
 0x1ca   :  { %4461 = vmatpush3.bf16.msk.msra.mxu0 %vm10639_vm1, %v9932_v51  ;;  %vm10644_vm12 = vmpackc.low %vm10641_vm0, %vm10643_vm5  ;;  %v4230_v61 = vpop.f32.mrb[20].mxu0  ;;  %vm10653_vm9 = vnez %v10652_v4  ;;  %vm10656_vm0 = vnez %v10655_v2  ;;  %vm10658_vm5 = vnez %v10657_v37  ;;  %v10692_v52 = vld [vmem:[#allocation47_spill] sm:$0xff]  ;;  %v10697_v3 = vld [vmem:[#allocation49_spill] sm:$0xff]  ;;  %v3822_v4 = vcombine.low %v1497_v25, %v1505_v33 }
 0x1cb   :  { %4462 = vmatprep.subr.msk.bf16.mxu0 %vm10644_vm12, %v9932_v51  ;;  %2440 = vmatmul.mubr.bf16.gmra.mrb[60].mxu1 %v3546_v43  ;;  %vm10649_vm7 = vmpackc.low %vm10646_vm14, %vm10648_vm4  ;;  %v8475_v12 = vadd.f32 %v4269_v58, %v2096_v50  ;;  %v4231_v21 = vpop.f32.mrb[21].mxu0  ;;  %vm10661_vm14 = vnez %v10660_v53  ;;  %vm10663_vm4 = vnez %v10662_v49  ;;  %v10672_v43 = vld [vmem:[#allocation39_spill] sm:$0xff]  ;;  %v10690_v50 = vld [vmem:[#allocation48_spill] sm:$0xff] }
 0x1cc   :  { %4501 = vmatpush3.bf16.msk.msra.mxu1 %vm10649_vm7, %v9932_v51  ;;  %2865 = vmatprep.mubr.bf16.mxu1 %v3807_v59  ;;  %vm10654_vm1 = vmpackc.low %vm10651_vm3, %vm10653_vm9  ;;  %v4232_v41 = vadd.f32 %v4231_v21, %v4230_v61  ;;  %v4233_v45 = vpop.f32.mrb[22].mxu0  ;;  %vm10666_vm3 = vnez %v10665_v30  ;;  %vm10668_vm9 = vnez %v10667_v14  ;;  %v1512_v59 = vld [vmem:[#allocation3 + $0x100] sm:$0xff]  ;;  %v1513_v58 = vld [vmem:[#allocation3 + $0x108] sm:$0xff] }
 0x1cd   :  { %4502 = vmatprep.subr.msk.bf16.mxu1 %vm10654_vm1, %v9932_v51  ;;  %vm10659_vm12 = vmpackc.low %vm10656_vm0, %vm10658_vm5  ;;  %v4270_v60 = vpop.f32.mrb[20].mxu1  ;;  %v4234_v10 = vpop.f32.mrb[23].mxu0  ;;  %vm10671_vm0 = vnez %v10670_v55  ;;  %vm10673_vm5 = vnez %v10672_v43  ;;  %v1521_v61 = vld [vmem:[#allocation3 + $0x148] sm:$0xff]  ;;  %v10700_v11 = vld [vmem:[#allocation54_spill] sm:$0xff]  ;;  %v3836_v43 = vcombine.low %v1512_v59, %v1520_v7 }
 0x1ce   :  { %4463 = vmatpush3.bf16.msk.msra.mxu0 %vm10659_vm12, %v9932_v51  ;;  %vm10664_vm7 = vmpackc.low %vm10661_vm14, %vm10663_vm4  ;;  %v2101_v18 = vadd.f32 %v4232_v41, %v8288_v63  ;;  %v4271_v22 = vpop.f32.mrb[21].mxu1  ;;  %v4235_v28 = vadd.f32 %v4234_v10, %v4233_v45  ;;  %v10675_v63 = vld [vmem:[#allocation42_spill] sm:$0xff]  ;;  %vm10678_vm4 = vnez %v10677_v20  ;;  %v10702_v6 = vld [vmem:[#allocation53_spill] sm:$0xff]  ;;  %v3839_v49 = vcombine.high %v1513_v58, %v1521_v61 }
 0x1cf   :  { %4528 = vmatprep.subr.msk.bf16.mxu0 %vm10664_vm7, %v9932_v51  ;;  %vm10669_vm1 = vmpackc.low %vm10666_vm3, %vm10668_vm9  ;;  %v4272_v26 = vadd.f32 %v4271_v22, %v4270_v60  ;;  %v4273_v23 = vpop.f32.mrb[22].mxu1  ;;  %vm10676_vm14 = vnez %v10675_v63  ;;  %vm10681_vm3 = vnez %v10680_v32  ;;  %vm10683_vm9 = vnez %v10682_v34  ;;  %v10705_v45 = vld [vmem:[#allocation52_spill] sm:$0xff]  ;;  %v10707_v53 = vld [vmem:[#allocation51_spill] sm:$0xff] }
 0x1d0   :  { %4503 = vmatpush3.bf16.msk.msra.mxu1 %vm10669_vm1, %v9932_v51  ;;  %vm10674_vm12 = vmpackc.low %vm10671_vm0, %vm10673_vm5  ;;  %v2104_v31 = vadd.f32 %v4235_v28, %v8311_v27  ;;  %v4274_v57 = vpop.f32.mrb[23].mxu1  ;;  %vm10686_vm0 = vnez %v10685_v40  ;;  %v10687_v27 = vld [vmem:[#allocation43_spill] sm:$0xff]  ;;  %v10710_v10 = vld [vmem:[#allocation56_spill] sm:$0xff] }
 0x1d1   :  { %2801 = vmatmul.mubr.bf16.vlgmr.msra.gmra.mrb[64].mxu0 %v3804_v8  ;;  %4568 = vmatprep.subr.msk.bf16.mxu1 %vm10674_vm12, %v9932_v51  ;;  %vm10679_vm7 = vmpackc.low %vm10676_vm14, %vm10678_vm4  ;;  %v8521_v38 = vadd.f32 %v4272_v26, %v2101_v18  ;;  %v4275_v5 = vadd.f32 %v4274_v57, %v4273_v23  ;;  %vm10688_vm5 = vnez %v10687_v27  ;;  %vm10691_vm14 = vnez %v10690_v50  ;;  %v10717_v25 = vld [vmem:[#allocation57_spill] sm:$0xff]  ;;  %v10720_v22 = vld [vmem:[#allocation62_spill] sm:$0xff] }
 0x1d2   :  { %4529 = vmatpush3.bf16.msk.msra.mxu0 %vm10679_vm7, %v9932_v51  ;;  %vm10684_vm1 = vmpackc.low %vm10681_vm3, %vm10683_vm9  ;;  %2808 = vmatprep.mubr.bf16.mxu0 %v3821_v47  ;;  %v4236_v46 = vpop.f32.mrb[24].mxu0  ;;  %vm10693_vm4 = vnez %v10692_v52  ;;  %vm10696_vm3 = vnez %v10695_v54  ;;  %vm10698_vm9 = vnez %v10697_v3  ;;  %v3837_v8 = vcombine.high %v1512_v59, %v1520_v7  ;;  %v10722_v28 = vld [vmem:[#allocation61_spill] sm:$0xff]  ;;  %v1536_v26 = vld [vmem:[#allocation3 + $0x1c0] sm:$0xff] }
 0x1d3   :  { %4530 = vmatprep.subr.msk.bf16.mxu0 %vm10684_vm1, %v9932_v51  ;;  %2866 = vmatmul.mubr.bf16.vlgmr.msra.gmra.mrb[64].mxu1 %v3806_v16  ;;  %vm10689_vm12 = vmpackc.low %vm10686_vm0, %vm10688_vm5  ;;  %v8529_v15 = vadd.f32 %v4275_v5, %v2104_v31  ;;  %v4237_v48 = vpop.f32.mrb[25].mxu0  ;;  %vm10701_vm0 = vnez %v10700_v11  ;;  %vm10703_vm5 = vnez %v10702_v6  ;;  %v10712_v16 = vld [vmem:[#allocation55_spill] sm:$0xff]  ;;  %v10725_v55 = vld [vmem:[#allocation60_spill] sm:$0xff]  ;;  %v3838_v52 = vcombine.low %v1513_v58, %v1521_v61 }
 0x1d4   :  { %4569 = vmatpush3.bf16.msk.msra.mxu1 %vm10689_vm12, %v9932_v51  ;;  %2873 = vmatprep.mubr.bf16.mxu1 %v3823_v24  ;;  %vm10694_vm7 = vmpackc.low %vm10691_vm14, %vm10693_vm4  ;;  %v4238_v0 = vadd.f32 %v4237_v48, %v4236_v46  ;;  %v4239_v35 = vpop.f32.mrb[26].mxu0  ;;  %vm10706_vm14 = vnez %v10705_v45  ;;  %vm10708_vm4 = vnez %v10707_v53  ;;  %v1528_v24 = vld [vmem:[#allocation3 + $0x180] sm:$0xff]  ;;  %v10735_v32 = vld [vmem:[#allocation66_spill] sm:$0xff] }
 0x1d5   :  { %4570 = vmatprep.subr.msk.bf16.mxu1 %vm10694_vm7, %v9932_v51  ;;  %vm10699_vm1 = vmpackc.low %vm10696_vm3, %vm10698_vm9  ;;  %v4276_v21 = vpop.f32.mrb[24].mxu1  ;;  %v4240_v13 = vpop.f32.mrb[27].mxu0  ;;  %vm10711_vm3 = vnez %v10710_v10  ;;  %vm10713_vm9 = vnez %v10712_v16  ;;  %v10730_v31 = vld [vmem:[#allocation64_spill] sm:$0xff]  ;;  %v10732_v57 = vld [vmem:[#allocation63_spill] sm:$0xff] }
 0x1d6   :  { %4531 = vmatpush3.bf16.msk.msra.mxu0 %vm10699_vm1, %v9932_v51  ;;  %vm10704_vm12 = vmpackc.low %vm10701_vm0, %vm10703_vm5  ;;  %v2109_v2 = vadd.f32 %v4238_v0, %v8337_v36  ;;  %v4277_v37 = vpop.f32.mrb[25].mxu1  ;;  %v4241_v41 = vadd.f32 %v4240_v13, %v4239_v35  ;;  %v10715_v36 = vld [vmem:[#allocation58_spill] sm:$0xff]  ;;  %vm10718_vm5 = vnez %v10717_v25  ;;  %v10737_v34 = vld [vmem:[#allocation65_spill] sm:$0xff] }
 0x1d7   :  { %4532 = vmatprep.subr.msk.bf16.mxu0 %vm10704_vm12, %v9932_v51  ;;  %vm10709_vm7 = vmpackc.low %vm10706_vm14, %vm10708_vm4  ;;  %v4278_v47 = vadd.f32 %v4277_v37, %v4276_v21  ;;  %v4279_v60 = vpop.f32.mrb[26].mxu1  ;;  %vm10716_vm0 = vnez %v10715_v36  ;;  %vm10721_vm14 = vnez %v10720_v22  ;;  %vm10723_vm4 = vnez %v10722_v28  ;;  %v1529_v5 = vld [vmem:[#allocation3 + $0x188] sm:$0xff]  ;;  %v10740_v40 = vld [vmem:[#allocation70_spill] sm:$0xff] }
 0x1d8   :  { %4571 = vmatpush3.bf16.msk.msra.mxu1 %vm10709_vm7, %v9932_v51  ;;  %vm10714_vm1 = vmpackc.low %vm10711_vm3, %vm10713_vm9  ;;  %v2112_v33 = vadd.f32 %v4241_v41, %v8357_v42  ;;  %v4280_v18 = vpop.f32.mrb[27].mxu1  ;;  %vm10726_vm3 = vnez %v10725_v55  ;;  %v10727_v42 = vld [vmem:[#allocation59_spill] sm:$0xff]  ;;  %v1537_v46 = vld [vmem:[#allocation3 + $0x1c8] sm:$0xff] }
 0x1d9   :  { %2809 = vmatmul.mubr.bf16.gmra.mrb[68].mxu0 %v3820_v44  ;;  %4572 = vmatprep.subr.msk.bf16.mxu1 %vm10714_vm1, %v9932_v51  ;;  %vm10719_vm12 = vmpackc.low %vm10716_vm0, %vm10718_vm5  ;;  %v8575_v30 = vadd.f32 %v4278_v47, %v2109_v2  ;;  %v4281_v14 = vadd.f32 %v4280_v18, %v4279_v60  ;;  %vm10728_vm9 = vnez %v10727_v42  ;;  %vm10731_vm0 = vnez %v10730_v31  ;;  %v10742_v27 = vld [vmem:[#allocation69_spill] sm:$0xff]  ;;  %v10745_v35 = vld [vmem:[#allocation68_spill] sm:$0xff] }
 0x1da   :  { %4533 = vmatpush3.bf16.msk.msra.mxu0 %vm10719_vm12, %v9932_v51  ;;  %vm10724_vm7 = vmpackc.low %vm10721_vm14, %vm10723_vm4  ;;  %2816 = vmatprep.mubr.bf16.mxu0 %v3837_v8  ;;  %v4242_v23 = vpop.f32.mrb[28].mxu0  ;;  %vm10733_vm5 = vnez %v10732_v57  ;;  %vm10736_vm14 = vnez %v10735_v32  ;;  %vm10738_vm4 = vnez %v10737_v34  ;;  %v3853_v44 = vcombine.high %v1528_v24, %v1536_v26  ;;  %v10747_v11 = vld [vmem:[#allocation67_spill] sm:$0xff]  ;;  %v10750_v13 = vld [vmem:[#allocation72_spill] sm:$0xff] }
 0x1db   :  { %4534 = vmatprep.subr.msk.bf16.mxu0 %vm10724_vm7, %v9932_v51  ;;  %2874 = vmatmul.mubr.bf16.gmra.mrb[68].mxu1 %v3822_v4  ;;  %vm10729_vm1 = vmpackc.low %vm10726_vm3, %vm10728_vm9  ;;  %v8583_v63 = vadd.f32 %v4281_v14, %v2112_v33  ;;  %v4243_v20 = vpop.f32.mrb[29].mxu0  ;;  %vm10741_vm3 = vnez %v10740_v40  ;;  %vm10743_vm9 = vnez %v10742_v27  ;;  %v3855_v6 = vcombine.high %v1529_v5, %v1537_v46  ;;  %v10752_v4 = vld [vmem:[#allocation71_spill] sm:$0xff]  ;;  %v10757_v58 = vld [vmem:[#allocation73_spill] sm:$0xff] }
 0x1dc   :  { %4573 = vmatpush3.bf16.msk.msra.mxu1 %vm10729_vm1, %v9932_v51  ;;  %2881 = vmatprep.mubr.bf16.mxu1 %v3839_v49  ;;  %vm10734_vm12 = vmpackc.low %vm10731_vm0, %vm10733_vm5  ;;  %v4244_v59 = vadd.f32 %v4243_v20, %v4242_v23  ;;  %v4245_v7 = vpop.f32.mrb[30].mxu0  ;;  %vm10746_vm0 = vnez %v10745_v35  ;;  %vm10748_vm5 = vnez %v10747_v11  ;;  %v10760_v37 = vld [vmem:[#allocation78_spill] sm:$0xff]  ;;  %v10762_v41 = vld [vmem:[#allocation77_spill] sm:$0xff]  ;;  %v3854_v23 = vcombine.low %v1529_v5, %v1537_v46 }
 0x1dd   :  { %4574 = vmatprep.subr.msk.bf16.mxu1 %vm10734_vm12, %v9932_v51  ;;  %vm10739_vm7 = vmpackc.low %vm10736_vm14, %vm10738_vm4  ;;  %v4282_v48 = vpop.f32.mrb[28].mxu1  ;;  %v4246_v50 = vpop.f32.mrb[31].mxu0  ;;  %vm10751_vm14 = vnez %v10750_v13  ;;  %vm10753_vm4 = vnez %v10752_v4  ;;  %v1482_v49 = vld [vmem:[#allocation3 + $0x10] sm:$0xff]  ;;  %v10765_v60 = vld [vmem:[#allocation76_spill] sm:$0xff] }
 0x1de   :  { %4535 = vmatpush3.bf16.msk.msra.mxu0 %vm10739_vm7, %v9932_v51  ;;  %vm10744_vm1 = vmpackc.low %vm10741_vm3, %vm10743_vm9  ;;  %v2117_v54 = vadd.f32 %v4244_v59, %v8389_v17  ;;  %v4283_v3 = vpop.f32.mrb[29].mxu1  ;;  %v4247_v0 = vadd.f32 %v4246_v50, %v4245_v7  ;;  %v10755_v17 = vld [vmem:[#allocation74_spill] sm:$0xff]  ;;  %vm10758_vm9 = vnez %v10757_v58  ;;  %v10767_v10 = vld [vmem:[#allocation75_spill] sm:$0xff] }
 0x1df   :  { %4536 = vmatprep.subr.msk.bf16.mxu0 %vm10744_vm1, %v9932_v51  ;;  %vm10749_vm12 = vmpackc.low %vm10746_vm0, %vm10748_vm5  ;;  %v4284_v8 = vadd.f32 %v4283_v3, %v4282_v48  ;;  %v4285_v21 = vpop.f32.mrb[30].mxu1  ;;  %vm10756_vm3 = vnez %v10755_v17  ;;  %vm10761_vm0 = vnez %v10760_v37  ;;  %vm10763_vm5 = vnez %v10762_v41  ;;  %v1490_v47 = vld [vmem:[#allocation3 + $0x50] sm:$0xff]  ;;  %v10770_v36 = vld [vmem:[#allocation80_spill] sm:$0xff] }
 0x1e0   :  { %4575 = vmatpush3.bf16.msk.msra.mxu1 %vm10749_vm12, %v9932_v51  ;;  %vm10754_vm7 = vmpackc.low %vm10751_vm14, %vm10753_vm4  ;;  %v2120_v61 = vadd.f32 %v4247_v0, %v8409_v29  ;;  %v4286_v2 = vpop.f32.mrb[31].mxu1  ;;  %vm10766_vm14 = vnez %v10765_v60  ;;  %vm10768_vm4 = vnez %v10767_v10  ;;  %v3852_v29 = vcombine.low %v1528_v24, %v1536_v26  ;;  %v10772_v25 = vld [vmem:[#allocation79_spill] sm:$0xff]  ;;  %v10775_v33 = vld [vmem:[#allocation82_spill] sm:$0xff] }
 0x1e1   :  { %2817 = vmatmul.mubr.bf16.gmra.mrb[72].mxu0 %v3836_v43  ;;  %4576 = vmatprep.subr.msk.bf16.mxu1 %vm10754_vm7, %v9932_v51  ;;  %vm10759_vm1 = vmpackc.low %vm10756_vm3, %vm10758_vm9  ;;  %v8629_v45 = vadd.f32 %v4284_v8, %v2117_v54  ;;  %v4287_v53 = vadd.f32 %v4286_v2, %v4285_v21  ;;  %vm10771_vm3 = vnez %v10770_v36  ;;  %vm10773_vm9 = vnez %v10772_v25  ;;  %v10777_v18 = vld [vmem:[#allocation81_spill] sm:$0xff]  ;;  %v1483_v22 = vld [vmem:[#allocation3 + $0x18] sm:$0xff] }
 0x1e2   :  { %4537 = vmatpush3.bf16.msk.msra.mxu0 %vm10759_vm1, %v9932_v51  ;;  %vm10764_vm12 = vmpackc.low %vm10761_vm0, %vm10763_vm5  ;;  %2824 = vmatprep.mubr.bf16.mxu0 %v3853_v44  ;;  %vm10776_vm0 = vnez %v10775_v33  ;;  %vm10778_vm5 = vnez %v10777_v18  ;;  %v1491_v28 = vld [vmem:[#allocation3 + $0x58] sm:$0xff]  ;;  %v10782_v24 = vld [vmem:[#allocation85_spill] sm:$0xff]  ;;  %v3809_v26 = vcombine.high %v1482_v49, %v1490_v47  ;;  %v3808_v27 = vcombine.low %v1482_v49, %v1490_v47 }
 0x1e3   :  { %4538 = vmatprep.subr.msk.bf16.mxu0 %vm10764_vm12, %v9932_v51  ;;  %2882 = vmatmul.mubr.bf16.gmra.mrb[72].mxu1 %v3838_v52  ;;  %vm10769_vm7 = vmpackc.low %vm10766_vm14, %vm10768_vm4  ;;  %v8637_v16 = vadd.f32 %v4287_v53, %v2120_v61  ;;  %v10780_v14 = vld [vmem:[#allocation86_spill] sm:$0xff]  ;;  %vm10783_vm4 = vnez %v10782_v24  ;;  %v10785_v55 = vld [vmem:[#allocation84_spill] sm:$0xff]  ;;  %v3811_v43 = vcombine.high %v1483_v22, %v1491_v28 }
 0x1e4   :  { %4577 = vmatpush3.bf16.msk.msra.mxu1 %vm10769_vm7, %v9932_v51  ;;  %2889 = vmatprep.mubr.bf16.mxu1 %v3855_v6  ;;  %vm10774_vm1 = vmpackc.low %vm10771_vm3, %vm10773_vm9  ;;  %vm10781_vm14 = vnez %v10780_v14  ;;  %vm10786_vm3 = vnez %v10785_v55  ;;  %v10787_v42 = vld [vmem:[#allocation83_spill] sm:$0xff]  ;;  %v10790_v20 = vld [vmem:[#allocation88_spill] sm:$0xff]  ;;  %v3810_v6 = vcombine.low %v1483_v22, %v1491_v28 }
 0x1e5   :  { %4578 = vmatprep.subr.msk.bf16.mxu1 %vm10774_vm1, %v9932_v51  ;;  %vm10779_vm12 = vmpackc.low %vm10776_vm0, %vm10778_vm5  ;;  %vm10788_vm9 = vnez %v10787_v42  ;;  %vm10791_vm0 = vnez %v10790_v20  ;;  %v10792_v31 = vld [vmem:[#allocation87_spill] sm:$0xff]  ;;  %v10795_v57 = vld [vmem:[#allocation90_spill] sm:$0xff] }
 0x1e6   :  { %4539 = vmatpush3.bf16.msk.msra.mxu0 %vm10779_vm12, %v9932_v51  ;;  %vm10784_vm7 = vmpackc.low %vm10781_vm14, %vm10783_vm4  ;;  %vm10793_vm5 = vnez %v10792_v31  ;;  %vm10796_vm14 = vnez %v10795_v57  ;;  %v10797_v32 = vld [vmem:[#allocation89_spill] sm:$0xff]  ;;  %v10800_v34 = vld [vmem:[#allocation94_spill] sm:$0xff] }
 0x1e7   :  { %4540 = vmatprep.subr.msk.bf16.mxu0 %vm10784_vm7, %v9932_v51  ;;  %vm10789_vm1 = vmpackc.low %vm10786_vm3, %vm10788_vm9  ;;  %vm10798_vm4 = vnez %v10797_v32  ;;  %vm10801_vm3 = vnez %v10800_v34  ;;  %v10802_v5 = vld [vmem:[#allocation93_spill] sm:$0xff]  ;;  %v10805_v7 = vld [vmem:[#allocation92_spill] sm:$0xff] }
 0x1e8   :  { %4579 = vmatpush3.bf16.msk.msra.mxu1 %vm10789_vm1, %v9932_v51  ;;  %vm10794_vm12 = vmpackc.low %vm10791_vm0, %vm10793_vm5  ;;  %vm10803_vm9 = vnez %v10802_v5  ;;  %v1498_v46 = vld [vmem:[#allocation3 + $0x90] sm:$0xff]  ;;  %vm10806_vm0 = vnez %v10805_v7  ;;  %v10807_v40 = vld [vmem:[#allocation91_spill] sm:$0xff] }
 0x1e9   :  { %2825 = vmatmul.mubr.bf16.gmra.mrb[76].mxu0 %v3852_v29  ;;  %4580 = vmatprep.subr.msk.bf16.mxu1 %vm10794_vm12, %v9932_v51  ;;  %vm10799_vm7 = vmpackc.low %vm10796_vm14, %vm10798_vm4  ;;  %v1506_v59 = vld [vmem:[#allocation3 + $0xd0] sm:$0xff]  ;;  %vm10808_vm5 = vnez %v10807_v40  ;;  %v10810_v44 = vld [vmem:[#allocation96_spill] sm:$0xff] }
 0x1ea   :  { %4541 = vmatpush3.bf16.msk.msra.mxu0 %vm10799_vm7, %v9932_v51  ;;  %vm10804_vm1 = vmpackc.low %vm10801_vm3, %vm10803_vm9  ;;  %2930 = vmatprep.mubr.bf16.mxu0 %v3809_v26  ;;  %vm10811_vm14 = vnez %v10810_v44  ;;  %v10812_v48 = vld [vmem:[#allocation95_spill] sm:$0xff]  ;;  %v10815_v50 = vld [vmem:[#allocation98_spill] sm:$0xff]  ;;  %v3825_v11 = vcombine.high %v1498_v46, %v1506_v59  ;;  %v3824_v60 = vcombine.low %v1498_v46, %v1506_v59 }
 0x1eb   :  { %4542 = vmatprep.subr.msk.bf16.mxu0 %vm10804_vm1, %v9932_v51  ;;  %2890 = vmatmul.mubr.bf16.gmra.mrb[76].mxu1 %v3854_v23  ;;  %vm10809_vm12 = vmpackc.low %vm10806_vm0, %vm10808_vm5  ;;  %vm10813_vm4 = vnez %v10812_v48  ;;  %vm10816_vm3 = vnez %v10815_v50  ;;  %v10817_v52 = vld [vmem:[#allocation97_spill] sm:$0xff]  ;;  %v1499_v54 = vld [vmem:[#allocation3 + $0x98] sm:$0xff] }
 0x1ec   :  { %4581 = vmatpush3.bf16.msk.msra.mxu1 %vm10809_vm12, %v9932_v51  ;;  %2995 = vmatprep.mubr.bf16.mxu1 %v3811_v43  ;;  %vm10814_vm7 = vmpackc.low %vm10811_vm14, %vm10813_vm4  ;;  %vm10818_vm9 = vnez %v10817_v52  ;;  %v1507_v3 = vld [vmem:[#allocation3 + $0xd8] sm:$0xff]  ;;  %v10822_v35 = vld [vmem:[#allocation101_spill] sm:$0xff] }
 0x1ed   :  { %4582 = vmatprep.subr.msk.bf16.mxu1 %vm10814_vm7, %v9932_v51  ;;  %vm10819_vm1 = vmpackc.low %vm10816_vm3, %vm10818_vm9  ;;  %v10820_v0 = vld [vmem:[#allocation102_spill] sm:$0xff]  ;;  %vm10823_vm5 = vnez %v10822_v35  ;;  %v10825_v8 = vld [vmem:[#allocation100_spill] sm:$0xff]  ;;  %v3827_v13 = vcombine.high %v1499_v54, %v1507_v3  ;;  %v3826_v24 = vcombine.low %v1499_v54, %v1507_v3 }
 0x1ee   :  { %4543 = vmatpush3.bf16.msk.msra.mxu0 %vm10819_vm1, %v9932_v51  ;;  %vm10821_vm0 = vnez %v10820_v0  ;;  %vm10826_vm14 = vnez %v10825_v8  ;;  %v10827_v21 = vld [vmem:[#allocation99_spill] sm:$0xff]  ;;  %v10830_v4 = vld [vmem:[#allocation104_spill] sm:$0xff]  ;;  %v10835_v58 = vld [vmem:[#allocation106_spill] sm:$0xff] }
 0x1ef   :  { %vm10824_vm12 = vmpackc.low %vm10821_vm0, %vm10823_vm5  ;;  %vm10828_vm4 = vnez %v10827_v21  ;;  %vm10831_vm3 = vnez %v10830_v4  ;;  %v10832_v17 = vld [vmem:[#allocation103_spill] sm:$0xff]  ;;  %vm10836_vm0 = vnez %v10835_v58  ;;  %v10837_v61 = vld [vmem:[#allocation105_spill] sm:$0xff] }
 0x1f0   :  { %4608 = vmatprep.subr.msk.bf16.mxu0 %vm10824_vm12, %v9932_v51  ;;  %vm10829_vm7 = vmpackc.low %vm10826_vm14, %vm10828_vm4  ;;  %vm10833_vm9 = vnez %v10832_v17  ;;  %vm10838_vm5 = vnez %v10837_v61  ;;  %v10840_v2 = vld [vmem:[#allocation110_spill] sm:$0xff]  ;;  %v10842_v37 = vld [vmem:[#allocation109_spill] sm:$0xff] }
 0x1f1   :  { %4583 = vmatpush3.bf16.msk.msra.mxu1 %vm10829_vm7, %v9932_v51  ;;  %2931 = vmatmul.mubr.bf16.vlgmr.msra.gmra.mrb[80].mxu0 %v3808_v27  ;;  %vm10834_vm1 = vmpackc.low %vm10831_vm3, %vm10833_vm9  ;;  %vm10841_vm14 = vnez %v10840_v2  ;;  %vm10843_vm4 = vnez %v10842_v37  ;;  %v1514_v41 = vld [vmem:[#allocation3 + $0x110] sm:$0xff]  ;;  %v10845_v49 = vld [vmem:[#allocation108_spill] sm:$0xff] }
 0x1f2   :  { %4648 = vmatprep.subr.msk.bf16.mxu1 %vm10834_vm1, %v9932_v51  ;;  %vm10839_vm12 = vmpackc.low %vm10836_vm0, %vm10838_vm5  ;;  %2938 = vmatprep.mubr.bf16.mxu0 %v3825_v11  ;;  %v1522_v53 = vld [vmem:[#allocation3 + $0x150] sm:$0xff]  ;;  %vm10846_vm3 = vnez %v10845_v49  ;;  %v10847_v47 = vld [vmem:[#allocation107_spill] sm:$0xff] }
 0x1f3   :  { %4609 = vmatpush3.bf16.msk.msra.mxu0 %vm10839_vm12, %v9932_v51  ;;  %vm10844_vm7 = vmpackc.low %vm10841_vm14, %vm10843_vm4  ;;  %vm10848_vm9 = vnez %v10847_v47  ;;  %v10850_v10 = vld [vmem:[#allocation112_spill] sm:$0xff]  ;;  %v10852_v29 = vld [vmem:[#allocation111_spill] sm:$0xff]  ;;  %v3841_v14 = vcombine.high %v1514_v41, %v1522_v53  ;;  %v3840_v7 = vcombine.low %v1514_v41, %v1522_v53 }
 0x1f4   :  { %4610 = vmatprep.subr.msk.bf16.mxu0 %vm10844_vm7, %v9932_v51  ;;  %2996 = vmatmul.mubr.bf16.vlgmr.msra.gmra.mrb[80].mxu1 %v3810_v6  ;;  %vm10849_vm1 = vmpackc.low %vm10846_vm3, %vm10848_vm9  ;;  %vm10851_vm0 = vnez %v10850_v10  ;;  %vm10853_vm5 = vnez %v10852_v29  ;;  %v10855_v36 = vld [vmem:[#allocation114_spill] sm:$0xff]  ;;  %v10857_v25 = vld [vmem:[#allocation113_spill] sm:$0xff] }
 0x1f5   :  { %4649 = vmatpush3.bf16.msk.msra.mxu1 %vm10849_vm1, %v9932_v51  ;;  %3003 = vmatprep.mubr.bf16.mxu1 %v3827_v13  ;;  %vm10854_vm12 = vmpackc.low %vm10851_vm0, %vm10853_vm5  ;;  %vm10856_vm14 = vnez %v10855_v36  ;;  %vm10858_vm4 = vnez %v10857_v25  ;;  %v1515_v33 = vld [vmem:[#allocation3 + $0x118] sm:$0xff]  ;;  %v10862_v28 = vld [vmem:[#allocation117_spill] sm:$0xff] }
 0x1f6   :  { %4650 = vmatprep.subr.msk.bf16.mxu1 %vm10854_vm12, %v9932_v51  ;;  %vm10859_vm7 = vmpackc.low %vm10856_vm14, %vm10858_vm4  ;;  %v1523_v18 = vld [vmem:[#allocation3 + $0x158] sm:$0xff]  ;;  %vm10863_vm9 = vnez %v10862_v28  ;;  %v10865_v26 = vld [vmem:[#allocation116_spill] sm:$0xff] }
 0x1f7   :  { %4611 = vmatpush3.bf16.msk.msra.mxu0 %vm10859_vm7, %v9932_v51  ;;  %v10860_v22 = vld [vmem:[#allocation118_spill] sm:$0xff]  ;;  %vm10866_vm0 = vnez %v10865_v26  ;;  %v10867_v23 = vld [vmem:[#allocation115_spill] sm:$0xff]  ;;  %v3843_v55 = vcombine.high %v1515_v33, %v1523_v18  ;;  %v10870_v42 = vld [vmem:[#allocation120_spill] sm:$0xff]  ;;  %v3842_v35 = vcombine.low %v1515_v33, %v1523_v18 }
 0x1f8   :  { %vm10861_vm3 = vnez %v10860_v22  ;;  %vm10868_vm5 = vnez %v10867_v23  ;;  %vm10871_vm14 = vnez %v10870_v42  ;;  %v10872_v43 = vld [vmem:[#allocation119_spill] sm:$0xff]  ;;  %v10875_v20 = vld [vmem:[#allocation122_spill] sm:$0xff]  ;;  %v10877_v31 = vld [vmem:[#allocation121_spill] sm:$0xff] }
 0x1f9   :  { %vm10864_vm1 = vmpackc.low %vm10861_vm3, %vm10863_vm9  ;;  %2939 = vmatmul.mubr.bf16.gmra.mrb[84].mxu0 %v3824_v60  ;;  %vm10873_vm4 = vnez %v10872_v43  ;;  %vm10876_vm3 = vnez %v10875_v20  ;;  %vm10878_vm9 = vnez %v10877_v31  ;;  %v10880_v57 = vld [vmem:[#allocation126_spill] sm:$0xff]  ;;  %v10882_v32 = vld [vmem:[#allocation125_spill] sm:$0xff] }
 0x1fa   :  { %4612 = vmatprep.subr.msk.bf16.mxu0 %vm10864_vm1, %v9932_v51  ;;  %vm10869_vm12 = vmpackc.low %vm10866_vm0, %vm10868_vm5  ;;  %vm10881_vm0 = vnez %v10880_v57  ;;  %vm10883_vm5 = vnez %v10882_v32  ;;  %2946 = vmatprep.mubr.bf16.mxu0 %v3841_v14  ;;  %v1530_v34 = vld [vmem:[#allocation3 + $0x190] sm:$0xff]  ;;  %v10885_v46 = vld [vmem:[#allocation124_spill] sm:$0xff] }
 0x1fb   :  { %4651 = vmatpush3.bf16.msk.msra.mxu1 %vm10869_vm12, %v9932_v51  ;;  %vm10874_vm7 = vmpackc.low %vm10871_vm14, %vm10873_vm4  ;;  %v1538_v5 = vld [vmem:[#allocation3 + $0x1d0] sm:$0xff]  ;;  %vm10886_vm14 = vnez %v10885_v46  ;;  %v10887_v59 = vld [vmem:[#allocation123_spill] sm:$0xff] }
 0x1fc   :  { %4652 = vmatprep.subr.msk.bf16.mxu1 %vm10874_vm7, %v9932_v51  ;;  %vm10879_vm1 = vmpackc.low %vm10876_vm3, %vm10878_vm9  ;;  %3004 = vmatmul.mubr.bf16.gmra.mrb[84].mxu1 %v3826_v24  ;;  %vm10888_vm4 = vnez %v10887_v59  ;;  %v10890_v40 = vld [vmem:[#allocation128_spill] sm:$0xff]  ;;  %v10892_v27 = vld [vmem:[#allocation127_spill] sm:$0xff]  ;;  %v3857_v0 = vcombine.high %v1530_v34, %v1538_v5  ;;  %v3856_v49 = vcombine.low %v1530_v34, %v1538_v5 }
 0x1fd   :  { %4613 = vmatpush3.bf16.msk.msra.mxu0 %vm10879_vm1, %v9932_v51  ;;  %vm10884_vm12 = vmpackc.low %vm10881_vm0, %vm10883_vm5  ;;  %3011 = vmatprep.mubr.bf16.mxu1 %v3843_v55  ;;  %vm10891_vm3 = vnez %v10890_v40  ;;  %vm10893_vm9 = vnez %v10892_v27  ;;  %v10895_v44 = vld [vmem:[#allocation130_spill] sm:$0xff]  ;;  %v10897_v48 = vld [vmem:[#allocation129_spill] sm:$0xff] }
 0x1fe   :  { %4614 = vmatprep.subr.msk.bf16.mxu0 %vm10884_vm12, %v9932_v51  ;;  %vm10889_vm7 = vmpackc.low %vm10886_vm14, %vm10888_vm4  ;;  %vm10896_vm0 = vnez %v10895_v44  ;;  %vm10898_vm5 = vnez %v10897_v48  ;;  %v1531_v50 = vld [vmem:[#allocation3 + $0x198] sm:$0xff]  ;;  %v10902_v3 = vld [vmem:[#allocation133_spill] sm:$0xff] }
 0x1ff   :  { %4653 = vmatpush3.bf16.msk.msra.mxu1 %vm10889_vm7, %v9932_v51  ;;  %vm10894_vm1 = vmpackc.low %vm10891_vm3, %vm10893_vm9  ;;  %v1539_v52 = vld [vmem:[#allocation3 + $0x1d8] sm:$0xff]  ;;  %vm10903_vm4 = vnez %v10902_v3  ;;  %v10905_v11 = vld [vmem:[#allocation132_spill] sm:$0xff] }
 0x200   :  { %4654 = vmatprep.subr.msk.bf16.mxu1 %vm10894_vm1, %v9932_v51  ;;  %vm10899_vm12 = vmpackc.low %vm10896_vm0, %vm10898_vm5  ;;  %v10900_v54 = vld [vmem:[#allocation134_spill] sm:$0xff]  ;;  %vm10906_vm3 = vnez %v10905_v11  ;;  %v10907_v6 = vld [vmem:[#allocation131_spill] sm:$0xff]  ;;  %v3859_v8 = vcombine.high %v1531_v50, %v1539_v52  ;;  %v3858_v28 = vcombine.low %v1531_v50, %v1539_v52 }
 0x201   :  { %4615 = vmatpush3.bf16.msk.msra.mxu0 %vm10899_vm12, %v9932_v51  ;;  %vm10901_vm14 = vnez %v10900_v54  ;;  %vm10908_vm9 = vnez %v10907_v6  ;;  %v10910_v21 = vld [vmem:[#allocation136_spill] sm:$0xff]  ;;  %v10912_v13 = vld [vmem:[#allocation135_spill] sm:$0xff]  ;;  %v10915_v4 = vld [vmem:[#allocation138_spill] sm:$0xff] }
 0x202   :  { %vm10904_vm7 = vmpackc.low %vm10901_vm14, %vm10903_vm4  ;;  %2947 = vmatmul.mubr.bf16.gmra.mrb[88].mxu0 %v3840_v7  ;;  %vm10911_vm0 = vnez %v10910_v21  ;;  %vm10913_vm5 = vnez %v10912_v13  ;;  %vm10916_vm14 = vnez %v10915_v4  ;;  %v10917_v17 = vld [vmem:[#allocation137_spill] sm:$0xff]  ;;  %v10920_v58 = vld [vmem:[#allocation142_spill] sm:$0xff] }
 0x203   :  { %4616 = vmatprep.subr.msk.bf16.mxu0 %vm10904_vm7, %v9932_v51  ;;  %vm10909_vm1 = vmpackc.low %vm10906_vm3, %vm10908_vm9  ;;  %vm10918_vm4 = vnez %v10917_v17  ;;  %vm10921_vm3 = vnez %v10920_v58  ;;  %v10922_v61 = vld [vmem:[#allocation141_spill] sm:$0xff]  ;;  %2954 = vmatprep.mubr.bf16.mxu0 %v3857_v0  ;;  %v1484_v2 = vld [vmem:[#allocation3 + $0x20] sm:$0xff] }
 0x204   :  { %4655 = vmatpush3.bf16.msk.msra.mxu1 %vm10909_vm1, %v9932_v51  ;;  %vm10914_vm12 = vmpackc.low %vm10911_vm0, %vm10913_vm5  ;;  %vm10923_vm9 = vnez %v10922_v61  ;;  %v1492_v37 = vld [vmem:[#allocation3 + $0x60] sm:$0xff]  ;;  %v10935_v10 = vld [vmem:[#allocation146_spill] sm:$0xff] }
 0x205   :  { %4656 = vmatprep.subr.msk.bf16.mxu1 %vm10914_vm12, %v9932_v51  ;;  %vm10919_vm7 = vmpackc.low %vm10916_vm14, %vm10918_vm4  ;;  %3012 = vmatmul.mubr.bf16.gmra.mrb[88].mxu1 %v3842_v35  ;;  %v10925_v41 = vld [vmem:[#allocation140_spill] sm:$0xff]  ;;  %v10927_v53 = vld [vmem:[#allocation139_spill] sm:$0xff]  ;;  %v3813_v22 = vcombine.high %v1484_v2, %v1492_v37  ;;  %v3812_v46 = vcombine.low %v1484_v2, %v1492_v37 }
 0x206   :  { %4617 = vmatpush3.bf16.msk.msra.mxu0 %vm10919_vm7, %v9932_v51  ;;  %vm10924_vm1 = vmpackc.low %vm10921_vm3, %vm10923_vm9  ;;  %vm10926_vm0 = vnez %v10925_v41  ;;  %vm10928_vm5 = vnez %v10927_v53  ;;  %3019 = vmatprep.mubr.bf16.mxu1 %v3859_v8  ;;  %v10930_v47 = vld [vmem:[#allocation144_spill] sm:$0xff]  ;;  %v10932_v60 = vld [vmem:[#allocation143_spill] sm:$0xff]  ;;  %vm10936_vm3 = vnez %v10935_v10 }
 0x207   :  { %4618 = vmatprep.subr.msk.bf16.mxu0 %vm10924_vm1, %v9932_v51  ;;  %vm10929_vm12 = vmpackc.low %vm10926_vm0, %vm10928_vm5  ;;  %vm10931_vm14 = vnez %v10930_v47  ;;  %vm10933_vm4 = vnez %v10932_v60  ;;  %v10937_v29 = vld [vmem:[#allocation145_spill] sm:$0xff]  ;;  %v10940_v33 = vld [vmem:[#allocation150_spill] sm:$0xff] }
 0x208   :  { %4657 = vmatpush3.bf16.msk.msra.mxu1 %vm10929_vm12, %v9932_v51  ;;  %vm10934_vm7 = vmpackc.low %vm10931_vm14, %vm10933_vm4  ;;  %vm10938_vm9 = vnez %v10937_v29  ;;  %v1485_v36 = vld [vmem:[#allocation3 + $0x28] sm:$0xff]  ;;  %vm10941_vm0 = vnez %v10940_v33  ;;  %v10947_v24 = vld [vmem:[#allocation147_spill] sm:$0xff] }
 0x209   :  { %4658 = vmatprep.subr.msk.bf16.mxu1 %vm10934_vm7, %v9932_v51  ;;  %vm10939_vm1 = vmpackc.low %vm10936_vm3, %vm10938_vm9  ;;  %v1493_v25 = vld [vmem:[#allocation3 + $0x68] sm:$0xff]  ;;  %vm10948_vm4 = vnez %v10947_v24  ;;  %v10952_v55 = vld [vmem:[#allocation151_spill] sm:$0xff] }
 0x20a   :  { %4619 = vmatpush3.bf16.msk.msra.mxu0 %vm10939_vm1, %v9932_v51  ;;  %v10942_v18 = vld [vmem:[#allocation149_spill] sm:$0xff]  ;;  %v10945_v14 = vld [vmem:[#allocation148_spill] sm:$0xff]  ;;  %v3815_v26 = vcombine.high %v1485_v36, %v1493_v25  ;;  %vm10953_vm9 = vnez %v10952_v55  ;;  %v10955_v42 = vld [vmem:[#allocation154_spill] sm:$0xff]  ;;  %v3814_v3 = vcombine.low %v1485_v36, %v1493_v25 }
 0x20b   :  { %vm10943_vm5 = vnez %v10942_v18  ;;  %vm10946_vm14 = vnez %v10945_v14  ;;  %2955 = vmatmul.mubr.bf16.gmra.mrb[92].mxu0 %v3856_v49  ;;  %v10950_v23 = vld [vmem:[#allocation152_spill] sm:$0xff]  ;;  %v10957_v43 = vld [vmem:[#allocation153_spill] sm:$0xff]  ;;  %v10960_v20 = vld [vmem:[#allocation158_spill] sm:$0xff] }
 0x20c   :  { %vm10944_vm12 = vmpackc.low %vm10941_vm0, %vm10943_vm5  ;;  %vm10951_vm3 = vnez %v10950_v23  ;;  %vm10956_vm0 = vnez %v10955_v42  ;;  %vm10958_vm5 = vnez %v10957_v43  ;;  %v10962_v31 = vld [vmem:[#allocation157_spill] sm:$0xff]  ;;  %3060 = vmatprep.mubr.bf16.mxu0 %v3813_v22  ;;  %v1500_v57 = vld [vmem:[#allocation3 + $0xa0] sm:$0xff] }
 0x20d   :  { %4620 = vmatprep.subr.msk.bf16.mxu0 %vm10944_vm12, %v9932_v51  ;;  %vm10949_vm7 = vmpackc.low %vm10946_vm14, %vm10948_vm4  ;;  %vm10961_vm14 = vnez %v10960_v20  ;;  %vm10963_vm4 = vnez %v10962_v31  ;;  %3020 = vmatmul.mubr.bf16.gmra.mrb[92].mxu1 %v3858_v28  ;;  %v1508_v32 = vld [vmem:[#allocation3 + $0xe0] sm:$0xff]  ;;  %v10975_v40 = vld [vmem:[#allocation162_spill] sm:$0xff] }
 0x20e   :  { %4659 = vmatpush3.bf16.msk.msra.mxu1 %vm10949_vm7, %v9932_v51  ;;  %vm10954_vm1 = vmpackc.low %vm10951_vm3, %vm10953_vm9  ;;  %v10965_v34 = vld [vmem:[#allocation156_spill] sm:$0xff]  ;;  %v10967_v5 = vld [vmem:[#allocation155_spill] sm:$0xff]  ;;  %3125 = vmatprep.mubr.bf16.mxu1 %v3815_v26  ;;  %v3829_v54 = vcombine.high %v1500_v57, %v1508_v32  ;;  %v3828_v37 = vcombine.low %v1500_v57, %v1508_v32 }
 0x20f   :  { %4660 = vmatprep.subr.msk.bf16.mxu1 %vm10954_vm1, %v9932_v51  ;;  %vm10959_vm12 = vmpackc.low %vm10956_vm0, %vm10958_vm5  ;;  %vm10966_vm3 = vnez %v10965_v34  ;;  %vm10968_vm9 = vnez %v10967_v5  ;;  %v10970_v59 = vld [vmem:[#allocation160_spill] sm:$0xff]  ;;  %v10972_v7 = vld [vmem:[#allocation159_spill] sm:$0xff] }
 0x210   :  { %4621 = vmatpush3.bf16.msk.msra.mxu0 %vm10959_vm12, %v9932_v51  ;;  %vm10964_vm7 = vmpackc.low %vm10961_vm14, %vm10963_vm4  ;;  %vm10971_vm0 = vnez %v10970_v59  ;;  %vm10973_vm5 = vnez %v10972_v7  ;;  %vm10976_vm14 = vnez %v10975_v40  ;;  %v10977_v27 = vld [vmem:[#allocation161_spill] sm:$0xff]  ;;  %v10980_v50 = vld [vmem:[#allocation166_spill] sm:$0xff] }
 0x211   :  { %4622 = vmatprep.subr.msk.bf16.mxu0 %vm10964_vm7, %v9932_v51  ;;  %vm10969_vm1 = vmpackc.low %vm10966_vm3, %vm10968_vm9  ;;  %vm10978_vm4 = vnez %v10977_v27  ;;  %v1501_v44 = vld [vmem:[#allocation3 + $0xa8] sm:$0xff]  ;;  %vm10981_vm3 = vnez %v10980_v50  ;;  %v10987_v35 = vld [vmem:[#allocation163_spill] sm:$0xff] }
 0x212   :  { %4661 = vmatpush3.bf16.msk.msra.mxu1 %vm10969_vm1, %v9932_v51  ;;  %vm10974_vm12 = vmpackc.low %vm10971_vm0, %vm10973_vm5  ;;  %v1509_v48 = vld [vmem:[#allocation3 + $0xe8] sm:$0xff]  ;;  %vm10988_vm5 = vnez %v10987_v35  ;;  %v10992_v8 = vld [vmem:[#allocation167_spill] sm:$0xff] }
 0x213   :  { %4662 = vmatprep.subr.msk.bf16.mxu1 %vm10974_vm12, %v9932_v51  ;;  %vm10979_vm7 = vmpackc.low %vm10976_vm14, %vm10978_vm4  ;;  %v10982_v52 = vld [vmem:[#allocation165_spill] sm:$0xff]  ;;  %v10985_v0 = vld [vmem:[#allocation164_spill] sm:$0xff]  ;;  %v3831_v11 = vcombine.high %v1501_v44, %v1509_v48  ;;  %vm10993_vm4 = vnez %v10992_v8  ;;  %v3830_v25 = vcombine.low %v1501_v44, %v1509_v48 }
 0x214   :  { %4623 = vmatpush3.bf16.msk.msra.mxu0 %vm10979_vm7, %v9932_v51  ;;  %vm10983_vm9 = vnez %v10982_v52  ;;  %vm10986_vm0 = vnez %v10985_v0  ;;  %v10990_v6 = vld [vmem:[#allocation168_spill] sm:$0xff]  ;;  %v10995_v21 = vld [vmem:[#allocation170_spill] sm:$0xff]  ;;  %v10997_v13 = vld [vmem:[#allocation169_spill] sm:$0xff] }
 0x215   :  { %vm10984_vm1 = vmpackc.low %vm10981_vm3, %vm10983_vm9  ;;  %vm10991_vm14 = vnez %v10990_v6  ;;  %vm10996_vm3 = vnez %v10995_v21  ;;  %vm10998_vm9 = vnez %v10997_v13  ;;  %v11001_v4 = vld [vmem:[#allocation173_spill] sm:$0xff]  ;;  %v1516_v17 = vld [vmem:[#allocation3 + $0x120] sm:$0xff] }
 0x216   :  { %4688 = vmatprep.subr.msk.bf16.mxu0 %vm10984_vm1, %v9932_v51  ;;  %vm10989_vm12 = vmpackc.low %vm10986_vm0, %vm10988_vm5  ;;  %vm11000_vm0 = vnez %v10386_v62  ;;  %vm11002_vm5 = vnez %v11001_v4  ;;  %v1524_v58 = vld [vmem:[#allocation3 + $0x160] sm:$0xff]  ;;  %v11011_v62 = vld [vmem:[#allocation174_spill] sm:$0xff] }
 0x217   :  { %4663 = vmatpush3.bf16.msk.msra.mxu1 %vm10989_vm12, %v9932_v51  ;;  %3061 = vmatmul.mubr.bf16.vlgmr.msra.gmra.mrb[96].mxu0 %v3812_v46  ;;  %vm10994_vm7 = vmpackc.low %vm10991_vm14, %vm10993_vm4  ;;  %v11004_v61 = vld [vmem:[#allocation172_spill] sm:$0xff]  ;;  %v11006_v2 = vld [vmem:[#allocation171_spill] sm:$0xff]  ;;  %v3845_v36 = vcombine.high %v1516_v17, %v1524_v58  ;;  %v3844_v57 = vcombine.low %v1516_v17, %v1524_v58 }
 0x218   :  { %4728 = vmatprep.subr.msk.bf16.mxu1 %vm10994_vm7, %v9932_v51  ;;  %vm10999_vm1 = vmpackc.low %vm10996_vm3, %vm10998_vm9  ;;  %3068 = vmatprep.mubr.bf16.mxu0 %v3829_v54  ;;  %vm11005_vm14 = vnez %v11004_v61  ;;  %vm11007_vm4 = vnez %v11006_v2  ;;  %v11009_v41 = vld [vmem:[#allocation175_spill] sm:$0xff]  ;;  %vm11012_vm9 = vnez %v11011_v62  ;;  %v11014_v53 = vld [vmem:[#allocation177_spill] sm:$0xff] }
 0x219   :  { %4689 = vmatpush3.bf16.msk.msra.mxu0 %vm10999_vm1, %v9932_v51  ;;  %vm11003_vm12 = vmpackc.low %vm11000_vm0, %vm11002_vm5  ;;  %vm11010_vm3 = vnez %v11009_v41  ;;  %vm11015_vm0 = vnez %v11014_v53  ;;  %v11016_v49 = vld [vmem:[#allocation176_spill] sm:$0xff]  ;;  %v11019_v10 = vld [vmem:[#allocation181_spill] sm:$0xff] }
 0x21a   :  { %4690 = vmatprep.subr.msk.bf16.mxu0 %vm11003_vm12, %v9932_v51  ;;  %3126 = vmatmul.mubr.bf16.vlgmr.msra.gmra.mrb[96].mxu1 %v3814_v3  ;;  %vm11008_vm7 = vmpackc.low %vm11005_vm14, %vm11007_vm4  ;;  %vm11017_vm5 = vnez %v11016_v49  ;;  %v1517_v47 = vld [vmem:[#allocation3 + $0x128] sm:$0xff]  ;;  %vm11020_vm14 = vnez %v11019_v10  ;;  %v11024_v33 = vld [vmem:[#allocation179_spill] sm:$0xff] }
 0x21b   :  { %4729 = vmatpush3.bf16.msk.msra.mxu1 %vm11008_vm7, %v9932_v51  ;;  %3133 = vmatprep.mubr.bf16.mxu1 %v3831_v11  ;;  %vm11013_vm1 = vmpackc.low %vm11010_vm3, %vm11012_vm9  ;;  %v1525_v60 = vld [vmem:[#allocation3 + $0x168] sm:$0xff]  ;;  %vm11025_vm3 = vnez %v11024_v33  ;;  %v11026_v18 = vld [vmem:[#allocation178_spill] sm:$0xff] }
 0x21c   :  { %4730 = vmatprep.subr.msk.bf16.mxu1 %vm11013_vm1, %v9932_v51  ;;  %vm11018_vm12 = vmpackc.low %vm11015_vm0, %vm11017_vm5  ;;  %v11021_v29 = vld [vmem:[#allocation180_spill] sm:$0xff]  ;;  %vm11027_vm9 = vnez %v11026_v18  ;;  %v3847_v22 = vcombine.high %v1517_v47, %v1525_v60  ;;  %v11029_v28 = vld [vmem:[#allocation183_spill] sm:$0xff]  ;;  %v3846_v48 = vcombine.low %v1517_v47, %v1525_v60 }
 0x21d   :  { %4691 = vmatpush3.bf16.msk.msra.mxu0 %vm11018_vm12, %v9932_v51  ;;  %vm11022_vm4 = vnez %v11021_v29  ;;  %vm11028_vm1 = vmpackc.low %vm11025_vm3, %vm11027_vm9  ;;  %vm11030_vm0 = vnez %v11029_v28  ;;  %v11031_v14 = vld [vmem:[#allocation182_spill] sm:$0xff]  ;;  %v11034_v24 = vld [vmem:[#allocation185_spill] sm:$0xff] }
 0x21e   :  { %vm11023_vm7 = vmpackc.low %vm11020_vm14, %vm11022_vm4  ;;  %vm11032_vm5 = vnez %v11031_v14  ;;  %vm11035_vm14 = vnez %v11034_v24  ;;  %v11036_v26 = vld [vmem:[#allocation184_spill] sm:$0xff]  ;;  %v11039_v23 = vld [vmem:[#allocation189_spill] sm:$0xff] }
 0x21f   :  { %4692 = vmatprep.subr.msk.bf16.mxu0 %vm11023_vm7, %v9932_v51  ;;  %4731 = vmatpush3.bf16.msk.msra.mxu1 %vm11028_vm1, %v9932_v51  ;;  %vm11033_vm12 = vmpackc.low %vm11030_vm0, %vm11032_vm5  ;;  %vm11037_vm4 = vnez %v11036_v26  ;;  %vm11040_vm3 = vnez %v11039_v23  ;;  %v11041_v55 = vld [vmem:[#allocation188_spill] sm:$0xff]  ;;  %v11044_v20 = vld [vmem:[#allocation187_spill] sm:$0xff] }
 0x220   :  { %3069 = vmatmul.mubr.bf16.gmra.mrb[100].mxu0 %v3828_v37  ;;  %4732 = vmatprep.subr.msk.bf16.mxu1 %vm11033_vm12, %v9932_v51  ;;  %vm11038_vm7 = vmpackc.low %vm11035_vm14, %vm11037_vm4  ;;  %vm11042_vm9 = vnez %v11041_v55  ;;  %v1532_v42 = vld [vmem:[#allocation3 + $0x1a0] sm:$0xff]  ;;  %vm11045_vm0 = vnez %v11044_v20  ;;  %v11046_v31 = vld [vmem:[#allocation186_spill] sm:$0xff] }
 0x221   :  { %4693 = vmatpush3.bf16.msk.msra.mxu0 %vm11038_vm7, %v9932_v51  ;;  %vm11043_vm1 = vmpackc.low %vm11040_vm3, %vm11042_vm9  ;;  %3076 = vmatprep.mubr.bf16.mxu0 %v3845_v36  ;;  %v1540_v43 = vld [vmem:[#allocation3 + $0x1e0] sm:$0xff]  ;;  %vm11047_vm5 = vnez %v11046_v31  ;;  %v11051_v34 = vld [vmem:[#allocation190_spill] sm:$0xff] }
 0x222   :  { %4694 = vmatprep.subr.msk.bf16.mxu0 %vm11043_vm1, %v9932_v51  ;;  %3134 = vmatmul.mubr.bf16.gmra.mrb[100].mxu1 %v3830_v25  ;;  %vm11048_vm12 = vmpackc.low %vm11045_vm0, %vm11047_vm5  ;;  %v11049_v32 = vld [vmem:[#allocation191_spill] sm:$0xff]  ;;  %vm11052_vm4 = vnez %v11051_v34  ;;  %v11054_v5 = vld [vmem:[#allocation193_spill] sm:$0xff]  ;;  %v3861_v44 = vcombine.high %v1532_v42, %v1540_v43  ;;  %v4304_v4 = vpop.f32.mrb[32].mxu0  ;;  %v3860_v61 = vcombine.low %v1532_v42, %v1540_v43 }
 0x223   :  { %4733 = vmatpush3.bf16.msk.msra.mxu1 %vm11048_vm12, %v9932_v51  ;;  %3141 = vmatprep.mubr.bf16.mxu1 %v3847_v22  ;;  %vm11050_vm14 = vnez %v11049_v32  ;;  %vm11055_vm3 = vnez %v11054_v5  ;;  %v11056_v46 = vld [vmem:[#allocation192_spill] sm:$0xff]  ;;  %v11059_v40 = vld [vmem:[#allocation197_spill] sm:$0xff]  ;;  %v11064_v50 = vld [vmem:[#allocation195_spill] sm:$0xff]  ;;  %v4305_v2 = vpop.f32.mrb[33].mxu0 }
 0x224   :  { %vm11053_vm7 = vmpackc.low %vm11050_vm14, %vm11052_vm4  ;;  %vm11057_vm9 = vnez %v11056_v46  ;;  %v1533_v59 = vld [vmem:[#allocation3 + $0x1a8] sm:$0xff]  ;;  %vm11060_vm0 = vnez %v11059_v40  ;;  %vm11065_vm14 = vnez %v11064_v50  ;;  %v11066_v52 = vld [vmem:[#allocation194_spill] sm:$0xff]  ;;  %v4306_v60 = vadd.f32 %v4305_v2, %v4304_v4  ;;  %v4307_v10 = vpop.f32.mrb[34].mxu0 }
 0x225   :  { %4734 = vmatprep.subr.msk.bf16.mxu1 %vm11053_vm7, %v9932_v51  ;;  %vm11058_vm1 = vmpackc.low %vm11055_vm3, %vm11057_vm9  ;;  %v1541_v7 = vld [vmem:[#allocation3 + $0x1e8] sm:$0xff]  ;;  %vm11067_vm4 = vnez %v11066_v52  ;;  %v11069_v3 = vld [vmem:[#allocation199_spill] sm:$0xff]  ;;  %v4344_v33 = vpop.f32.mrb[32].mxu1  ;;  %v4308_v18 = vpop.f32.mrb[35].mxu0 }
 0x226   :  { %4695 = vmatpush3.bf16.msk.msra.mxu0 %vm11058_vm1, %v9932_v51  ;;  %v11061_v27 = vld [vmem:[#allocation196_spill] sm:$0xff]  ;;  %vm11068_vm7 = vmpackc.low %vm11065_vm14, %vm11067_vm4  ;;  %v3863_v54 = vcombine.high %v1533_v59, %v1541_v7  ;;  %vm11070_vm3 = vnez %v11069_v3  ;;  %v11071_v0 = vld [vmem:[#allocation198_spill] sm:$0xff]  ;;  %v3862_v22 = vcombine.low %v1533_v59, %v1541_v7  ;;  %v2223_v28 = vadd.f32 %v4306_v60, %v8467_v56  ;;  %v4345_v14 = vpop.f32.mrb[33].mxu1 }
 0x227   :  { %vm11062_vm5 = vnez %v11061_v27  ;;  %4735 = vmatpush3.bf16.msk.msra.mxu1 %vm11068_vm7, %v9932_v51  ;;  %vm11072_vm9 = vnez %v11071_v0  ;;  %v11074_v35 = vld [vmem:[#allocation201_spill] sm:$0xff]  ;;  %v11076_v11 = vld [vmem:[#allocation200_spill] sm:$0xff]  ;;  %v11084_v17 = vld [vmem:[#allocation203_spill] sm:$0xff]  ;;  %v4309_v24 = vadd.f32 %v4308_v18, %v4307_v10  ;;  %v4346_v42 = vadd.f32 %v4345_v14, %v4344_v33  ;;  %v4347_v43 = vpop.f32.mrb[34].mxu1 }
 0x228   :  { %vm11063_vm12 = vmpackc.low %vm11060_vm0, %vm11062_vm5  ;;  %3077 = vmatmul.mubr.bf16.gmra.mrb[104].mxu0 %v3844_v57  ;;  %vm11075_vm0 = vnez %v11074_v35  ;;  %vm11077_vm5 = vnez %v11076_v11  ;;  %v11079_v6 = vld [vmem:[#allocation205_spill] sm:$0xff]  ;;  %v11081_v8 = vld [vmem:[#allocation204_spill] sm:$0xff]  ;;  %v4348_v34 = vpop.f32.mrb[35].mxu1 }
 0x229   :  { %4696 = vmatprep.subr.msk.bf16.mxu0 %vm11063_vm12, %v9932_v51  ;;  %vm11073_vm1 = vmpackc.low %vm11070_vm3, %vm11072_vm9  ;;  %vm11080_vm14 = vnez %v11079_v6  ;;  %vm11082_vm4 = vnez %v11081_v8  ;;  %3084 = vmatprep.mubr.bf16.mxu0 %v3861_v44  ;;  %v1486_v21 = vld [vmem:[#allocation3 + $0x30] sm:$0xff]  ;;  %vm11085_vm3 = vnez %v11084_v17  ;;  %v11089_v37 = vld [vmem:[#allocation207_spill] sm:$0xff]  ;;  %v2226_v32 = vadd.f32 %v4309_v24, %v8475_v12 }
 0x22a   :  { %4736 = vmatprep.subr.msk.bf16.mxu1 %vm11073_vm1, %v9932_v51  ;;  %vm11078_vm12 = vmpackc.low %vm11075_vm0, %vm11077_vm5  ;;  %3142 = vmatmul.mubr.bf16.gmra.mrb[104].mxu1 %v3846_v48  ;;  %v1494_v13 = vld [vmem:[#allocation3 + $0x70] sm:$0xff]  ;;  %vm11090_vm0 = vnez %v11089_v37  ;;  %v11096_v53 = vld [vmem:[#allocation208_spill] sm:$0xff]  ;;  %v9067_v59 = vadd.f32 %v4346_v42, %v2223_v28  ;;  %v4349_v7 = vadd.f32 %v4348_v34, %v4347_v43  ;;  %v4310_v40 = vpop.f32.mrb[36].mxu0 }
 0x22b   :  { %4697 = vmatpush3.bf16.msk.msra.mxu0 %vm11078_vm12, %v9932_v51  ;;  %vm11083_vm7 = vmpackc.low %vm11080_vm14, %vm11082_vm4  ;;  %v11086_v58 = vld [vmem:[#allocation202_spill] sm:$0xff]  ;;  %3149 = vmatprep.mubr.bf16.mxu1 %v3863_v54  ;;  %v11094_v62 = vld [vmem:[#allocation209_spill] sm:$0xff]  ;;  %vm11097_vm4 = vnez %v11096_v53  ;;  %v3817_v25 = vcombine.high %v1486_v21, %v1494_v13  ;;  %v4311_v44 = vpop.f32.mrb[37].mxu0 }
 0x22c   :  { %4698 = vmatprep.subr.msk.bf16.mxu0 %vm11083_vm7, %v9932_v51  ;;  %vm11087_vm9 = vnez %v11086_v58  ;;  %v11091_v41 = vld [vmem:[#allocation206_spill] sm:$0xff]  ;;  %vm11095_vm14 = vnez %v11094_v62  ;;  %v11099_v29 = vld [vmem:[#allocation213_spill] sm:$0xff]  ;;  %v11101_v36 = vld [vmem:[#allocation212_spill] sm:$0xff]  ;;  %v4312_v11 = vadd.f32 %v4311_v44, %v4310_v40  ;;  %v4313_v6 = vpop.f32.mrb[38].mxu0 }
 0x22d   :  { %vm11088_vm1 = vmpackc.low %vm11085_vm3, %vm11087_vm9  ;;  %vm11092_vm5 = vnez %v11091_v41  ;;  %v1487_v49 = vld [vmem:[#allocation3 + $0x38] sm:$0xff]  ;;  %vm11100_vm3 = vnez %v11099_v29  ;;  %vm11102_vm9 = vnez %v11101_v36  ;;  %v11114_v56 = vld [vmem:[#allocation217_spill] sm:$0xff]  ;;  %v4350_v8 = vpop.f32.mrb[36].mxu1 }
 0x22e   :  { %4737 = vmatpush3.bf16.msk.msra.mxu1 %vm11088_vm1, %v9932_v51  ;;  %vm11093_vm12 = vmpackc.low %vm11090_vm0, %vm11092_vm5  ;;  %v1495_v47 = vld [vmem:[#allocation3 + $0x78] sm:$0xff]  ;;  %v11116_v57 = vld [vmem:[#allocation216_spill] sm:$0xff]  ;;  %v2231_v4 = vadd.f32 %v4312_v11, %v8521_v38  ;;  %v4351_v17 = vpop.f32.mrb[37].mxu1 }
 0x22f   :  { %4738 = vmatprep.subr.msk.bf16.mxu1 %vm11093_vm12, %v9932_v51  ;;  %vm11098_vm7 = vmpackc.low %vm11095_vm14, %vm11097_vm4  ;;  %v11104_v26 = vld [vmem:[#allocation211_spill] sm:$0xff]  ;;  %v11106_v23 = vld [vmem:[#allocation210_spill] sm:$0xff]  ;;  %v3819_v55 = vcombine.high %v1487_v49, %v1495_v47  ;;  %v4352_v2 = vadd.f32 %v4351_v17, %v4350_v8  ;;  %v4353_v37 = vpop.f32.mrb[38].mxu1 }
 0x230   :  { %4699 = vmatpush3.bf16.msk.msra.mxu0 %vm11098_vm7, %v9932_v51  ;;  %vm11103_vm1 = vmpackc.low %vm11100_vm3, %vm11102_vm9  ;;  %vm11105_vm0 = vnez %v11104_v26  ;;  %vm11107_vm5 = vnez %v11106_v23  ;;  %v11109_v20 = vld [vmem:[#allocation215_spill] sm:$0xff]  ;;  %v11111_v31 = vld [vmem:[#allocation214_spill] sm:$0xff]  ;;  %vm11115_vm3 = vnez %v11114_v56  ;;  %vm11117_vm9 = vnez %v11116_v57  ;;  %v4354_v62 = vpop.f32.mrb[39].mxu1 }
 0x231   :  { %4700 = vmatprep.subr.msk.bf16.mxu0 %vm11103_vm1, %v9932_v51  ;;  %vm11108_vm12 = vmpackc.low %vm11105_vm0, %vm11107_vm5  ;;  %3085 = vmatmul.mubr.bf16.gmra.mrb[108].mxu0 %v3860_v61  ;;  %vm11110_vm14 = vnez %v11109_v20  ;;  %vm11112_vm4 = vnez %v11111_v31  ;;  %vm11119_vm0 = vnez %v10528_v39  ;;  %vm11120_vm5 = vnez %v10526_v19  ;;  %v1502_v5 = vld [vmem:[#allocation3 + $0xb0] sm:$0xff]  ;;  %v11122_v27 = vld [vmem:[#allocation219_spill] sm:$0xff] }
 0x232   :  { %4739 = vmatpush3.bf16.msk.msra.mxu1 %vm11108_vm12, %v9932_v51  ;;  %vm11113_vm7 = vmpackc.low %vm11110_vm14, %vm11112_vm4  ;;  %3190 = vmatprep.mubr.bf16.mxu0 %v3817_v25  ;;  %v1510_v46 = vld [vmem:[#allocation3 + $0xf0] sm:$0xff]  ;;  %vm11123_vm14 = vnez %v11122_v27  ;;  %v3816_v39 = vcombine.low %v1486_v21, %v1494_v13  ;;  %v9075_v19 = vadd.f32 %v4349_v7, %v2226_v32  ;;  %v1503_v0 = vld [vmem:[#allocation3 + $0xb8] sm:$0xff]  ;;  %v4314_v21 = vpop.f32.mrb[39].mxu0  ;;  %v3818_v13 = vcombine.low %v1487_v49, %v1495_v47 }
 0x233   :  { %4740 = vmatprep.subr.msk.bf16.mxu1 %vm11113_vm7, %v9932_v51  ;;  %vm11118_vm1 = vmpackc.low %vm11115_vm3, %vm11117_vm9  ;;  %3150 = vmatmul.mubr.bf16.gmra.mrb[108].mxu1 %v3862_v22  ;;  %v11124_v12 = vld [vmem:[#allocation218_spill] sm:$0xff]  ;;  %v3833_v3 = vcombine.high %v1502_v5, %v1510_v46  ;;  %v4315_v58 = vadd.f32 %v4314_v21, %v4313_v6  ;;  %v9097_v38 = vadd.f32 %v4352_v2, %v2231_v4  ;;  %v4316_v60 = vpop.f32.mrb[40].mxu0 }
 0x234   :  { %4701 = vmatpush3.bf16.msk.msra.mxu0 %vm11118_vm1, %v9932_v51  ;;  %vm11121_vm12 = vmpackc.low %vm11119_vm0, %vm11120_vm5  ;;  %vm11125_vm4 = vnez %v11124_v12  ;;  %3255 = vmatprep.mubr.bf16.mxu1 %v3819_v55  ;;  %v1511_v35 = vld [vmem:[#allocation3 + $0xf8] sm:$0xff]  ;;  %v1518_v53 = vld [vmem:[#allocation3 + $0x130] sm:$0xff]  ;;  %v4355_v47 = vadd.f32 %v4354_v62, %v4353_v37  ;;  %v3832_v1 = vcombine.low %v1502_v5, %v1510_v46 }
 0x235   :  { %4702 = vmatprep.subr.msk.bf16.mxu0 %vm11121_vm12, %v9932_v51  ;;  %vm11126_vm7 = vmpackc.low %vm11123_vm14, %vm11125_vm4  ;;  %v3835_v61 = vcombine.high %v1503_v0, %v1511_v35  ;;  %v2234_v41 = vadd.f32 %v4315_v58, %v8529_v15  ;;  %v1526_v49 = vld [vmem:[#allocation3 + $0x170] sm:$0xff]  ;;  %v1519_v29 = vld [vmem:[#allocation3 + $0x138] sm:$0xff]  ;;  %v4356_v18 = vpop.f32.mrb[40].mxu1  ;;  %v3834_v22 = vcombine.low %v1503_v0, %v1511_v35 }
 0x236   :  { %4741 = vmatpush3.bf16.msk.msra.mxu1 %vm11126_vm7, %v9932_v51  ;;  %vm11131_vm3 = vmpackc.low %vm8243_vm11, %vm8237_vm13  ;;  %v3849_v10 = vcombine.high %v1518_v53, %v1526_v49  ;;  %v1527_v36 = vld [vmem:[#allocation3 + $0x178] sm:$0xff]  ;;  %v4357_v14 = vpop.f32.mrb[41].mxu1  ;;  %v1534_v20 = vld [vmem:[#allocation3 + $0x1b0] sm:$0xff]  ;;  %v3848_v34 = vcombine.low %v1518_v53, %v1526_v49  ;;  %vm3324_vm11 = vcmask 523264  }
 0x237   :  { %4742 = vmatprep.subr.msk.bf16.mxu1 %vm3802_vm2, %v9932_v51  ;;  %vm11132_vm6 = vmpackc.low %vm8265_vm10, %vm8261_vm15  ;;  %v9099_v9 = vadd.f32 %v4355_v47, %v2234_v41  ;;  %v3851_v26 = vcombine.high %v1519_v29, %v1527_v36  ;;  %v4358_v23 = vadd.f32 %v4357_v14, %v4356_v18  ;;  %v4359_v55 = vpop.f32.mrb[42].mxu1  ;;  %v1542_v31 = vld [vmem:[#allocation3 + $0x1f0] sm:$0xff]  ;;  %v1535_v7 = vld [vmem:[#allocation3 + $0x1b8] sm:$0xff]  ;;  %v3850_v44 = vcombine.low %v1519_v29, %v1527_v36 }
 0x238   :  { %4703 = vmatpush3.bf16.msk.msra.mxu0 %vm11131_vm3, %v9932_v51  ;;  %v4360_v43 = vpop.f32.mrb[43].mxu1  ;;  %v3865_v46 = vcombine.high %v1534_v20, %v1542_v31  ;;  %v1543_v40 = vld [vmem:[#allocation3 + $0x1f8] sm:$0xff]  ;;  %v3864_v21 = vcombine.low %v1534_v20, %v1542_v31 }
 0x239   :  { %v4361_v57 = vadd.f32 %v4360_v43, %v4359_v55  ;;  %v3867_v54 = vcombine.high %v1535_v7, %v1543_v40  ;;  %v3866_v4 = vcombine.low %v1535_v7, %v1543_v40 }
 0x23a   :  { %4743 = vmatpush3.bf16.msk.msra.mxu1 %vm11132_vm6, %v9932_v51  ;;  %v4317_v51 = vpop.f32.mrb[41].mxu0 }
 0x23b   :  { %3191 = vmatmul.mubr.bf16.vlgmr.msra.gmra.mrb[112].mxu0 %v3816_v39  ;;  %v4318_v25 = vadd.f32 %v4317_v51, %v4316_v60  ;;  %v4319_v33 = vpop.f32.mrb[42].mxu0 }
 0x23c   :  { %3198 = vmatprep.mubr.bf16.mxu0 %v3833_v3  ;;  %v4320_v15 = vpop.f32.mrb[43].mxu0 }
 0x23d   :  { %3256 = vmatmul.mubr.bf16.vlgmr.msra.gmra.mrb[112].mxu1 %v3818_v13  ;;  %v2239_v28 = vadd.f32 %v4318_v25, %v8575_v30  ;;  %v4321_v24 = vadd.f32 %v4320_v15, %v4319_v33  ;;  %v4322_v32 = vpop.f32.mrb[44].mxu0  ;;  %v4362_v39 = vpop.f32.mrb[44].mxu1 }
 0x23e   :  { %3263 = vmatprep.mubr.bf16.mxu1 %v3835_v61  ;;  %v4323_v5 = vpop.f32.mrb[45].mxu0  ;;  %v4363_v50 = vpop.f32.mrb[45].mxu1 }
 0x23f   :  { %v2242_v42 = vadd.f32 %v4321_v24, %v8583_v63  ;;  %v9103_v56 = vadd.f32 %v4358_v23, %v2239_v28  ;;  %v4324_v27 = vadd.f32 %v4323_v5, %v4322_v32  ;;  %v4325_v12 = vpop.f32.mrb[46].mxu0  ;;  %v4364_v3 = vadd.f32 %v4363_v50, %v4362_v39  ;;  %v4365_v0 = vpop.f32.mrb[46].mxu1 }
 0x240   :  { %v4326_v63 = vpop.f32.mrb[47].mxu0  ;;  %v4366_v11 = vpop.f32.mrb[47].mxu1 }
 0x241   :  { %v9105_v30 = vadd.f32 %v4361_v57, %v2242_v42  ;;  %v2247_v48 = vadd.f32 %v4324_v27, %v8629_v45  ;;  %v4327_v52 = vadd.f32 %v4326_v63, %v4325_v12  ;;  %v4367_v8 = vadd.f32 %v4366_v11, %v4365_v0 }
 0x243   :  { %3199 = vmatmul.mubr.bf16.gmra.mrb[116].mxu0 %v3832_v1  ;;  %v2250_v35 = vadd.f32 %v4327_v52, %v8637_v16  ;;  %v9109_v6 = vadd.f32 %v4364_v3, %v2247_v48 }
 0x244   :  { %3206 = vmatprep.mubr.bf16.mxu0 %v3849_v10 }
 0x245   :  { %3264 = vmatmul.mubr.bf16.gmra.mrb[116].mxu1 %v3834_v22  ;;  %v9111_v13 = vadd.f32 %v4367_v8, %v2250_v35 }
 0x246   :  { %3271 = vmatprep.mubr.bf16.mxu1 %v3851_v26 }
 0x24b   :  { %3207 = vmatmul.mubr.bf16.gmra.mrb[120].mxu0 %v3848_v34 }
 0x24c   :  { %3214 = vmatprep.mubr.bf16.mxu0 %v3865_v46 }
 0x24d   :  { %3272 = vmatmul.mubr.bf16.gmra.mrb[120].mxu1 %v3850_v44 }
 0x24e   :  { %3279 = vmatprep.mubr.bf16.mxu1 %v3867_v54 }
 0x253   :  { %3215 = vmatmul.mubr.bf16.gmra.mrb[124].mxu0 %v3864_v21 }
 0x255   :  { %3280 = vmatmul.mubr.bf16.gmra.mrb[124].mxu1 %v3866_v4 }
 0x282   :  { %v4384_v45 = vpop.f32.mrb[48].mxu0 }
 0x283   :  { %v4385_v17 = vpop.f32.mrb[49].mxu0 }
 0x284   :  { %v4386_v58 = vadd.f32 %v4385_v17, %v4384_v45  ;;  %v4387_v61 = vpop.f32.mrb[50].mxu0 }
 0x285   :  { %v4388_v37 = vpop.f32.mrb[51].mxu0 }
 0x286   :  { %v4424_v2 = vpop.f32.mrb[48].mxu1  ;;  %v2353_v16 = vadd.f32 %v4386_v58, %v9067_v59  ;;  %v4389_v62 = vadd.f32 %v4388_v37, %v4387_v61 }
 0x287   :  { %v4425_v41 = vpop.f32.mrb[49].mxu1 }
 0x288   :  { %v4426_v53 = vadd.f32 %v4425_v41, %v4424_v2  ;;  %v4427_v49 = vpop.f32.mrb[50].mxu1  ;;  %v2356_v47 = vadd.f32 %v4389_v62, %v9075_v19 }
 0x289   :  { %v4428_v60 = vpop.f32.mrb[51].mxu1 }
 0x28a   :  { %v2418_v1 = vadd.f32 %v4426_v53, %v2353_v16  ;;  %v4429_v51 = vadd.f32 %v4428_v60, %v4427_v49  ;;  %v4390_v10 = vpop.f32.mrb[52].mxu0 }
 0x28b   :  { %v4391_v36 = vpop.f32.mrb[53].mxu0 }
 0x28c   :  { %v2421_v29 = vadd.f32 %v4429_v51, %v2356_v47  ;;  %v4392_v25 = vadd.f32 %v4391_v36, %v4390_v10  ;;  %v4393_v33 = vpop.f32.mrb[54].mxu0 }
 0x28d   :  { %v4394_v15 = vpop.f32.mrb[55].mxu0 }
 0x28e   :  { %v4430_v18 = vpop.f32.mrb[52].mxu1  ;;  %v2361_v22 = vadd.f32 %v4392_v25, %v9097_v38  ;;  %v4395_v59 = vadd.f32 %v4394_v15, %v4393_v33  ;;  %v3296_v25 = vld [vmem:[%s9222_s4] sm:$0xff]  ;;  %v3298_v33 = vld [vmem:[%s9222_s4 + $0x10] sm:$0xff] }
 0x28f   :  { %v4431_v28 = vpop.f32.mrb[53].mxu1  ;;  %4796 = vmatprep.mubr.msk.f32.mxu0 %vm3324_vm11, %v3296_v25  ;;  %4799 = vmatprep.mubr.msk.f32.mxu1 %vm3324_vm11, %v3298_v33 }
 0x290   :  { %v4432_v14 = vadd.f32 %v4431_v28, %v4430_v18  ;;  %v4433_v24 = vpop.f32.mrb[54].mxu1  ;;  %v2364_v26 = vadd.f32 %v4395_v59, %v9099_v9  ;;  %v3300_v59 = vld [vmem:[%s9223_s5] sm:$0xff] }
 0x291   :  { %v4434_v23 = vpop.f32.mrb[55].mxu1 }
 0x292   :  { %v9117_v19 = vadd.f32 %v4432_v14, %v2361_v22  ;;  %v4435_v55 = vadd.f32 %v4434_v23, %v4433_v24  ;;  %v4396_v42 = vpop.f32.mrb[56].mxu0  ;;  %v3302_v14 = vld [vmem:[%s9223_s5 + $0x10] sm:$0xff] }
 0x293   :  { %v4397_v20 = vpop.f32.mrb[57].mxu0 }
 0x294   :  { %v9119_v43 = vadd.f32 %v4435_v55, %v2364_v26  ;;  %v4398_v31 = vadd.f32 %v4397_v20, %v4396_v42  ;;  %v4399_v57 = vpop.f32.mrb[58].mxu0  ;;  %v4914_v55 = vmov 0  }
 0x295   :  { %v4400_v34 = vpop.f32.mrb[59].mxu0  ;;  %4833 = vset.pattern.permute.xlu0 %v4914_v55  ;;  %4834 = vset.pattern.permute.xlu1 %v4914_v55 }
 0x296   :  { %v4436_v32 = vpop.f32.mrb[56].mxu1  ;;  %v2369_v38 = vadd.f32 %v4398_v31, %v9103_v56  ;;  %v4401_v46 = vadd.f32 %v4400_v34, %v4399_v57  ;;  %3306 = vperm.xlu0 %4833, %v3300_v59   ;;  %3316 = vperm.xlu1 %4834, %v3302_v14  }
 0x297   :  { %v4437_v5 = vpop.f32.mrb[57].mxu1 }
 0x298   :  { %v4438_v7 = vadd.f32 %v4437_v5, %v4436_v32  ;;  %v4439_v40 = vpop.f32.mrb[58].mxu1  ;;  %v2372_v9 = vadd.f32 %v4401_v46, %v9105_v30  ;;  %v3301_v32 = vld [vmem:[%s9223_s5 + $0x8] sm:$0xff] }
 0x299   :  { %v4440_v27 = vpop.f32.mrb[59].mxu1 }
 0x29a   :  { %v9123_v12 = vadd.f32 %v4438_v7, %v2369_v38  ;;  %v4441_v39 = vadd.f32 %v4440_v27, %v4439_v40  ;;  %v4402_v63 = vpop.f32.mrb[60].mxu0  ;;  %3311 = vperm.xlu0 %4833, %v3301_v32   ;;  %v3427_v27 = vld [vmem:[%s9224_s6 + $0x8] sm:$0xff] }
 0x29b   :  { %v4403_v48 = vpop.f32.mrb[61].mxu0 }
 0x29c   :  { %v9125_v44 = vadd.f32 %v4441_v39, %v2372_v9  ;;  %v4404_v50 = vadd.f32 %v4403_v48, %v4402_v63  ;;  %v4405_v52 = vpop.f32.mrb[62].mxu0  ;;  %v3426_v9 = vld [vmem:[%s9224_s6] sm:$0xff] }
 0x29d   :  { %v4406_v3 = vpop.f32.mrb[63].mxu0 }
 0x29e   :  { %v4442_v54 = vpop.f32.mrb[60].mxu1  ;;  %v2377_v56 = vadd.f32 %v4404_v50, %v9109_v6  ;;  %v4407_v35 = vadd.f32 %v4406_v3, %v4405_v52  ;;  %3432 = vperm.xlu0 %4833, %v3426_v9  }
 0x29f   :  { %v4443_v0 = vpop.f32.mrb[61].mxu1 }
 0x2a0   :  { %v4444_v11 = vadd.f32 %v4443_v0, %v4442_v54  ;;  %v4445_v8 = vpop.f32.mrb[62].mxu1  ;;  %v2380_v30 = vadd.f32 %v4407_v35, %v9111_v13  ;;  %v3428_v35 = vld [vmem:[%s9224_s6 + $0x10] sm:$0xff] }
 0x2a1   :  { %v4446_v21 = vpop.f32.mrb[63].mxu1 }
 0x2a2   :  { %v9129_v4 = vadd.f32 %v4444_v11, %v2377_v56  ;;  %v4447_v45 = vadd.f32 %v4446_v21, %v4445_v8  ;;  %v3429_v11 = vld [vmem:[%s9224_s6 + $0x18] sm:$0xff]  ;;  %3442 = vperm.xlu0 %4833, %v3428_v35  }
 0x2a4   :  { %v4464_v17 = vpop.f32.mrb[64].mxu0  ;;  %v9131_v58 = vadd.f32 %v4447_v45, %v2380_v30 }
 0x2a5   :  { %v4465_v61 = vpop.f32.mrb[65].mxu0 }
 0x2a6   :  { %v4466_v2 = vadd.f32 %v4465_v61, %v4464_v17  ;;  %v4467_v37 = vpop.f32.mrb[66].mxu0  ;;  %v4504_v16 = vpop.f32.mrb[64].mxu1 }
 0x2a7   :  { %v4468_v41 = vpop.f32.mrb[67].mxu0  ;;  %v4505_v6 = vpop.f32.mrb[65].mxu1 }
 0x2a8   :  { %v2803_v62 = vadd.f32 %v4466_v2, %v2418_v1  ;;  %v4469_v53 = vadd.f32 %v4468_v41, %v4467_v37  ;;  %v4506_v49 = vadd.f32 %v4505_v6, %v4504_v16  ;;  %v4507_v47 = vpop.f32.mrb[66].mxu1 }
 0x2a9   :  { %v4508_v51 = vpop.f32.mrb[67].mxu1 }
 0x2aa   :  { %v2806_v60 = vadd.f32 %v4469_v53, %v2421_v29  ;;  %v9133_v13 = vadd.f32 %v4506_v49, %v2803_v62  ;;  %v4509_v10 = vadd.f32 %v4508_v51, %v4507_v47 }
 0x2ac   :  { %v4470_v36 = vpop.f32.mrb[68].mxu0  ;;  %v9141_v1 = vadd.f32 %v4509_v10, %v2806_v60 }
 0x2ad   :  { %v4471_v18 = vpop.f32.mrb[69].mxu0 }
 0x2ae   :  { %v4472_v29 = vadd.f32 %v4471_v18, %v4470_v36  ;;  %v4473_v15 = vpop.f32.mrb[70].mxu0  ;;  %v4510_v22 = vpop.f32.mrb[68].mxu1 }
 0x2af   :  { %v4474_v28 = vpop.f32.mrb[71].mxu0  ;;  %v4511_v26 = vpop.f32.mrb[69].mxu1 }
 0x2b0   :  { %v2811_v24 = vadd.f32 %v4472_v29, %v9117_v19  ;;  %v4475_v23 = vadd.f32 %v4474_v28, %v4473_v15  ;;  %v4512_v42 = vadd.f32 %v4511_v26, %v4510_v22  ;;  %v4513_v20 = vpop.f32.mrb[70].mxu1  ;;  %v3303_v19 = vld [vmem:[%s9223_s5 + $0x18] sm:$0xff] }
 0x2b1   :  { %v4514_v57 = vpop.f32.mrb[71].mxu1  ;;  %3321 = vperm.xlu1 %4834, %v3303_v19  }
 0x2b2   :  { %v2814_v31 = vadd.f32 %v4475_v23, %v9119_v43  ;;  %v9159_v34 = vadd.f32 %v4512_v42, %v2811_v24  ;;  %v4515_v38 = vadd.f32 %v4514_v57, %v4513_v20 }
 0x2b4   :  { %v4476_v5 = vpop.f32.mrb[72].mxu0  ;;  %v9161_v46 = vadd.f32 %v4515_v38, %v2814_v31 }
 0x2b5   :  { %v4477_v7 = vpop.f32.mrb[73].mxu0  ;;  %3437 = vperm.xlu1 %4834, %v3427_v27  }
 0x2b6   :  { %v4478_v40 = vadd.f32 %v4477_v7, %v4476_v5  ;;  %v4479_v43 = vpop.f32.mrb[74].mxu0  ;;  %v4516_v39 = vpop.f32.mrb[72].mxu1 }
 0x2b7   :  { %v4480_v63 = vpop.f32.mrb[75].mxu0  ;;  %v4517_v50 = vpop.f32.mrb[73].mxu1 }
 0x2b8   :  { %v2819_v48 = vadd.f32 %v4478_v40, %v9123_v12  ;;  %v4481_v52 = vadd.f32 %v4480_v63, %v4479_v43  ;;  %v4518_v54 = vadd.f32 %v4517_v50, %v4516_v39  ;;  %v4519_v3 = vpop.f32.mrb[74].mxu1 }
 0x2b9   :  { %v4520_v0 = vpop.f32.mrb[75].mxu1  ;;  %3447 = vperm.xlu1 %4834, %v3429_v11  }
 0x2ba   :  { %v2822_v56 = vadd.f32 %v4481_v52, %v9125_v44  ;;  %v2884_v8 = vadd.f32 %v4518_v54, %v2819_v48  ;;  %v4521_v30 = vadd.f32 %v4520_v0, %v4519_v3 }
 0x2bc   :  { %v4482_v12 = vpop.f32.mrb[76].mxu0  ;;  %v2887_v21 = vadd.f32 %v4521_v30, %v2822_v56 }
 0x2bd   :  { %v4483_v45 = vpop.f32.mrb[77].mxu0 }
 0x2be   :  { %v4484_v17 = vadd.f32 %v4483_v45, %v4482_v12  ;;  %v4485_v61 = vpop.f32.mrb[78].mxu0  ;;  %v4522_v2 = vpop.f32.mrb[76].mxu1 }
 0x2bf   :  { %v4486_v44 = vpop.f32.mrb[79].mxu0  ;;  %v4523_v16 = vpop.f32.mrb[77].mxu1 }
 0x2c0   :  { %v2827_v37 = vadd.f32 %v4484_v17, %v9129_v4  ;;  %v4487_v41 = vadd.f32 %v4486_v44, %v4485_v61  ;;  %v4524_v62 = vadd.f32 %v4523_v16, %v4522_v2  ;;  %v4525_v6 = vpop.f32.mrb[78].mxu1 }
 0x2c1   :  { %v4526_v49 = vpop.f32.mrb[79].mxu1 }
 0x2c2   :  { %v2830_v53 = vadd.f32 %v4487_v41, %v9131_v58  ;;  %v2892_v47 = vadd.f32 %v4524_v62, %v2827_v37  ;;  %v4527_v60 = vadd.f32 %v4526_v49, %v4525_v6 }
 0x2c4   :  { %v4544_v51 = vpop.f32.mrb[80].mxu0  ;;  %v2895_v10 = vadd.f32 %v4527_v60, %v2830_v53 }
 0x2c5   :  { %v4545_v36 = vpop.f32.mrb[81].mxu0 }
 0x2c6   :  { %v4546_v25 = vadd.f32 %v4545_v36, %v4544_v51  ;;  %v4547_v33 = vpop.f32.mrb[82].mxu0 }
 0x2c7   :  { %v4584_v18 = vpop.f32.mrb[80].mxu1  ;;  %v4548_v29 = vpop.f32.mrb[83].mxu0 }
 0x2c8   :  { %v2933_v15 = vadd.f32 %v4546_v25, %v9133_v13  ;;  %v4585_v22 = vpop.f32.mrb[81].mxu1  ;;  %v4549_v4 = vadd.f32 %v4548_v29, %v4547_v33 }
 0x2c9   :  { %v4586_v28 = vadd.f32 %v4585_v22, %v4584_v18  ;;  %v4587_v59 = vpop.f32.mrb[82].mxu1 }
 0x2ca   :  { %v2936_v14 = vadd.f32 %v4549_v4, %v9141_v1  ;;  %v4588_v24 = vpop.f32.mrb[83].mxu1 }
 0x2cb   :  { %v2998_v58 = vadd.f32 %v4586_v28, %v2933_v15  ;;  %v4589_v26 = vadd.f32 %v4588_v24, %v4587_v59 }
 0x2cc   :  { %v4550_v23 = vpop.f32.mrb[84].mxu0 }
 0x2cd   :  { %v3001_v55 = vadd.f32 %v4589_v26, %v2936_v14  ;;  %v4551_v42 = vpop.f32.mrb[85].mxu0 }
 0x2ce   :  { %v4552_v20 = vadd.f32 %v4551_v42, %v4550_v23  ;;  %v4553_v31 = vpop.f32.mrb[86].mxu0 }
 0x2cf   :  { %v4590_v57 = vpop.f32.mrb[84].mxu1  ;;  %v4554_v32 = vpop.f32.mrb[87].mxu0 }
 0x2d0   :  { %v2941_v19 = vadd.f32 %v4552_v20, %v9159_v34  ;;  %v4591_v38 = vpop.f32.mrb[85].mxu1  ;;  %v4555_v13 = vadd.f32 %v4554_v32, %v4553_v31 }
 0x2d1   :  { %v4592_v5 = vadd.f32 %v4591_v38, %v4590_v57  ;;  %v4593_v7 = vpop.f32.mrb[86].mxu1 }
 0x2d2   :  { %v2944_v40 = vadd.f32 %v4555_v13, %v9161_v46  ;;  %v4594_v43 = vpop.f32.mrb[87].mxu1 }
 0x2d3   :  { %v3006_v1 = vadd.f32 %v4592_v5, %v2941_v19  ;;  %v4595_v9 = vadd.f32 %v4594_v43, %v4593_v7 }
 0x2d5   :  { %v4556_v27 = vpop.f32.mrb[88].mxu0  ;;  %v3009_v39 = vadd.f32 %v4595_v9, %v2944_v40 }
 0x2d6   :  { %v4557_v63 = vpop.f32.mrb[89].mxu0 }
 0x2d7   :  { %v4558_v48 = vadd.f32 %v4557_v63, %v4556_v27  ;;  %v4559_v50 = vpop.f32.mrb[90].mxu0 }
 0x2d8   :  { %v4596_v52 = vpop.f32.mrb[88].mxu1  ;;  %v4560_v54 = vpop.f32.mrb[91].mxu0 }
 0x2d9   :  { %v2949_v3 = vadd.f32 %v4558_v48, %v2884_v8  ;;  %v4597_v56 = vpop.f32.mrb[89].mxu1  ;;  %v4561_v0 = vadd.f32 %v4560_v54, %v4559_v50 }
 0x2da   :  { %v4598_v34 = vadd.f32 %v4597_v56, %v4596_v52  ;;  %v4599_v35 = vpop.f32.mrb[90].mxu1 }
 0x2db   :  { %v2952_v11 = vadd.f32 %v4561_v0, %v2887_v21  ;;  %v4600_v30 = vpop.f32.mrb[91].mxu1 }
 0x2dc   :  { %v3014_v12 = vadd.f32 %v4598_v34, %v2949_v3  ;;  %v4601_v45 = vadd.f32 %v4600_v30, %v4599_v35 }
 0x2de   :  { %v4562_v46 = vpop.f32.mrb[92].mxu0  ;;  %v3017_v17 = vadd.f32 %v4601_v45, %v2952_v11 }
 0x2df   :  { %v4563_v61 = vpop.f32.mrb[93].mxu0 }
 0x2e0   :  { %v4564_v2 = vadd.f32 %v4563_v61, %v4562_v46  ;;  %v4565_v44 = vpop.f32.mrb[94].mxu0  ;;  %v4602_v37 = vpop.f32.mrb[92].mxu1 }
 0x2e1   :  { %v4566_v16 = vpop.f32.mrb[95].mxu0  ;;  %v4603_v62 = vpop.f32.mrb[93].mxu1 }
 0x2e2   :  { %v2957_v41 = vadd.f32 %v4564_v2, %v2892_v47  ;;  %v4567_v6 = vadd.f32 %v4566_v16, %v4565_v44  ;;  %v4604_v53 = vadd.f32 %v4603_v62, %v4602_v37  ;;  %v4605_v8 = vpop.f32.mrb[94].mxu1 }
 0x2e3   :  { %v4606_v60 = vpop.f32.mrb[95].mxu1 }
 0x2e4   :  { %v2960_v49 = vadd.f32 %v4567_v6, %v2895_v10  ;;  %v3022_v51 = vadd.f32 %v4604_v53, %v2957_v41  ;;  %v4607_v36 = vadd.f32 %v4606_v60, %v4605_v8 }
 0x2e6   :  { %v3025_v25 = vadd.f32 %v4607_v36, %v2960_v49 }
 0x2ea   :  { %v4624_v21 = vpop.f32.mrb[96].mxu0 }
 0x2eb   :  { %v4625_v33 = vpop.f32.mrb[97].mxu0 }
 0x2ec   :  { %v4626_v18 = vadd.f32 %v4625_v33, %v4624_v21  ;;  %v4627_v29 = vpop.f32.mrb[98].mxu0 }
 0x2ed   :  { %v4664_v15 = vpop.f32.mrb[96].mxu1  ;;  %v4628_v22 = vpop.f32.mrb[99].mxu0 }
 0x2ee   :  { %v3063_v4 = vadd.f32 %v4626_v18, %v2998_v58  ;;  %v4665_v28 = vpop.f32.mrb[97].mxu1  ;;  %v4629_v59 = vadd.f32 %v4628_v22, %v4627_v29 }
 0x2ef   :  { %v4666_v14 = vadd.f32 %v4665_v28, %v4664_v15  ;;  %v4667_v47 = vpop.f32.mrb[98].mxu1 }
 0x2f0   :  { %v3066_v24 = vadd.f32 %v4629_v59, %v3001_v55  ;;  %v4668_v26 = vpop.f32.mrb[99].mxu1 }
 0x2f1   :  { %v3128_v23 = vadd.f32 %v4666_v14, %v3063_v4  ;;  %v4669_v42 = vadd.f32 %v4668_v26, %v4667_v47 }
 0x2f3   :  { %v4630_v10 = vpop.f32.mrb[100].mxu0  ;;  %v3131_v20 = vadd.f32 %v4669_v42, %v3066_v24 }
 0x2f4   :  { %v4631_v31 = vpop.f32.mrb[101].mxu0 }
 0x2f5   :  { %v4632_v57 = vadd.f32 %v4631_v31, %v4630_v10  ;;  %v4633_v32 = vpop.f32.mrb[102].mxu0  ;;  %v4670_v19 = vpop.f32.mrb[100].mxu1 }
 0x2f6   :  { %v4634_v38 = vpop.f32.mrb[103].mxu0  ;;  %v4671_v5 = vpop.f32.mrb[101].mxu1 }
 0x2f7   :  { %v3071_v13 = vadd.f32 %v4632_v57, %v3006_v1  ;;  %v4635_v7 = vadd.f32 %v4634_v38, %v4633_v32  ;;  %v4672_v40 = vadd.f32 %v4671_v5, %v4670_v19  ;;  %v4673_v58 = vpop.f32.mrb[102].mxu1 }
 0x2f8   :  { %v4674_v9 = vpop.f32.mrb[103].mxu1 }
 0x2f9   :  { %v3074_v43 = vadd.f32 %v4635_v7, %v3009_v39  ;;  %v3136_v27 = vadd.f32 %v4672_v40, %v3071_v13  ;;  %v4675_v63 = vadd.f32 %v4674_v9, %v4673_v58 }
 0x2fb   :  { %v4636_v55 = vpop.f32.mrb[104].mxu0  ;;  %v3139_v48 = vadd.f32 %v4675_v63, %v3074_v43 }
 0x2fc   :  { %v4637_v50 = vpop.f32.mrb[105].mxu0 }
 0x2fd   :  { %v4638_v52 = vadd.f32 %v4637_v50, %v4636_v55  ;;  %v4639_v54 = vpop.f32.mrb[106].mxu0  ;;  %v4676_v3 = vpop.f32.mrb[104].mxu1 }
 0x2fe   :  { %v4640_v56 = vpop.f32.mrb[107].mxu0  ;;  %v4677_v34 = vpop.f32.mrb[105].mxu1 }
 0x2ff   :  { %v3079_v0 = vadd.f32 %v4638_v52, %v3014_v12  ;;  %v4641_v35 = vadd.f32 %v4640_v56, %v4639_v54  ;;  %v4678_v11 = vadd.f32 %v4677_v34, %v4676_v3  ;;  %v4679_v1 = vpop.f32.mrb[106].mxu1 }
 0x300   :  { %v4680_v45 = vpop.f32.mrb[107].mxu1 }
 0x301   :  { %v3082_v30 = vadd.f32 %v4641_v35, %v3017_v17  ;;  %v9183_v46 = vadd.f32 %v4678_v11, %v3079_v0  ;;  %v4681_v39 = vadd.f32 %v4680_v45, %v4679_v1 }
 0x303   :  { %v9185_v2 = vadd.f32 %v4681_v39, %v3082_v30 }
 0x304   :  { %v4642_v61 = vpop.f32.mrb[108].mxu0 }
 0x305   :  { %v4643_v44 = vpop.f32.mrb[109].mxu0 }
 0x306   :  { %v4644_v37 = vadd.f32 %v4643_v44, %v4642_v61  ;;  %v4645_v16 = vpop.f32.mrb[110].mxu0  ;;  %v4682_v41 = vpop.f32.mrb[108].mxu1 }
 0x307   :  { %v4646_v62 = vpop.f32.mrb[111].mxu0  ;;  %v4683_v53 = vpop.f32.mrb[109].mxu1 }
 0x308   :  { %v3087_v6 = vadd.f32 %v4644_v37, %v3022_v51  ;;  %v4647_v12 = vadd.f32 %v4646_v62, %v4645_v16  ;;  %v4684_v8 = vadd.f32 %v4683_v53, %v4682_v41  ;;  %v4685_v49 = vpop.f32.mrb[110].mxu1 }
 0x309   :  { %v4686_v36 = vpop.f32.mrb[111].mxu1 }
 0x30a   :  { %v3090_v60 = vadd.f32 %v4647_v12, %v3025_v25  ;;  %v9187_v17 = vadd.f32 %v4684_v8, %v3087_v6  ;;  %v4687_v21 = vadd.f32 %v4686_v36, %v4685_v49 }
 0x30c   :  { %v9189_v18 = vadd.f32 %v4687_v21, %v3090_v60 }
 0x30e   :  { %v4704_v33 = vpop.f32.mrb[112].mxu0 }
 0x30f   :  { %v4705_v29 = vpop.f32.mrb[113].mxu0 }
 0x310   :  { %v4706_v15 = vadd.f32 %v4705_v29, %v4704_v33  ;;  %v4707_v22 = vpop.f32.mrb[114].mxu0  ;;  %v4744_v4 = vpop.f32.mrb[112].mxu1 }
 0x311   :  { %v4708_v28 = vpop.f32.mrb[115].mxu0  ;;  %v4745_v14 = vpop.f32.mrb[113].mxu1 }
 0x312   :  { %v3193_v59 = vadd.f32 %v4706_v15, %v3128_v23  ;;  %v4709_v51 = vadd.f32 %v4708_v28, %v4707_v22  ;;  %v4746_v47 = vadd.f32 %v4745_v14, %v4744_v4  ;;  %v4747_v24 = vpop.f32.mrb[114].mxu1 }
 0x313   :  { %v4748_v42 = vpop.f32.mrb[115].mxu1 }
 0x314   :  { %v3196_v26 = vadd.f32 %v4709_v51, %v3131_v20  ;;  %v3258_v25 = vadd.f32 %v4746_v47, %v3193_v59  ;;  %v4749_v10 = vadd.f32 %v4748_v42, %v4747_v24 }
 0x316   :  { %v4710_v31 = vpop.f32.mrb[116].mxu0  ;;  %v3261_v57 = vadd.f32 %v4749_v10, %v3196_v26  ;;  %v3288_v13 = vmax.f32 %v3258_v25, 0.0  ;;  %v3307_v10 = vpop.permute.xlu0 %3306 }
 0x317   :  { %v4711_v32 = vpop.f32.mrb[117].mxu0 }
 0x318   :  { %v4712_v19 = vadd.f32 %v4711_v32, %v4710_v31  ;;  %v4713_v38 = vpop.f32.mrb[118].mxu0  ;;  %v3289_v5 = vmax.f32 %v3261_v57, 0.0  ;;  %v4750_v7 = vpop.f32.mrb[116].mxu1 }
 0x319   :  { %v4714_v40 = vpop.f32.mrb[119].mxu0  ;;  %v4751_v43 = vpop.f32.mrb[117].mxu1 }
 0x31a   :  { %v3201_v58 = vadd.f32 %v4712_v19, %v3136_v27  ;;  %v4715_v23 = vadd.f32 %v4714_v40, %v4713_v38  ;;  %v4802_v9 = vpack.c.bf16 %v3289_v5, %v3288_v13  ;;  %v4752_v63 = vadd.f32 %v4751_v43, %v4750_v7  ;;  %v4753_v55 = vpop.f32.mrb[118].mxu1  ;;  %v3317_v31 = vpop.permute.xlu1 %3316 }
 0x31b   :  { %v4754_v20 = vpop.f32.mrb[119].mxu1  ;;  %v3312_v57 = vpop.permute.xlu0 %3311 }
 0x31c   :  { %v3204_v50 = vadd.f32 %v4715_v23, %v3139_v48  ;;  %v3266_v52 = vadd.f32 %v4752_v63, %v3201_v58  ;;  %v4755_v54 = vadd.f32 %v4754_v20, %v4753_v55  ;;  %4803 = vmatprep.subr.bf16.mxu0 %v4802_v9  ;;  %4818 = vmatprep.subr.bf16.mxu1 %v4802_v9 }
 0x31d   :  { %4805 = vmatpush3.bf16.msra.mxu0 %v4802_v9  ;;  %4822 = vmatpush3.bf16.msra.mxu1 %v4802_v9 }
 0x31e   :  { %v4716_v3 = vpop.f32.mrb[120].mxu0  ;;  %v3269_v56 = vadd.f32 %v4755_v54, %v3204_v50  ;;  %v3290_v11 = vmax.f32 %v3266_v52, 0.0 }
 0x31f   :  { %v4717_v0 = vpop.f32.mrb[121].mxu0  ;;  %v3433_v19 = vpop.permute.xlu0 %3432 }
 0x320   :  { %v4718_v34 = vadd.f32 %v4717_v0, %v4716_v3  ;;  %v4719_v35 = vpop.f32.mrb[122].mxu0  ;;  %v3291_v27 = vmax.f32 %v3269_v56, 0.0  ;;  %v4756_v1 = vpop.f32.mrb[120].mxu1 }
 0x321   :  { %v4720_v30 = vpop.f32.mrb[123].mxu0  ;;  %v4757_v39 = vpop.f32.mrb[121].mxu1 }
 0x322   :  { %v3209_v45 = vadd.f32 %v4718_v34, %v9183_v46  ;;  %v4721_v48 = vadd.f32 %v4720_v30, %v4719_v35  ;;  %v4806_v61 = vpack.c.bf16 %v3291_v27, %v3290_v11  ;;  %v4758_v44 = vadd.f32 %v4757_v39, %v4756_v1  ;;  %v4759_v37 = vpop.f32.mrb[122].mxu1 }
 0x323   :  { %v4760_v41 = vpop.f32.mrb[123].mxu1  ;;  %v3443_v3 = vpop.permute.xlu0 %3442 }
 0x324   :  { %v3212_v16 = vadd.f32 %v4721_v48, %v9185_v2  ;;  %v3274_v62 = vadd.f32 %v4758_v44, %v3209_v45  ;;  %v4761_v6 = vadd.f32 %v4760_v41, %v4759_v37  ;;  %4807 = vmatprep.subr.bf16.mxu0 %v4806_v61  ;;  %4819 = vmatprep.subr.bf16.mxu1 %v4806_v61 }
 0x325   :  { %4809 = vmatpush3.bf16.msra.mxu0 %v4806_v61  ;;  %4823 = vmatpush3.bf16.msra.mxu1 %v4806_v61  ;;  %v3464_v61 = vstv %s9225_s7 }
 0x326   :  { %v4722_v53 = vpop.f32.mrb[124].mxu0  ;;  %v3277_v12 = vadd.f32 %v4761_v6, %v3212_v16  ;;  %v3292_v46 = vmax.f32 %v3274_v62, 0.0 }
 0x327   :  { %v4723_v8 = vpop.f32.mrb[125].mxu0 }
 0x328   :  { %v4724_v49 = vadd.f32 %v4723_v8, %v4722_v53  ;;  %v4725_v60 = vpop.f32.mrb[126].mxu0  ;;  %v3293_v36 = vmax.f32 %v3277_v12, 0.0  ;;  %v4762_v21 = vpop.f32.mrb[124].mxu1 }
 0x329   :  { %v4726_v33 = vpop.f32.mrb[127].mxu0  ;;  %v4763_v15 = vpop.f32.mrb[125].mxu1 }
 0x32a   :  { %v3217_v29 = vadd.f32 %v4724_v49, %v9187_v17  ;;  %v4727_v2 = vadd.f32 %v4726_v33, %v4725_v60  ;;  %v4810_v22 = vpack.c.bf16 %v3293_v36, %v3292_v46  ;;  %v4764_v4 = vadd.f32 %v4763_v15, %v4762_v21  ;;  %v4765_v28 = vpop.f32.mrb[126].mxu1  ;;  %v3297_v17 = vld [vmem:[%s9222_s4 + $0x8] sm:$0xff] }
 0x32b   :  { %v4766_v14 = vpop.f32.mrb[127].mxu1 }
 0x32c   :  { %v3220_v59 = vadd.f32 %v4727_v2, %v9189_v18  ;;  %v3282_v51 = vadd.f32 %v4764_v4, %v3217_v29  ;;  %v4767_v47 = vadd.f32 %v4766_v14, %v4765_v28  ;;  %4811 = vmatprep.subr.bf16.mxu0 %v4810_v22  ;;  %4820 = vmatprep.subr.bf16.mxu1 %v4810_v22  ;;  %v3299_v18 = vld [vmem:[%s9222_s4 + $0x18] sm:$0xff] }
 0x32d   :  { %4813 = vmatpush3.bf16.msra.mxu0 %v4810_v22  ;;  %4824 = vmatpush3.bf16.msra.mxu1 %v4810_v22 }
 0x32e   :  { %v3285_v24 = vadd.f32 %v4767_v47, %v3220_v59  ;;  %v3294_v26 = vmax.f32 %v3282_v51, 0.0 }
 0x330   :  { %v3295_v42 = vmax.f32 %v3285_v24, 0.0  ;;  %v3322_v32 = vpop.permute.xlu1 %3321 }
 0x332   :  { %v4814_v25 = vpack.c.bf16 %v3295_v42, %v3294_v26 }
 0x334   :  { %4815 = vmatprep.subr.bf16.mxu0 %v4814_v25  ;;  %4821 = vmatprep.subr.bf16.mxu1 %v4814_v25  ;;  %v3438_v9 = vpop.permute.xlu1 %3437 }
 0x335   :  { %4817 = vmatpush3.bf16.msra.mxu0 %v4814_v25  ;;  %4825 = vmatpush3.bf16.msra.mxu1 %v4814_v25 }
 0x338   :  { %4797 = vmatmul.mubr.msk.f32.vlgmr.msra.gmra.mrb[128].mxu0 %vm3324_vm11, %v3297_v17  ;;  %4800 = vmatmul.mubr.msk.f32.vlgmr.msra.gmra.mrb[128].mxu1 %vm3324_vm11, %v3299_v18  ;;  %v3448_v34 = vpop.permute.xlu1 %3447 }
 0x40b   :  { %v4798_v38 = vpop.f32.mrb[128].mxu0  ;;  %v4801_v13 = vpop.f32.mrb[128].mxu1 }
 0x40c   :  { %v3409_v5 = vadd.f32 %v4798_v38, %v3312_v57  ;;  %v3403_v7 = vpop.f32.mrb[129].mxu0  ;;  %v3413_v40 = vpop.f32.mrb[129].mxu1  ;;  %v3419_v58 = vadd.f32 %v4801_v13, %v3322_v32 }
 0x40d   :  { %v3404_v43 = vadd.f32 %v3403_v7, %v3307_v10  ;;  %v3414_v23 = vadd.f32 %v3413_v40, %v3317_v31 }
 0x40e   :  { %v3423_v63 = vmax.f32 %v3409_v5, 0.0  ;;  %v3425_v52 = vmax.f32 %v3419_v58, 0.0 }
 0x40f   :  { %v3422_v55 = vmax.f32 %v3404_v43, 0.0  ;;  %v3424_v50 = vmax.f32 %v3414_v23, 0.0 }
 0x410   :  { %v3451_v20 = vmul.f32 %v3438_v9, %v3423_v63  ;;  %v3453_v35 = vmul.f32 %v3448_v34, %v3425_v52 }
 0x411   :  { %v3450_v54 = vmul.f32 %v3433_v19, %v3422_v55  ;;  %v3452_v0 = vmul.f32 %v3443_v3, %v3424_v50 }
 0x413   :  { %v3454_v56 = vadd.f32 %v3451_v20, %v3450_v54 }
 0x415   :  { %v3455_v11 = vadd.f32 %v3454_v56, %v3452_v0 }
 0x417   :  { %v3456_v27 = vadd.f32 %v3455_v11, %v3453_v35 }
 0x419   :  { %v3457_v1 = vrot.slane %v3456_v27, 4 }
 0x41b   :  { %v3458_v30 = vadd.f32 %v3457_v1, %v3456_v27 }
 0x41d   :  { %v3459_v45 = vrot.slane %v3458_v30, 2 }
 0x41f   :  { %v3460_v39 = vadd.f32 %v3459_v45, %v3458_v30 }
 0x421   :  { %v3461_v48 = vrot.slane %v3460_v39, 1 }
 0x423   :  { %v3462_v44 = vadd.f32 %v3461_v48, %v3460_v39 }
 0x425   :  { %v3465_v37 = vadd.f32 %v3464_v61, %v3462_v44 }
 0x427   :  { %3466 = vst [vmem:[#allocation8] sm:$0x1] %v3465_v37 }
 0x428   :  { %4892 = shalt.err (!%p4889_p6)
}
 0x429   :  { %s4893_s16 = scalar_lea.hbm %s9226_s8, 16 }
 0x42a   :  { %p4894_p7 = scmp.ne.s32.totalorder %s9226_s8, %s4893_s16  ;;  %p4897_p8 = scmp.lt.u32.totalorder %s4893_s16, %s9226_s8 }
 0x42c   :  { %p4899_p9 = pnand %p4897_p8, %p4894_p7 }
 0x42e   :  { %4902 = shalt.err (!%p4899_p9)
}
 0x42f   :  { %3476 = dma.vmem_to_hbm [thread:$0]  %s3474_s12, 16, %s9226_s8, [#allocation5]  }
 0x430   :  { %4907 = dma.done.wait [#allocation5], 16  }
 0x431   :  { %4908 = vsyncadd [#allocation5], 4294967280 }
 0x432   :  { %3480 = vsyncpa [#allocation4], 1 }
 0x433   :  { %3481 = vsyncpa [#allocation7], 1 }
 0x434   :  { %3482 = vsyncpa [#allocation5], 1 }

</bundles_post_ra>
